<compile_context>
chip_gen: v7x
topology: tpu7x:2x2x1
jax: 0.10.0
libtpu: 0.0.40
codegen_flags: <defaults>
</compile_context>

<pallas_src>
import functools

import jax
import jax.numpy as jnp
from jax.experimental import pallas as pl
from jax.experimental.pallas import tpu as pltpu

# ----------------------------- model hyper-params (small) -------------------
IMG_SIZE = 16
PATCH = 8
IMG_CH = 3
VIS_WIDTH = 32
VIS_HEADS = 2
VIS_LAYERS = 2

CTX_LEN = 8
VOCAB = 64
TXT_WIDTH = 32
TXT_HEADS = 2
TXT_LAYERS = 2

EMBED_DIM = 16
TEMPERATURE = 0.07

_LN_EPS = 1e-5
_NEG = -1e9


# ----------------------------- BlockSpec helpers ----------------------------
def _const_spec(shape):
    """Full-array block, always block (0,...,0) (weights).  *_ absorbs prefetch refs."""
    nd = len(shape)
    return pl.BlockSpec(shape, lambda *_: (0,) * nd)


def _batch_spec(shape):
    """Per-batch block: index only the leading (batch) axis."""
    nd = len(shape)
    return pl.BlockSpec(shape, lambda b, *_: (b,) + (0,) * (nd - 1))


# ----------------------------- in-kernel math helpers ------------------------
def _ln(v, g, b, eps=_LN_EPS):
    """LayerNorm over the last axis; v (S, D) f32, g/b (1, D) f32."""
    mu = jnp.mean(v, axis=-1, keepdims=True)
    var = jnp.mean(jnp.square(v - mu), axis=-1, keepdims=True)
    return (v - mu) * jax.lax.rsqrt(var + eps) * g + b


def _run_layers(x, bias, heads, layers,
                ln1_g, ln1_b, qkv_w, qkv_b, proj_w, proj_b,
                ln2_g, ln2_b, fc_w, fc_b, cproj_w, cproj_b):
    """Residual attention blocks.  x: (S, D) f32 value; weights are (L, ...) refs."""
    f32 = jnp.float32
    S, D = x.shape
    Dh = D // heads
    scale = 1.0 / float(Dh) ** 0.5
    for l in range(layers):                                   # static, weights stay VMEM-resident
        # ---------------- attention branch ----------------
        h = _ln(x, ln1_g[l], ln1_b[l])
        qkv = jnp.dot(h, qkv_w[l], preferred_element_type=f32) + qkv_b[l]   # (S, 3D)
        pw = proj_w[l]                                                      # (D, D)
        attn = jnp.zeros((S, D), f32)
        for hh in range(heads):                               # static, unrolled
            q = qkv[:, hh * Dh:(hh + 1) * Dh]
            k = qkv[:, D + hh * Dh:D + (hh + 1) * Dh]
            v = qkv[:, 2 * D + hh * Dh:2 * D + (hh + 1) * Dh]
            # q @ k^T without an explicit transpose (NT dot_general)
            s = jax.lax.dot_general(q, k, (((1,), (1,)), ((), ())),
                                    preferred_element_type=f32) * scale + bias
            s = s - jnp.max(s, axis=-1, keepdims=True)
            p = jnp.exp(s)
            p = p * pl.reciprocal(jnp.sum(p, axis=-1, keepdims=True), approx=True)
            o_h = jnp.dot(p, v, preferred_element_type=f32)                 # (S, Dh)
            # fold this head's slice of the output projection (avoids a lane concat)
            attn = attn + jnp.dot(o_h, pw[hh * Dh:(hh + 1) * Dh, :],
                                  preferred_element_type=f32)
        x = x + attn + proj_b[l]
        # ---------------- MLP branch ----------------
        h2 = _ln(x, ln2_g[l], ln2_b[l])
        h2 = jnp.dot(h2, fc_w[l], preferred_element_type=f32) + fc_b[l]
        h2 = h2 * jax.nn.sigmoid(1.702 * h2)                  # QuickGELU
        h2 = jnp.dot(h2, cproj_w[l], preferred_element_type=f32) + cproj_b[l]
        x = x + h2
    return x


# ----------------------------- fused image encoder ---------------------------
def _vision_kernel(patch_ref, conv_w_ref, base_ref, lnpre_g_ref, lnpre_b_ref,
                   ln1_g, ln1_b, qkv_w, qkv_b, proj_w, proj_b,
                   ln2_g, ln2_b, fc_w, fc_b, cproj_w, cproj_b,
                   lnpost_g_ref, lnpost_b_ref, proj_out_ref,
                   o_ref, *, layers, heads, n_valid):
    f32 = jnp.float32
    # patch embedding = matmul (conv with kernel==stride==patch, bias=False);
    # row 0 (CLS slot) and padded tail rows of patch_ref are zero.
    x = jnp.dot(patch_ref[0].astype(f32), conv_w_ref[...],
                preferred_element_type=f32) + base_ref[...]    # + (CLS emb + pos emb)
    x = _ln(x, lnpre_g_ref[...], lnpre_b_ref[...])             # ln_pre
    S = x.shape[0]
    # key-padding bias, built ONCE before the layer loop (padded tokens masked out)
    k_pos = jax.lax.broadcasted_iota(jnp.int32, (S, S), 1)
    bias = jnp.where(k_pos >= n_valid, jnp.float32(_NEG), jnp.float32(0.0))
    x = _run_layers(x, bias, heads, layers,
                    ln1_g, ln1_b, qkv_w, qkv_b, proj_w, proj_b,
                    ln2_g, ln2_b, fc_w, fc_b, cproj_w, cproj_b)
    cls = _ln(x[0:1, :], lnpost_g_ref[...], lnpost_b_ref[...])  # CLS pooling + ln_post
    o_ref[0] = jnp.dot(cls, proj_out_ref[...],
                       preferred_element_type=f32).astype(o_ref.dtype)


def encode_image(images, vpk):
    """images: (B, C, H, W) NCHW -> (B, EMBED_DIM). Single fused pallas_call."""
    B = images.shape[0]
    P, C = PATCH, IMG_CH
    Gh = IMG_SIZE // P
    NP = Gh * Gh
    D = VIS_WIDTH
    S_real = NP + 1                       # CLS + patches
    S_pad = max(8, -(-S_real // 8) * 8)   # pad token axis to a sublane multiple
    CPP = C * P * P
    L = VIS_LAYERS

    # patchify (glue): NCHW -> (B, NP, C*P*P), channel-major per patch (matches conv weight);
    # row 0 reserved for CLS, tail rows zero-padded (masked out of attention in-kernel).
    x = images.reshape(B, C, Gh, P, Gh, P)
    x = x.transpose(0, 2, 4, 1, 3, 5).reshape(B, NP, CPP)
    x = jnp.pad(x, ((0, 0), (1, S_pad - S_real), (0, 0)))

    blk = vpk["blocks"]
    out = pl.pallas_call(
        functools.partial(_vision_kernel, layers=L, heads=VIS_HEADS, n_valid=S_real),
        out_shape=jax.ShapeDtypeStruct((B, 1, EMBED_DIM), jnp.float32),
        grid_spec=pltpu.PrefetchScalarGridSpec(
            num_scalar_prefetch=0,
            grid=(B,),
            in_specs=[
                _batch_spec((1, S_pad, CPP)),
                _const_spec((CPP, D)),
                _const_spec((S_pad, D)),
                _const_spec((1, D)), _const_spec((1, D)),                    # ln_pre
                _const_spec((L, 1, D)), _const_spec((L, 1, D)),              # ln1
                _const_spec((L, D, 3 * D)), _const_spec((L, 1, 3 * D)),      # qkv
                _const_spec((L, D, D)), _const_spec((L, 1, D)),              # out proj
                _const_spec((L, 1, D)), _const_spec((L, 1, D)),              # ln2
                _const_spec((L, D, 4 * D)), _const_spec((L, 1, 4 * D)),      # mlp fc
                _const_spec((L, 4 * D, D)), _const_spec((L, 1, D)),          # mlp c_proj
                _const_spec((1, D)), _const_spec((1, D)),                    # ln_post
                _const_spec((D, EMBED_DIM)),                                 # visual proj
            ],
            out_specs=_batch_spec((1, 1, EMBED_DIM)),
        ),
        compiler_params=pltpu.CompilerParams(dimension_semantics=("parallel",)),
    )(x, vpk["conv_w"], vpk["base"], vpk["ln_pre_g"], vpk["ln_pre_b"],
      blk["ln1_g"], blk["ln1_b"], blk["qkv_w"], blk["qkv_b"],
      blk["proj_w"], blk["proj_b"],
      blk["ln2_g"], blk["ln2_b"], blk["fc_w"], blk["fc_b"],
      blk["cproj_w"], blk["cproj_b"],
      vpk["ln_post_g"], vpk["ln_post_b"], vpk["proj"])
    return out[:, 0, :]


# ----------------------------- fused text encoder ----------------------------
def _text_kernel(eot_ref, tok_ref, tok_emb_ref, pos_ref,
                 ln1_g, ln1_b, qkv_w, qkv_b, proj_w, proj_b,
                 ln2_g, ln2_b, fc_w, fc_b, cproj_w, cproj_b,
                 lnf_g_ref, lnf_b_ref, tproj_ref,
                 o_ref, *, layers, heads, vocab):
    f32 = jnp.float32
    b = pl.program_id(0)
    tok = tok_ref[0]                                           # (S, 1) int32
    S = tok.shape[0]
    # token embedding as a one-hot matmul (no XLA gather on the serial path)
    onehot = (jax.lax.broadcasted_iota(jnp.int32, (S, vocab), 1) == tok).astype(f32)
    x = jnp.dot(onehot, tok_emb_ref[...], preferred_element_type=f32) + pos_ref[...]
    # causal bias, built ONCE before the layer loop
    q_pos = jax.lax.broadcasted_iota(jnp.int32, (S, S), 0)
    k_pos = jax.lax.broadcasted_iota(jnp.int32, (S, S), 1)
    bias = jnp.where(k_pos > q_pos, jnp.float32(_NEG), jnp.float32(0.0))
    x = _run_layers(x, bias, heads, layers,
                    ln1_g, ln1_b, qkv_w, qkv_b, proj_w, proj_b,
                    ln2_g, ln2_b, fc_w, fc_b, cproj_w, cproj_b)
    # EOT pooling via scalar-prefetched index -> one-hot row matmul
    e = eot_ref[b]
    sel = (jax.lax.broadcasted_iota(jnp.int32, (1, S), 1) == e).astype(f32)
    pooled = jnp.dot(sel, x, preferred_element_type=f32)       # (1, D)
    pooled = _ln(pooled, lnf_g_ref[...], lnf_b_ref[...])       # ln_final
    o_ref[0] = jnp.dot(pooled, tproj_ref[...],
                       preferred_element_type=f32).astype(o_ref.dtype)


def encode_text(tokens, tpk):
    """tokens: (B, S) int32 -> (B, EMBED_DIM). Single fused pallas_call."""
    B, S = tokens.shape
    D = TXT_WIDTH
    L = TXT_LAYERS
    eot = jnp.argmax(tokens, axis=-1).astype(jnp.int32)        # (B,) glue
    tok3 = tokens.astype(jnp.int32)[..., None]                 # (B, S, 1)
    blk = tpk["blocks"]
    out = pl.pallas_call(
        functools.partial(_text_kernel, layers=L, heads=TXT_HEADS, vocab=VOCAB),
        out_shape=jax.ShapeDtypeStruct((B, 1, EMBED_DIM), jnp.float32),
        grid_spec=pltpu.PrefetchScalarGridSpec(
            num_scalar_prefetch=1,                             # eot indices -> SMEM
            grid=(B,),
            in_specs=[
                _batch_spec((1, S, 1)),
                _const_spec((VOCAB, D)),
                _const_spec((S, D)),
                _const_spec((L, 1, D)), _const_spec((L, 1, D)),              # ln1
                _const_spec((L, D, 3 * D)), _const_spec((L, 1, 3 * D)),      # qkv
                _const_spec((L, D, D)), _const_spec((L, 1, D)),              # out proj
                _const_spec((L, 1, D)), _const_spec((L, 1, D)),              # ln2
                _const_spec((L, D, 4 * D)), _const_spec((L, 1, 4 * D)),      # mlp fc
                _const_spec((L, 4 * D, D)), _const_spec((L, 1, D)),          # mlp c_proj
                _const_spec((1, D)), _const_spec((1, D)),                    # ln_final
                _const_spec((D, EMBED_DIM)),                                 # text proj
            ],
            out_specs=_batch_spec((1, 1, EMBED_DIM)),
        ),
        compiler_params=pltpu.CompilerParams(dimension_semantics=("parallel",)),
    )(eot, tok3, tpk["tok_emb"], tpk["pos"],
      blk["ln1_g"], blk["ln1_b"], blk["qkv_w"], blk["qkv_b"],
      blk["proj_w"], blk["proj_b"],
      blk["ln2_g"], blk["ln2_b"], blk["fc_w"], blk["fc_b"],
      blk["cproj_w"], blk["cproj_b"],
      tpk["ln_final_g"], tpk["ln_final_b"], tpk["text_proj"])
    return out[:, 0, :]


# ----------------------------- forward ---------------------------------------
def clip_forward(images, tokens, packed_params):
    z_images = encode_image(images, packed_params["visual"])
    z_captions = encode_text(tokens, packed_params["text"])
    logit_scale = jnp.exp(packed_params["logit_scale"])
    return z_images, z_captions, logit_scale


# ----------------------------- parameter init & one-time packing -------------
def _init_block(key, D):
    ks = jax.random.split(key, 4)
    s = 0.02
    f32 = jnp.float32
    return dict(
        ln1_g=jnp.ones((D,), f32), ln1_b=jnp.zeros((D,), f32),
        qkv_w=(jax.random.normal(ks[0], (D, 3 * D)) * s).astype(f32),   # cols: [Q | K | V], head-major
        qkv_b=jnp.zeros((3 * D,), f32),
        proj_w=(jax.random.normal(ks[1], (D, D)) * s).astype(f32),
        proj_b=jnp.zeros((D,), f32),
        ln2_g=jnp.ones((D,), f32), ln2_b=jnp.zeros((D,), f32),
        fc_w=(jax.random.normal(ks[2], (D, 4 * D)) * s).astype(f32),
        fc_b=jnp.zeros((4 * D,), f32),
        cproj_w=(jax.random.normal(ks[3], (4 * D, D)) * s).astype(f32),
        cproj_b=jnp.zeros((D,), f32),
    )


def init_params(key):
    f32 = jnp.float32
    kv, kt = jax.random.split(key)
    kvs = jax.random.split(kv, 4 + VIS_LAYERS)
    num_patches = (IMG_SIZE // PATCH) ** 2
    Sv = num_patches + 1
    visual = dict(
        conv_w=(jax.random.normal(kvs[0], (IMG_CH * PATCH * PATCH, VIS_WIDTH)) * 0.02).astype(f32),
        cls=(jax.random.normal(kvs[1], (VIS_WIDTH,)) * 0.02).astype(f32),
        pos=(jax.random.normal(kvs[2], (Sv, VIS_WIDTH)) * 0.02).astype(f32),
        ln_pre_g=jnp.ones((VIS_WIDTH,), f32), ln_pre_b=jnp.zeros((VIS_WIDTH,), f32),
        ln_post_g=jnp.ones((VIS_WIDTH,), f32), ln_post_b=jnp.zeros((VIS_WIDTH,), f32),
        proj=(jax.random.normal(kvs[3], (VIS_WIDTH, EMBED_DIM)) * 0.02).astype(f32),
        blocks=[_init_block(kvs[4 + i], VIS_WIDTH) for i in range(VIS_LAYERS)],
    )
    kts = jax.random.split(kt, 3 + TXT_LAYERS)
    text = dict(
        tok_emb=(jax.random.normal(kts[0], (VOCAB, TXT_WIDTH)) * 0.02).astype(f32),
        pos=(jax.random.normal(kts[1], (CTX_LEN, TXT_WIDTH)) * 0.01).astype(f32),
        ln_final_g=jnp.ones((TXT_WIDTH,), f32), ln_final_b=jnp.zeros((TXT_WIDTH,), f32),
        text_proj=(jax.random.normal(kts[2], (TXT_WIDTH, EMBED_DIM)) * 0.02).astype(f32),
        blocks=[_init_block(kts[3 + i], TXT_WIDTH) for i in range(TXT_LAYERS)],
    )
    logit_scale = jnp.array(jnp.log(1.0 / TEMPERATURE), f32)   # log(1/temperature)
    return dict(visual=visual, text=text, logit_scale=logit_scale)


def _pack_blocks(blocks):
    """Stack per-layer block weights with a leading layer axis (done once)."""
    D = blocks[0]["ln1_g"].shape[0]
    def stack(name, shape):
        return jnp.stack([b[name].reshape(shape) for b in blocks], axis=0)
    return dict(
        ln1_g=stack("ln1_g", (1, D)), ln1_b=stack("ln1_b", (1, D)),
        qkv_w=stack("qkv_w", (D, 3 * D)), qkv_b=stack("qkv_b", (1, 3 * D)),
        proj_w=stack("proj_w", (D, D)), proj_b=stack("proj_b", (1, D)),
        ln2_g=stack("ln2_g", (1, D)), ln2_b=stack("ln2_b", (1, D)),
        fc_w=stack("fc_w", (D, 4 * D)), fc_b=stack("fc_b", (1, 4 * D)),
        cproj_w=stack("cproj_w", (4 * D, D)), cproj_b=stack("cproj_b", (1, D)),
    )


def pack_params(params):
    """One-time parameter re-layout, hoisted out of the jitted forward pass."""
    vp = params["visual"]
    D = VIS_WIDTH
    NP = (IMG_SIZE // PATCH) ** 2
    S_real = NP + 1
    S_pad = max(8, -(-S_real // 8) * 8)
    pos = jnp.pad(vp["pos"], ((0, S_pad - S_real), (0, 0)))
    cls_slab = jnp.concatenate(
        [vp["cls"].reshape(1, D), jnp.zeros((S_pad - 1, D), vp["cls"].dtype)], axis=0)
    visual = dict(
        conv_w=vp["conv_w"],
        base=cls_slab + pos,                                   # CLS emb + positional emb
        ln_pre_g=vp["ln_pre_g"].reshape(1, D), ln_pre_b=vp["ln_pre_b"].reshape(1, D),
        ln_post_g=vp["ln_post_g"].reshape(1, D), ln_post_b=vp["ln_post_b"].reshape(1, D),
        proj=vp["proj"],
        blocks=_pack_blocks(vp["blocks"]),
    )
    tp = params["text"]
    Dt = TXT_WIDTH
    text = dict(
        tok_emb=tp["tok_emb"],
        pos=tp["pos"],
        ln_final_g=tp["ln_final_g"].reshape(1, Dt), ln_final_b=tp["ln_final_b"].reshape(1, Dt),
        text_proj=tp["text_proj"],
        blocks=_pack_blocks(tp["blocks"]),
    )
    return dict(visual=visual, text=text, logit_scale=params["logit_scale"])


# TODO(synk): pretrained clip.load(...) checkpoint weights are not loadable here;
# parameters are deterministic synthetic initializations with matching structure.

if __name__ == "__main__":
    key = jax.random.PRNGKey(0)
    k_params, k_img, k_tok = jax.random.split(key, 3)
    params = init_params(k_params)
    packed = jax.tree_util.tree_map(lambda x: x, pack_params(params))  # packed once, outside jit

    images = jax.random.normal(k_img, (2, IMG_CH, IMG_SIZE, IMG_SIZE), jnp.float32)  # NCHW
    tokens = jax.random.randint(k_tok, (2, CTX_LEN), 1, VOCAB, dtype=jnp.int32)

    fwd = jax.jit(clip_forward)
    z_images, z_captions, logit_scale = fwd(images, tokens, packed)
    jax.block_until_ready((z_images, z_captions, logit_scale))

    assert z_images.shape == (2, EMBED_DIM)
    assert z_captions.shape == (2, EMBED_DIM)
    assert logit_scale.shape == ()
    print("KERNEL_OK")
</pallas_src>

<mosaic_0001>
module attributes {stable_mosaic.version = 11 : i64} {
  func.func @_vision_kernel(%arg0: i32, %arg1: memref<1x8x192xf32, #tpu.memory_space<vmem>>, %arg2: memref<192x32xf32, #tpu.memory_space<vmem>>, %arg3: memref<8x32xf32, #tpu.memory_space<vmem>>, %arg4: memref<1x32xf32, #tpu.memory_space<vmem>>, %arg5: memref<1x32xf32, #tpu.memory_space<vmem>>, %arg6: memref<2x1x32xf32, #tpu.memory_space<vmem>>, %arg7: memref<2x1x32xf32, #tpu.memory_space<vmem>>, %arg8: memref<2x32x96xf32, #tpu.memory_space<vmem>>, %arg9: memref<2x1x96xf32, #tpu.memory_space<vmem>>, %arg10: memref<2x32x32xf32, #tpu.memory_space<vmem>>, %arg11: memref<2x1x32xf32, #tpu.memory_space<vmem>>, %arg12: memref<2x1x32xf32, #tpu.memory_space<vmem>>, %arg13: memref<2x1x32xf32, #tpu.memory_space<vmem>>, %arg14: memref<2x32x128xf32, #tpu.memory_space<vmem>>, %arg15: memref<2x1x128xf32, #tpu.memory_space<vmem>>, %arg16: memref<2x128x32xf32, #tpu.memory_space<vmem>>, %arg17: memref<2x1x32xf32, #tpu.memory_space<vmem>>, %arg18: memref<1x32xf32, #tpu.memory_space<vmem>>, %arg19: memref<1x32xf32, #tpu.memory_space<vmem>>, %arg20: memref<32x16xf32, #tpu.memory_space<vmem>>, %arg21: memref<1x1x16xf32, #tpu.memory_space<vmem>>) attributes {dimension_semantics = [#tpu.dimension_semantics<parallel>], iteration_bounds = array<i64: 2>, scalar_prefetch = 0 : i64, scratch_operands = 0 : i64, tpu.core_type = #tpu.core_type<tc>, window_params = [{transform_indices = @transform_0, window_bounds = array<i64: 1, 8, 192>}, {pipeline_mode = #tpu.pipeline_mode<synchronous>, transform_indices = @transform_1, window_bounds = array<i64: 192, 32>}, {pipeline_mode = #tpu.pipeline_mode<synchronous>, transform_indices = @transform_2, window_bounds = array<i64: 8, 32>}, {pipeline_mode = #tpu.pipeline_mode<synchronous>, transform_indices = @transform_3, window_bounds = array<i64: 1, 32>}, {pipeline_mode = #tpu.pipeline_mode<synchronous>, transform_indices = @transform_4, window_bounds = array<i64: 1, 32>}, {pipeline_mode = #tpu.pipeline_mode<synchronous>, transform_indices = @transform_5, window_bounds = array<i64: 2, 1, 32>}, {pipeline_mode = #tpu.pipeline_mode<synchronous>, transform_indices = @transform_6, window_bounds = array<i64: 2, 1, 32>}, {pipeline_mode = #tpu.pipeline_mode<synchronous>, transform_indices = @transform_7, window_bounds = array<i64: 2, 32, 96>}, {pipeline_mode = #tpu.pipeline_mode<synchronous>, transform_indices = @transform_8, window_bounds = array<i64: 2, 1, 96>}, {pipeline_mode = #tpu.pipeline_mode<synchronous>, transform_indices = @transform_9, window_bounds = array<i64: 2, 32, 32>}, {pipeline_mode = #tpu.pipeline_mode<synchronous>, transform_indices = @transform_10, window_bounds = array<i64: 2, 1, 32>}, {pipeline_mode = #tpu.pipeline_mode<synchronous>, transform_indices = @transform_11, window_bounds = array<i64: 2, 1, 32>}, {pipeline_mode = #tpu.pipeline_mode<synchronous>, transform_indices = @transform_12, window_bounds = array<i64: 2, 1, 32>}, {pipeline_mode = #tpu.pipeline_mode<synchronous>, transform_indices = @transform_13, window_bounds = array<i64: 2, 32, 128>}, {pipeline_mode = #tpu.pipeline_mode<synchronous>, transform_indices = @transform_14, window_bounds = array<i64: 2, 1, 128>}, {pipeline_mode = #tpu.pipeline_mode<synchronous>, transform_indices = @transform_15, window_bounds = array<i64: 2, 128, 32>}, {pipeline_mode = #tpu.pipeline_mode<synchronous>, transform_indices = @transform_16, window_bounds = array<i64: 2, 1, 32>}, {pipeline_mode = #tpu.pipeline_mode<synchronous>, transform_indices = @transform_17, window_bounds = array<i64: 1, 32>}, {pipeline_mode = #tpu.pipeline_mode<synchronous>, transform_indices = @transform_18, window_bounds = array<i64: 1, 32>}, {pipeline_mode = #tpu.pipeline_mode<synchronous>, transform_indices = @transform_19, window_bounds = array<i64: 32, 16>}, {transform_indices = @transform_20, window_bounds = array<i64: 1, 1, 16>}]} {
    %c0 = arith.constant 0 : index
    %c0_0 = arith.constant 0 : index
    %c0_1 = arith.constant 0 : index
    %0 = vector.load %arg1[%c0, %c0_0, %c0_1] : memref<1x8x192xf32, #tpu.memory_space<vmem>>, vector<1x8x192xf32>
    %1 = vector.shape_cast %0 : vector<1x8x192xf32> to vector<8x192xf32>
    %c0_2 = arith.constant 0 : index
    %c0_3 = arith.constant 0 : index
    %2 = vector.load %arg2[%c0_2, %c0_3] : memref<192x32xf32, #tpu.memory_space<vmem>>, vector<192x32xf32>
    %cst = arith.constant dense<0.000000e+00> : vector<8x32xf32>
    %3 = tpu.matmul %1, %2, %cst {dimension_numbers = #tpu.dot_dimension_numbers<[1], [0], [0], [1], [0, 0, 1, 1], [], []>} : vector<8x192xf32>, vector<192x32xf32>, vector<8x32xf32> -> vector<8x32xf32>
    %c0_4 = arith.constant 0 : index
    %c0_5 = arith.constant 0 : index
    %4 = vector.load %arg3[%c0_4, %c0_5] : memref<8x32xf32, #tpu.memory_space<vmem>>, vector<8x32xf32>
    %5 = arith.addf %3, %4 : vector<8x32xf32>
    %c0_6 = arith.constant 0 : index
    %c0_7 = arith.constant 0 : index
    %6 = vector.load %arg4[%c0_6, %c0_7] : memref<1x32xf32, #tpu.memory_space<vmem>>, vector<1x32xf32>
    %c0_8 = arith.constant 0 : index
    %c0_9 = arith.constant 0 : index
    %7 = vector.load %arg5[%c0_8, %c0_9] : memref<1x32xf32, #tpu.memory_space<vmem>>, vector<1x32xf32>
    %cst_10 = arith.constant dense<0.000000e+00> : vector<8xf32>
    %8 = vector.multi_reduction <add>, %5, %cst_10 [1] : vector<8x32xf32> to vector<8xf32>
    %9 = vector.shape_cast %8 : vector<8xf32> to vector<8x1xf32>
    %cst_11 = arith.constant 3.200000e+01 : f32
    %10 = vector.broadcast %cst_11 : f32 to vector<8x1xf32>
    %11 = arith.divf %9, %10 : vector<8x1xf32>
    %12 = vector.broadcast %11 : vector<8x1xf32> to vector<8x32xf32>
    %13 = arith.subf %5, %12 : vector<8x32xf32>
    %14 = arith.mulf %13, %13 : vector<8x32xf32>
    %cst_12 = arith.constant dense<0.000000e+00> : vector<8xf32>
    %15 = vector.multi_reduction <add>, %14, %cst_12 [1] : vector<8x32xf32> to vector<8xf32>
    %16 = vector.shape_cast %15 : vector<8xf32> to vector<8x1xf32>
    %cst_13 = arith.constant 3.200000e+01 : f32
    %17 = vector.broadcast %cst_13 : f32 to vector<8x1xf32>
    %18 = arith.divf %16, %17 : vector<8x1xf32>
    %19 = vector.broadcast %11 : vector<8x1xf32> to vector<8x32xf32>
    %20 = arith.subf %5, %19 : vector<8x32xf32>
    %cst_14 = arith.constant 9.99999974E-6 : f32
    %21 = vector.broadcast %cst_14 : f32 to vector<8x1xf32>
    %22 = arith.addf %18, %21 : vector<8x1xf32>
    %23 = math.rsqrt %22 : vector<8x1xf32>
    %24 = vector.broadcast %23 : vector<8x1xf32> to vector<8x32xf32>
    %25 = arith.mulf %20, %24 : vector<8x32xf32>
    %26 = vector.broadcast %6 : vector<1x32xf32> to vector<8x32xf32>
    %27 = arith.mulf %25, %26 : vector<8x32xf32>
    %28 = vector.broadcast %7 : vector<1x32xf32> to vector<8x32xf32>
    %29 = arith.addf %27, %28 : vector<8x32xf32>
    %30 = tpu.iota {dimensions = array<i32: 1>} : vector<8x8xi32>
    %c5_i32 = arith.constant 5 : i32
    %31 = vector.broadcast %c5_i32 : i32 to vector<8x8xi32>
    %32 = arith.cmpi sge, %30, %31 : vector<8x8xi32>
    %cst_15 = arith.constant -1.000000e+09 : f32
    %cst_16 = arith.constant 0.000000e+00 : f32
    %33 = vector.broadcast %cst_15 : f32 to vector<8x8xf32>
    %34 = vector.broadcast %cst_16 : f32 to vector<8x8xf32>
    %35 = arith.select %32, %33, %34 : vector<8x8xi1>, vector<8x8xf32>
    %c0_17 = arith.constant 0 : index
    %c0_18 = arith.constant 0 : index
    %c0_19 = arith.constant 0 : index
    %36 = vector.load %arg6[%c0_17, %c0_18, %c0_19] : memref<2x1x32xf32, #tpu.memory_space<vmem>>, vector<1x1x32xf32>
    %37 = vector.shape_cast %36 : vector<1x1x32xf32> to vector<1x32xf32>
    %c0_20 = arith.constant 0 : index
    %c0_21 = arith.constant 0 : index
    %c0_22 = arith.constant 0 : index
    %38 = vector.load %arg7[%c0_20, %c0_21, %c0_22] : memref<2x1x32xf32, #tpu.memory_space<vmem>>, vector<1x1x32xf32>
    %39 = vector.shape_cast %38 : vector<1x1x32xf32> to vector<1x32xf32>
    %cst_23 = arith.constant dense<0.000000e+00> : vector<8xf32>
    %40 = vector.multi_reduction <add>, %29, %cst_23 [1] : vector<8x32xf32> to vector<8xf32>
    %41 = vector.shape_cast %40 : vector<8xf32> to vector<8x1xf32>
    %cst_24 = arith.constant 3.200000e+01 : f32
    %42 = vector.broadcast %cst_24 : f32 to vector<8x1xf32>
    %43 = arith.divf %41, %42 : vector<8x1xf32>
    %44 = vector.broadcast %43 : vector<8x1xf32> to vector<8x32xf32>
    %45 = arith.subf %29, %44 : vector<8x32xf32>
    %46 = arith.mulf %45, %45 : vector<8x32xf32>
    %cst_25 = arith.constant dense<0.000000e+00> : vector<8xf32>
    %47 = vector.multi_reduction <add>, %46, %cst_25 [1] : vector<8x32xf32> to vector<8xf32>
    %48 = vector.shape_cast %47 : vector<8xf32> to vector<8x1xf32>
    %cst_26 = arith.constant 3.200000e+01 : f32
    %49 = vector.broadcast %cst_26 : f32 to vector<8x1xf32>
    %50 = arith.divf %48, %49 : vector<8x1xf32>
    %51 = vector.broadcast %43 : vector<8x1xf32> to vector<8x32xf32>
    %52 = arith.subf %29, %51 : vector<8x32xf32>
    %cst_27 = arith.constant 9.99999974E-6 : f32
    %53 = vector.broadcast %cst_27 : f32 to vector<8x1xf32>
    %54 = arith.addf %50, %53 : vector<8x1xf32>
    %55 = math.rsqrt %54 : vector<8x1xf32>
    %56 = vector.broadcast %55 : vector<8x1xf32> to vector<8x32xf32>
    %57 = arith.mulf %52, %56 : vector<8x32xf32>
    %58 = vector.broadcast %37 : vector<1x32xf32> to vector<8x32xf32>
    %59 = arith.mulf %57, %58 : vector<8x32xf32>
    %60 = vector.broadcast %39 : vector<1x32xf32> to vector<8x32xf32>
    %61 = arith.addf %59, %60 : vector<8x32xf32>
    %c0_28 = arith.constant 0 : index
    %c0_29 = arith.constant 0 : index
    %c0_30 = arith.constant 0 : index
    %62 = vector.load %arg8[%c0_28, %c0_29, %c0_30] : memref<2x32x96xf32, #tpu.memory_space<vmem>>, vector<1x32x96xf32>
    %63 = vector.shape_cast %62 : vector<1x32x96xf32> to vector<32x96xf32>
    %cst_31 = arith.constant dense<0.000000e+00> : vector<8x96xf32>
    %64 = tpu.matmul %61, %63, %cst_31 {dimension_numbers = #tpu.dot_dimension_numbers<[1], [0], [0], [1], [0, 0, 1, 1], [], []>} : vector<8x32xf32>, vector<32x96xf32>, vector<8x96xf32> -> vector<8x96xf32>
    %c0_32 = arith.constant 0 : index
    %c0_33 = arith.constant 0 : index
    %c0_34 = arith.constant 0 : index
    %65 = vector.load %arg9[%c0_32, %c0_33, %c0_34] : memref<2x1x96xf32, #tpu.memory_space<vmem>>, vector<1x1x96xf32>
    %66 = vector.shape_cast %65 : vector<1x1x96xf32> to vector<1x96xf32>
    %67 = vector.broadcast %66 : vector<1x96xf32> to vector<8x96xf32>
    %68 = arith.addf %64, %67 : vector<8x96xf32>
    %c0_35 = arith.constant 0 : index
    %c0_36 = arith.constant 0 : index
    %c0_37 = arith.constant 0 : index
    %69 = vector.load %arg10[%c0_35, %c0_36, %c0_37] : memref<2x32x32xf32, #tpu.memory_space<vmem>>, vector<1x32x32xf32>
    %70 = vector.shape_cast %69 : vector<1x32x32xf32> to vector<32x32xf32>
    %cst_38 = arith.constant 0.000000e+00 : f32
    %71 = vector.broadcast %cst_38 : f32 to vector<8x32xf32>
    %72 = vector.extract_strided_slice %68 {offsets = [0, 0], sizes = [8, 16], strides = [1, 1]} : vector<8x96xf32> to vector<8x16xf32>
    %73 = vector.extract_strided_slice %68 {offsets = [0, 32], sizes = [8, 16], strides = [1, 1]} : vector<8x96xf32> to vector<8x16xf32>
    %74 = vector.extract_strided_slice %68 {offsets = [0, 64], sizes = [8, 16], strides = [1, 1]} : vector<8x96xf32> to vector<8x16xf32>
    %cst_39 = arith.constant dense<0.000000e+00> : vector<8x8xf32>
    %75 = tpu.matmul %72, %73, %cst_39 {dimension_numbers = #tpu.dot_dimension_numbers<[1], [1], [0], [0], [0, 0, 1, 0], [], []>} : vector<8x16xf32>, vector<8x16xf32>, vector<8x8xf32> -> vector<8x8xf32>
    %cst_40 = arith.constant 2.500000e-01 : f32
    %76 = vector.broadcast %cst_40 : f32 to vector<8x8xf32>
    %77 = arith.mulf %75, %76 : vector<8x8xf32>
    %78 = arith.addf %77, %35 : vector<8x8xf32>
    %cst_41 = arith.constant dense<0xFF800000> : vector<8xf32>
    %79 = vector.multi_reduction <maximumf>, %78, %cst_41 [1] : vector<8x8xf32> to vector<8xf32>
    %80 = vector.shape_cast %79 : vector<8xf32> to vector<8x1xf32>
    %81 = vector.broadcast %80 : vector<8x1xf32> to vector<8x8xf32>
    %82 = arith.subf %78, %81 : vector<8x8xf32>
    %83 = math.exp %82 : vector<8x8xf32>
    %cst_42 = arith.constant dense<0.000000e+00> : vector<8xf32>
    %84 = vector.multi_reduction <add>, %83, %cst_42 [1] : vector<8x8xf32> to vector<8xf32>
    %85 = vector.shape_cast %84 : vector<8xf32> to vector<8x1xf32>
    %86 = tpu.reciprocal %85 {approx = true} : vector<8x1xf32> -> vector<8x1xf32>
    %87 = vector.broadcast %86 : vector<8x1xf32> to vector<8x8xf32>
    %88 = arith.mulf %83, %87 : vector<8x8xf32>
    %cst_43 = arith.constant dense<0.000000e+00> : vector<8x16xf32>
    %89 = tpu.matmul %88, %74, %cst_43 {dimension_numbers = #tpu.dot_dimension_numbers<[1], [0], [0], [1], [0, 0, 1, 1], [], []>} : vector<8x8xf32>, vector<8x16xf32>, vector<8x16xf32> -> vector<8x16xf32>
    %90 = vector.extract_strided_slice %70 {offsets = [0, 0], sizes = [16, 32], strides = [1, 1]} : vector<32x32xf32> to vector<16x32xf32>
    %cst_44 = arith.constant dense<0.000000e+00> : vector<8x32xf32>
    %91 = tpu.matmul %89, %90, %cst_44 {dimension_numbers = #tpu.dot_dimension_numbers<[1], [0], [0], [1], [0, 0, 1, 1], [], []>} : vector<8x16xf32>, vector<16x32xf32>, vector<8x32xf32> -> vector<8x32xf32>
    %92 = arith.addf %71, %91 : vector<8x32xf32>
    %93 = vector.extract_strided_slice %68 {offsets = [0, 16], sizes = [8, 16], strides = [1, 1]} : vector<8x96xf32> to vector<8x16xf32>
    %94 = vector.extract_strided_slice %68 {offsets = [0, 48], sizes = [8, 16], strides = [1, 1]} : vector<8x96xf32> to vector<8x16xf32>
    %95 = vector.extract_strided_slice %68 {offsets = [0, 80], sizes = [8, 16], strides = [1, 1]} : vector<8x96xf32> to vector<8x16xf32>
    %cst_45 = arith.constant dense<0.000000e+00> : vector<8x8xf32>
    %96 = tpu.matmul %93, %94, %cst_45 {dimension_numbers = #tpu.dot_dimension_numbers<[1], [1], [0], [0], [0, 0, 1, 0], [], []>} : vector<8x16xf32>, vector<8x16xf32>, vector<8x8xf32> -> vector<8x8xf32>
    %cst_46 = arith.constant 2.500000e-01 : f32
    %97 = vector.broadcast %cst_46 : f32 to vector<8x8xf32>
    %98 = arith.mulf %96, %97 : vector<8x8xf32>
    %99 = arith.addf %98, %35 : vector<8x8xf32>
    %cst_47 = arith.constant dense<0xFF800000> : vector<8xf32>
    %100 = vector.multi_reduction <maximumf>, %99, %cst_47 [1] : vector<8x8xf32> to vector<8xf32>
    %101 = vector.shape_cast %100 : vector<8xf32> to vector<8x1xf32>
    %102 = vector.broadcast %101 : vector<8x1xf32> to vector<8x8xf32>
    %103 = arith.subf %99, %102 : vector<8x8xf32>
    %104 = math.exp %103 : vector<8x8xf32>
    %cst_48 = arith.constant dense<0.000000e+00> : vector<8xf32>
    %105 = vector.multi_reduction <add>, %104, %cst_48 [1] : vector<8x8xf32> to vector<8xf32>
    %106 = vector.shape_cast %105 : vector<8xf32> to vector<8x1xf32>
    %107 = tpu.reciprocal %106 {approx = true} : vector<8x1xf32> -> vector<8x1xf32>
    %108 = vector.broadcast %107 : vector<8x1xf32> to vector<8x8xf32>
    %109 = arith.mulf %104, %108 : vector<8x8xf32>
    %cst_49 = arith.constant dense<0.000000e+00> : vector<8x16xf32>
    %110 = tpu.matmul %109, %95, %cst_49 {dimension_numbers = #tpu.dot_dimension_numbers<[1], [0], [0], [1], [0, 0, 1, 1], [], []>} : vector<8x8xf32>, vector<8x16xf32>, vector<8x16xf32> -> vector<8x16xf32>
    %111 = vector.extract_strided_slice %70 {offsets = [16, 0], sizes = [16, 32], strides = [1, 1]} : vector<32x32xf32> to vector<16x32xf32>
    %cst_50 = arith.constant dense<0.000000e+00> : vector<8x32xf32>
    %112 = tpu.matmul %110, %111, %cst_50 {dimension_numbers = #tpu.dot_dimension_numbers<[1], [0], [0], [1], [0, 0, 1, 1], [], []>} : vector<8x16xf32>, vector<16x32xf32>, vector<8x32xf32> -> vector<8x32xf32>
    %113 = arith.addf %92, %112 : vector<8x32xf32>
    %114 = arith.addf %29, %113 : vector<8x32xf32>
    %c0_51 = arith.constant 0 : index
    %c0_52 = arith.constant 0 : index
    %c0_53 = arith.constant 0 : index
    %115 = vector.load %arg11[%c0_51, %c0_52, %c0_53] : memref<2x1x32xf32, #tpu.memory_space<vmem>>, vector<1x1x32xf32>
    %116 = vector.shape_cast %115 : vector<1x1x32xf32> to vector<1x32xf32>
    %117 = vector.broadcast %116 : vector<1x32xf32> to vector<8x32xf32>
    %118 = arith.addf %114, %117 : vector<8x32xf32>
    %c0_54 = arith.constant 0 : index
    %c0_55 = arith.constant 0 : index
    %c0_56 = arith.constant 0 : index
    %119 = vector.load %arg12[%c0_54, %c0_55, %c0_56] : memref<2x1x32xf32, #tpu.memory_space<vmem>>, vector<1x1x32xf32>
    %120 = vector.shape_cast %119 : vector<1x1x32xf32> to vector<1x32xf32>
    %c0_57 = arith.constant 0 : index
    %c0_58 = arith.constant 0 : index
    %c0_59 = arith.constant 0 : index
    %121 = vector.load %arg13[%c0_57, %c0_58, %c0_59] : memref<2x1x32xf32, #tpu.memory_space<vmem>>, vector<1x1x32xf32>
    %122 = vector.shape_cast %121 : vector<1x1x32xf32> to vector<1x32xf32>
    %cst_60 = arith.constant dense<0.000000e+00> : vector<8xf32>
    %123 = vector.multi_reduction <add>, %118, %cst_60 [1] : vector<8x32xf32> to vector<8xf32>
    %124 = vector.shape_cast %123 : vector<8xf32> to vector<8x1xf32>
    %cst_61 = arith.constant 3.200000e+01 : f32
    %125 = vector.broadcast %cst_61 : f32 to vector<8x1xf32>
    %126 = arith.divf %124, %125 : vector<8x1xf32>
    %127 = vector.broadcast %126 : vector<8x1xf32> to vector<8x32xf32>
    %128 = arith.subf %118, %127 : vector<8x32xf32>
    %129 = arith.mulf %128, %128 : vector<8x32xf32>
    %cst_62 = arith.constant dense<0.000000e+00> : vector<8xf32>
    %130 = vector.multi_reduction <add>, %129, %cst_62 [1] : vector<8x32xf32> to vector<8xf32>
    %131 = vector.shape_cast %130 : vector<8xf32> to vector<8x1xf32>
    %cst_63 = arith.constant 3.200000e+01 : f32
    %132 = vector.broadcast %cst_63 : f32 to vector<8x1xf32>
    %133 = arith.divf %131, %132 : vector<8x1xf32>
    %134 = vector.broadcast %126 : vector<8x1xf32> to vector<8x32xf32>
    %135 = arith.subf %118, %134 : vector<8x32xf32>
    %cst_64 = arith.constant 9.99999974E-6 : f32
    %136 = vector.broadcast %cst_64 : f32 to vector<8x1xf32>
    %137 = arith.addf %133, %136 : vector<8x1xf32>
    %138 = math.rsqrt %137 : vector<8x1xf32>
    %139 = vector.broadcast %138 : vector<8x1xf32> to vector<8x32xf32>
    %140 = arith.mulf %135, %139 : vector<8x32xf32>
    %141 = vector.broadcast %120 : vector<1x32xf32> to vector<8x32xf32>
    %142 = arith.mulf %140, %141 : vector<8x32xf32>
    %143 = vector.broadcast %122 : vector<1x32xf32> to vector<8x32xf32>
    %144 = arith.addf %142, %143 : vector<8x32xf32>
    %c0_65 = arith.constant 0 : index
    %c0_66 = arith.constant 0 : index
    %c0_67 = arith.constant 0 : index
    %145 = vector.load %arg14[%c0_65, %c0_66, %c0_67] : memref<2x32x128xf32, #tpu.memory_space<vmem>>, vector<1x32x128xf32>
    %146 = vector.shape_cast %145 : vector<1x32x128xf32> to vector<32x128xf32>
    %cst_68 = arith.constant dense<0.000000e+00> : vector<8x128xf32>
    %147 = tpu.matmul %144, %146, %cst_68 {dimension_numbers = #tpu.dot_dimension_numbers<[1], [0], [0], [1], [0, 0, 1, 1], [], []>} : vector<8x32xf32>, vector<32x128xf32>, vector<8x128xf32> -> vector<8x128xf32>
    %c0_69 = arith.constant 0 : index
    %c0_70 = arith.constant 0 : index
    %c0_71 = arith.constant 0 : index
    %148 = vector.load %arg15[%c0_69, %c0_70, %c0_71] : memref<2x1x128xf32, #tpu.memory_space<vmem>>, vector<1x1x128xf32>
    %149 = vector.shape_cast %148 : vector<1x1x128xf32> to vector<1x128xf32>
    %150 = vector.broadcast %149 : vector<1x128xf32> to vector<8x128xf32>
    %151 = arith.addf %147, %150 : vector<8x128xf32>
    %cst_72 = arith.constant 1.702000e+00 : f32
    %152 = vector.broadcast %cst_72 : f32 to vector<8x128xf32>
    %153 = arith.mulf %152, %151 : vector<8x128xf32>
    %154 = arith.negf %153 : vector<8x128xf32>
    %155 = math.exp %154 : vector<8x128xf32>
    %cst_73 = arith.constant 1.000000e+00 : f32
    %156 = vector.broadcast %cst_73 : f32 to vector<8x128xf32>
    %157 = arith.addf %156, %155 : vector<8x128xf32>
    %158 = arith.divf %156, %157 : vector<8x128xf32>
    %159 = arith.mulf %151, %158 : vector<8x128xf32>
    %c0_74 = arith.constant 0 : index
    %c0_75 = arith.constant 0 : index
    %c0_76 = arith.constant 0 : index
    %160 = vector.load %arg16[%c0_74, %c0_75, %c0_76] : memref<2x128x32xf32, #tpu.memory_space<vmem>>, vector<1x128x32xf32>
    %161 = vector.shape_cast %160 : vector<1x128x32xf32> to vector<128x32xf32>
    %cst_77 = arith.constant dense<0.000000e+00> : vector<8x32xf32>
    %162 = tpu.matmul %159, %161, %cst_77 {dimension_numbers = #tpu.dot_dimension_numbers<[1], [0], [0], [1], [0, 0, 1, 1], [], []>} : vector<8x128xf32>, vector<128x32xf32>, vector<8x32xf32> -> vector<8x32xf32>
    %c0_78 = arith.constant 0 : index
    %c0_79 = arith.constant 0 : index
    %c0_80 = arith.constant 0 : index
    %163 = vector.load %arg17[%c0_78, %c0_79, %c0_80] : memref<2x1x32xf32, #tpu.memory_space<vmem>>, vector<1x1x32xf32>
    %164 = vector.shape_cast %163 : vector<1x1x32xf32> to vector<1x32xf32>
    %165 = vector.broadcast %164 : vector<1x32xf32> to vector<8x32xf32>
    %166 = arith.addf %162, %165 : vector<8x32xf32>
    %167 = arith.addf %118, %166 : vector<8x32xf32>
    %c1 = arith.constant 1 : index
    %c0_81 = arith.constant 0 : index
    %c0_82 = arith.constant 0 : index
    %168 = vector.load %arg6[%c1, %c0_81, %c0_82] : memref<2x1x32xf32, #tpu.memory_space<vmem>>, vector<1x1x32xf32>
    %169 = vector.shape_cast %168 : vector<1x1x32xf32> to vector<1x32xf32>
    %c1_83 = arith.constant 1 : index
    %c0_84 = arith.constant 0 : index
    %c0_85 = arith.constant 0 : index
    %170 = vector.load %arg7[%c1_83, %c0_84, %c0_85] : memref<2x1x32xf32, #tpu.memory_space<vmem>>, vector<1x1x32xf32>
    %171 = vector.shape_cast %170 : vector<1x1x32xf32> to vector<1x32xf32>
    %cst_86 = arith.constant dense<0.000000e+00> : vector<8xf32>
    %172 = vector.multi_reduction <add>, %167, %cst_86 [1] : vector<8x32xf32> to vector<8xf32>
    %173 = vector.shape_cast %172 : vector<8xf32> to vector<8x1xf32>
    %cst_87 = arith.constant 3.200000e+01 : f32
    %174 = vector.broadcast %cst_87 : f32 to vector<8x1xf32>
    %175 = arith.divf %173, %174 : vector<8x1xf32>
    %176 = vector.broadcast %175 : vector<8x1xf32> to vector<8x32xf32>
    %177 = arith.subf %167, %176 : vector<8x32xf32>
    %178 = arith.mulf %177, %177 : vector<8x32xf32>
    %cst_88 = arith.constant dense<0.000000e+00> : vector<8xf32>
    %179 = vector.multi_reduction <add>, %178, %cst_88 [1] : vector<8x32xf32> to vector<8xf32>
    %180 = vector.shape_cast %179 : vector<8xf32> to vector<8x1xf32>
    %cst_89 = arith.constant 3.200000e+01 : f32
    %181 = vector.broadcast %cst_89 : f32 to vector<8x1xf32>
    %182 = arith.divf %180, %181 : vector<8x1xf32>
    %183 = vector.broadcast %175 : vector<8x1xf32> to vector<8x32xf32>
    %184 = arith.subf %167, %183 : vector<8x32xf32>
    %cst_90 = arith.constant 9.99999974E-6 : f32
    %185 = vector.broadcast %cst_90 : f32 to vector<8x1xf32>
    %186 = arith.addf %182, %185 : vector<8x1xf32>
    %187 = math.rsqrt %186 : vector<8x1xf32>
    %188 = vector.broadcast %187 : vector<8x1xf32> to vector<8x32xf32>
    %189 = arith.mulf %184, %188 : vector<8x32xf32>
    %190 = vector.broadcast %169 : vector<1x32xf32> to vector<8x32xf32>
    %191 = arith.mulf %189, %190 : vector<8x32xf32>
    %192 = vector.broadcast %171 : vector<1x32xf32> to vector<8x32xf32>
    %193 = arith.addf %191, %192 : vector<8x32xf32>
    %c1_91 = arith.constant 1 : index
    %c0_92 = arith.constant 0 : index
    %c0_93 = arith.constant 0 : index
    %194 = vector.load %arg8[%c1_91, %c0_92, %c0_93] : memref<2x32x96xf32, #tpu.memory_space<vmem>>, vector<1x32x96xf32>
    %195 = vector.shape_cast %194 : vector<1x32x96xf32> to vector<32x96xf32>
    %cst_94 = arith.constant dense<0.000000e+00> : vector<8x96xf32>
    %196 = tpu.matmul %193, %195, %cst_94 {dimension_numbers = #tpu.dot_dimension_numbers<[1], [0], [0], [1], [0, 0, 1, 1], [], []>} : vector<8x32xf32>, vector<32x96xf32>, vector<8x96xf32> -> vector<8x96xf32>
    %c1_95 = arith.constant 1 : index
    %c0_96 = arith.constant 0 : index
    %c0_97 = arith.constant 0 : index
    %197 = vector.load %arg9[%c1_95, %c0_96, %c0_97] : memref<2x1x96xf32, #tpu.memory_space<vmem>>, vector<1x1x96xf32>
    %198 = vector.shape_cast %197 : vector<1x1x96xf32> to vector<1x96xf32>
    %199 = vector.broadcast %198 : vector<1x96xf32> to vector<8x96xf32>
    %200 = arith.addf %196, %199 : vector<8x96xf32>
    %c1_98 = arith.constant 1 : index
    %c0_99 = arith.constant 0 : index
    %c0_100 = arith.constant 0 : index
    %201 = vector.load %arg10[%c1_98, %c0_99, %c0_100] : memref<2x32x32xf32, #tpu.memory_space<vmem>>, vector<1x32x32xf32>
    %202 = vector.shape_cast %201 : vector<1x32x32xf32> to vector<32x32xf32>
    %cst_101 = arith.constant 0.000000e+00 : f32
    %203 = vector.broadcast %cst_101 : f32 to vector<8x32xf32>
    %204 = vector.extract_strided_slice %200 {offsets = [0, 0], sizes = [8, 16], strides = [1, 1]} : vector<8x96xf32> to vector<8x16xf32>
    %205 = vector.extract_strided_slice %200 {offsets = [0, 32], sizes = [8, 16], strides = [1, 1]} : vector<8x96xf32> to vector<8x16xf32>
    %206 = vector.extract_strided_slice %200 {offsets = [0, 64], sizes = [8, 16], strides = [1, 1]} : vector<8x96xf32> to vector<8x16xf32>
    %cst_102 = arith.constant dense<0.000000e+00> : vector<8x8xf32>
    %207 = tpu.matmul %204, %205, %cst_102 {dimension_numbers = #tpu.dot_dimension_numbers<[1], [1], [0], [0], [0, 0, 1, 0], [], []>} : vector<8x16xf32>, vector<8x16xf32>, vector<8x8xf32> -> vector<8x8xf32>
    %cst_103 = arith.constant 2.500000e-01 : f32
    %208 = vector.broadcast %cst_103 : f32 to vector<8x8xf32>
    %209 = arith.mulf %207, %208 : vector<8x8xf32>
    %210 = arith.addf %209, %35 : vector<8x8xf32>
    %cst_104 = arith.constant dense<0xFF800000> : vector<8xf32>
    %211 = vector.multi_reduction <maximumf>, %210, %cst_104 [1] : vector<8x8xf32> to vector<8xf32>
    %212 = vector.shape_cast %211 : vector<8xf32> to vector<8x1xf32>
    %213 = vector.broadcast %212 : vector<8x1xf32> to vector<8x8xf32>
    %214 = arith.subf %210, %213 : vector<8x8xf32>
    %215 = math.exp %214 : vector<8x8xf32>
    %cst_105 = arith.constant dense<0.000000e+00> : vector<8xf32>
    %216 = vector.multi_reduction <add>, %215, %cst_105 [1] : vector<8x8xf32> to vector<8xf32>
    %217 = vector.shape_cast %216 : vector<8xf32> to vector<8x1xf32>
    %218 = tpu.reciprocal %217 {approx = true} : vector<8x1xf32> -> vector<8x1xf32>
    %219 = vector.broadcast %218 : vector<8x1xf32> to vector<8x8xf32>
    %220 = arith.mulf %215, %219 : vector<8x8xf32>
    %cst_106 = arith.constant dense<0.000000e+00> : vector<8x16xf32>
    %221 = tpu.matmul %220, %206, %cst_106 {dimension_numbers = #tpu.dot_dimension_numbers<[1], [0], [0], [1], [0, 0, 1, 1], [], []>} : vector<8x8xf32>, vector<8x16xf32>, vector<8x16xf32> -> vector<8x16xf32>
    %222 = vector.extract_strided_slice %202 {offsets = [0, 0], sizes = [16, 32], strides = [1, 1]} : vector<32x32xf32> to vector<16x32xf32>
    %cst_107 = arith.constant dense<0.000000e+00> : vector<8x32xf32>
    %223 = tpu.matmul %221, %222, %cst_107 {dimension_numbers = #tpu.dot_dimension_numbers<[1], [0], [0], [1], [0, 0, 1, 1], [], []>} : vector<8x16xf32>, vector<16x32xf32>, vector<8x32xf32> -> vector<8x32xf32>
    %224 = arith.addf %203, %223 : vector<8x32xf32>
    %225 = vector.extract_strided_slice %200 {offsets = [0, 16], sizes = [8, 16], strides = [1, 1]} : vector<8x96xf32> to vector<8x16xf32>
    %226 = vector.extract_strided_slice %200 {offsets = [0, 48], sizes = [8, 16], strides = [1, 1]} : vector<8x96xf32> to vector<8x16xf32>
    %227 = vector.extract_strided_slice %200 {offsets = [0, 80], sizes = [8, 16], strides = [1, 1]} : vector<8x96xf32> to vector<8x16xf32>
    %cst_108 = arith.constant dense<0.000000e+00> : vector<8x8xf32>
    %228 = tpu.matmul %225, %226, %cst_108 {dimension_numbers = #tpu.dot_dimension_numbers<[1], [1], [0], [0], [0, 0, 1, 0], [], []>} : vector<8x16xf32>, vector<8x16xf32>, vector<8x8xf32> -> vector<8x8xf32>
    %cst_109 = arith.constant 2.500000e-01 : f32
    %229 = vector.broadcast %cst_109 : f32 to vector<8x8xf32>
    %230 = arith.mulf %228, %229 : vector<8x8xf32>
    %231 = arith.addf %230, %35 : vector<8x8xf32>
    %cst_110 = arith.constant dense<0xFF800000> : vector<8xf32>
    %232 = vector.multi_reduction <maximumf>, %231, %cst_110 [1] : vector<8x8xf32> to vector<8xf32>
    %233 = vector.shape_cast %232 : vector<8xf32> to vector<8x1xf32>
    %234 = vector.broadcast %233 : vector<8x1xf32> to vector<8x8xf32>
    %235 = arith.subf %231, %234 : vector<8x8xf32>
    %236 = math.exp %235 : vector<8x8xf32>
    %cst_111 = arith.constant dense<0.000000e+00> : vector<8xf32>
    %237 = vector.multi_reduction <add>, %236, %cst_111 [1] : vector<8x8xf32> to vector<8xf32>
    %238 = vector.shape_cast %237 : vector<8xf32> to vector<8x1xf32>
    %239 = tpu.reciprocal %238 {approx = true} : vector<8x1xf32> -> vector<8x1xf32>
    %240 = vector.broadcast %239 : vector<8x1xf32> to vector<8x8xf32>
    %241 = arith.mulf %236, %240 : vector<8x8xf32>
    %cst_112 = arith.constant dense<0.000000e+00> : vector<8x16xf32>
    %242 = tpu.matmul %241, %227, %cst_112 {dimension_numbers = #tpu.dot_dimension_numbers<[1], [0], [0], [1], [0, 0, 1, 1], [], []>} : vector<8x8xf32>, vector<8x16xf32>, vector<8x16xf32> -> vector<8x16xf32>
    %243 = vector.extract_strided_slice %202 {offsets = [16, 0], sizes = [16, 32], strides = [1, 1]} : vector<32x32xf32> to vector<16x32xf32>
    %cst_113 = arith.constant dense<0.000000e+00> : vector<8x32xf32>
    %244 = tpu.matmul %242, %243, %cst_113 {dimension_numbers = #tpu.dot_dimension_numbers<[1], [0], [0], [1], [0, 0, 1, 1], [], []>} : vector<8x16xf32>, vector<16x32xf32>, vector<8x32xf32> -> vector<8x32xf32>
    %245 = arith.addf %224, %244 : vector<8x32xf32>
    %246 = arith.addf %167, %245 : vector<8x32xf32>
    %c1_114 = arith.constant 1 : index
    %c0_115 = arith.constant 0 : index
    %c0_116 = arith.constant 0 : index
    %247 = vector.load %arg11[%c1_114, %c0_115, %c0_116] : memref<2x1x32xf32, #tpu.memory_space<vmem>>, vector<1x1x32xf32>
    %248 = vector.shape_cast %247 : vector<1x1x32xf32> to vector<1x32xf32>
    %249 = vector.broadcast %248 : vector<1x32xf32> to vector<8x32xf32>
    %250 = arith.addf %246, %249 : vector<8x32xf32>
    %c1_117 = arith.constant 1 : index
    %c0_118 = arith.constant 0 : index
    %c0_119 = arith.constant 0 : index
    %251 = vector.load %arg12[%c1_117, %c0_118, %c0_119] : memref<2x1x32xf32, #tpu.memory_space<vmem>>, vector<1x1x32xf32>
    %252 = vector.shape_cast %251 : vector<1x1x32xf32> to vector<1x32xf32>
    %c1_120 = arith.constant 1 : index
    %c0_121 = arith.constant 0 : index
    %c0_122 = arith.constant 0 : index
    %253 = vector.load %arg13[%c1_120, %c0_121, %c0_122] : memref<2x1x32xf32, #tpu.memory_space<vmem>>, vector<1x1x32xf32>
    %254 = vector.shape_cast %253 : vector<1x1x32xf32> to vector<1x32xf32>
    %cst_123 = arith.constant dense<0.000000e+00> : vector<8xf32>
    %255 = vector.multi_reduction <add>, %250, %cst_123 [1] : vector<8x32xf32> to vector<8xf32>
    %256 = vector.shape_cast %255 : vector<8xf32> to vector<8x1xf32>
    %cst_124 = arith.constant 3.200000e+01 : f32
    %257 = vector.broadcast %cst_124 : f32 to vector<8x1xf32>
    %258 = arith.divf %256, %257 : vector<8x1xf32>
    %259 = vector.broadcast %258 : vector<8x1xf32> to vector<8x32xf32>
    %260 = arith.subf %250, %259 : vector<8x32xf32>
    %261 = arith.mulf %260, %260 : vector<8x32xf32>
    %cst_125 = arith.constant dense<0.000000e+00> : vector<8xf32>
    %262 = vector.multi_reduction <add>, %261, %cst_125 [1] : vector<8x32xf32> to vector<8xf32>
    %263 = vector.shape_cast %262 : vector<8xf32> to vector<8x1xf32>
    %cst_126 = arith.constant 3.200000e+01 : f32
    %264 = vector.broadcast %cst_126 : f32 to vector<8x1xf32>
    %265 = arith.divf %263, %264 : vector<8x1xf32>
    %266 = vector.broadcast %258 : vector<8x1xf32> to vector<8x32xf32>
    %267 = arith.subf %250, %266 : vector<8x32xf32>
    %cst_127 = arith.constant 9.99999974E-6 : f32
    %268 = vector.broadcast %cst_127 : f32 to vector<8x1xf32>
    %269 = arith.addf %265, %268 : vector<8x1xf32>
    %270 = math.rsqrt %269 : vector<8x1xf32>
    %271 = vector.broadcast %270 : vector<8x1xf32> to vector<8x32xf32>
    %272 = arith.mulf %267, %271 : vector<8x32xf32>
    %273 = vector.broadcast %252 : vector<1x32xf32> to vector<8x32xf32>
    %274 = arith.mulf %272, %273 : vector<8x32xf32>
    %275 = vector.broadcast %254 : vector<1x32xf32> to vector<8x32xf32>
    %276 = arith.addf %274, %275 : vector<8x32xf32>
    %c1_128 = arith.constant 1 : index
    %c0_129 = arith.constant 0 : index
    %c0_130 = arith.constant 0 : index
    %277 = vector.load %arg14[%c1_128, %c0_129, %c0_130] : memref<2x32x128xf32, #tpu.memory_space<vmem>>, vector<1x32x128xf32>
    %278 = vector.shape_cast %277 : vector<1x32x128xf32> to vector<32x128xf32>
    %cst_131 = arith.constant dense<0.000000e+00> : vector<8x128xf32>
    %279 = tpu.matmul %276, %278, %cst_131 {dimension_numbers = #tpu.dot_dimension_numbers<[1], [0], [0], [1], [0, 0, 1, 1], [], []>} : vector<8x32xf32>, vector<32x128xf32>, vector<8x128xf32> -> vector<8x128xf32>
    %c1_132 = arith.constant 1 : index
    %c0_133 = arith.constant 0 : index
    %c0_134 = arith.constant 0 : index
    %280 = vector.load %arg15[%c1_132, %c0_133, %c0_134] : memref<2x1x128xf32, #tpu.memory_space<vmem>>, vector<1x1x128xf32>
    %281 = vector.shape_cast %280 : vector<1x1x128xf32> to vector<1x128xf32>
    %282 = vector.broadcast %281 : vector<1x128xf32> to vector<8x128xf32>
    %283 = arith.addf %279, %282 : vector<8x128xf32>
    %cst_135 = arith.constant 1.702000e+00 : f32
    %284 = vector.broadcast %cst_135 : f32 to vector<8x128xf32>
    %285 = arith.mulf %284, %283 : vector<8x128xf32>
    %286 = arith.negf %285 : vector<8x128xf32>
    %287 = math.exp %286 : vector<8x128xf32>
    %cst_136 = arith.constant 1.000000e+00 : f32
    %288 = vector.broadcast %cst_136 : f32 to vector<8x128xf32>
    %289 = arith.addf %288, %287 : vector<8x128xf32>
    %290 = arith.divf %288, %289 : vector<8x128xf32>
    %291 = arith.mulf %283, %290 : vector<8x128xf32>
    %c1_137 = arith.constant 1 : index
    %c0_138 = arith.constant 0 : index
    %c0_139 = arith.constant 0 : index
    %292 = vector.load %arg16[%c1_137, %c0_138, %c0_139] : memref<2x128x32xf32, #tpu.memory_space<vmem>>, vector<1x128x32xf32>
    %293 = vector.shape_cast %292 : vector<1x128x32xf32> to vector<128x32xf32>
    %cst_140 = arith.constant dense<0.000000e+00> : vector<8x32xf32>
    %294 = tpu.matmul %291, %293, %cst_140 {dimension_numbers = #tpu.dot_dimension_numbers<[1], [0], [0], [1], [0, 0, 1, 1], [], []>} : vector<8x128xf32>, vector<128x32xf32>, vector<8x32xf32> -> vector<8x32xf32>
    %c1_141 = arith.constant 1 : index
    %c0_142 = arith.constant 0 : index
    %c0_143 = arith.constant 0 : index
    %295 = vector.load %arg17[%c1_141, %c0_142, %c0_143] : memref<2x1x32xf32, #tpu.memory_space<vmem>>, vector<1x1x32xf32>
    %296 = vector.shape_cast %295 : vector<1x1x32xf32> to vector<1x32xf32>
    %297 = vector.broadcast %296 : vector<1x32xf32> to vector<8x32xf32>
    %298 = arith.addf %294, %297 : vector<8x32xf32>
    %299 = arith.addf %250, %298 : vector<8x32xf32>
    %300 = vector.extract_strided_slice %299 {offsets = [0, 0], sizes = [1, 32], strides = [1, 1]} : vector<8x32xf32> to vector<1x32xf32>
    %c0_144 = arith.constant 0 : index
    %c0_145 = arith.constant 0 : index
    %301 = vector.load %arg18[%c0_144, %c0_145] : memref<1x32xf32, #tpu.memory_space<vmem>>, vector<1x32xf32>
    %c0_146 = arith.constant 0 : index
    %c0_147 = arith.constant 0 : index
    %302 = vector.load %arg19[%c0_146, %c0_147] : memref<1x32xf32, #tpu.memory_space<vmem>>, vector<1x32xf32>
    %cst_148 = arith.constant dense<0.000000e+00> : vector<1xf32>
    %303 = vector.multi_reduction <add>, %300, %cst_148 [1] : vector<1x32xf32> to vector<1xf32>
    %304 = vector.shape_cast %303 : vector<1xf32> to vector<1x1xf32>
    %cst_149 = arith.constant 3.200000e+01 : f32
    %305 = vector.broadcast %cst_149 : f32 to vector<1x1xf32>
    %306 = arith.divf %304, %305 : vector<1x1xf32>
    %307 = vector.broadcast %306 : vector<1x1xf32> to vector<1x32xf32>
    %308 = arith.subf %300, %307 : vector<1x32xf32>
    %309 = arith.mulf %308, %308 : vector<1x32xf32>
    %cst_150 = arith.constant dense<0.000000e+00> : vector<1xf32>
    %310 = vector.multi_reduction <add>, %309, %cst_150 [1] : vector<1x32xf32> to vector<1xf32>
    %311 = vector.shape_cast %310 : vector<1xf32> to vector<1x1xf32>
    %cst_151 = arith.constant 3.200000e+01 : f32
    %312 = vector.broadcast %cst_151 : f32 to vector<1x1xf32>
    %313 = arith.divf %311, %312 : vector<1x1xf32>
    %314 = vector.broadcast %306 : vector<1x1xf32> to vector<1x32xf32>
    %315 = arith.subf %300, %314 : vector<1x32xf32>
    %cst_152 = arith.constant 9.99999974E-6 : f32
    %316 = vector.broadcast %cst_152 : f32 to vector<1x1xf32>
    %317 = arith.addf %313, %316 : vector<1x1xf32>
    %318 = math.rsqrt %317 : vector<1x1xf32>
    %319 = vector.broadcast %318 : vector<1x1xf32> to vector<1x32xf32>
    %320 = arith.mulf %315, %319 : vector<1x32xf32>
    %321 = arith.mulf %320, %301 : vector<1x32xf32>
    %322 = arith.addf %321, %302 : vector<1x32xf32>
    %c0_153 = arith.constant 0 : index
    %c0_154 = arith.constant 0 : index
    %323 = vector.load %arg20[%c0_153, %c0_154] : memref<32x16xf32, #tpu.memory_space<vmem>>, vector<32x16xf32>
    %cst_155 = arith.constant dense<0.000000e+00> : vector<1x16xf32>
    %324 = tpu.matmul %322, %323, %cst_155 {dimension_numbers = #tpu.dot_dimension_numbers<[1], [0], [0], [1], [0, 0, 1, 1], [], []>} : vector<1x32xf32>, vector<32x16xf32>, vector<1x16xf32> -> vector<1x16xf32>
    %c0_156 = arith.constant 0 : index
    %c0_157 = arith.constant 0 : index
    %c0_158 = arith.constant 0 : index
    %325 = vector.load %arg21[%c0_156, %c0_157, %c0_158] : memref<1x1x16xf32, #tpu.memory_space<vmem>>, vector<1x1x16xf32>
    %326 = vector.shape_cast %325 : vector<1x1x16xf32> to vector<1x16xf32>
    %327 = vector.shape_cast %324 : vector<1x16xf32> to vector<1x1x16xf32>
    tpu.vector_store %arg21[%c0_156, %c0_157, %c0_158], %327 {strides = array<i32>} : memref<1x1x16xf32, #tpu.memory_space<vmem>>, vector<1x1x16xf32>,
    return
  }
  func.func @transform_0(%arg0: i32) -> (i32, i32, i32) {
    %c0_i32 = arith.constant 0 : i32
    %c0_i32_0 = arith.constant 0 : i32
    %c0_i32_1 = arith.constant 0 : i32
    return %arg0, %c0_i32, %c0_i32_0 : i32, i32, i32
  }
  func.func @transform_1(%arg0: i32) -> (i32, i32) {
    %c0_i32 = arith.constant 0 : i32
    %c0_i32_0 = arith.constant 0 : i32
    %c0_i32_1 = arith.constant 0 : i32
    return %c0_i32, %c0_i32_0 : i32, i32
  }
  func.func @transform_2(%arg0: i32) -> (i32, i32) {
    %c0_i32 = arith.constant 0 : i32
    %c0_i32_0 = arith.constant 0 : i32
    %c0_i32_1 = arith.constant 0 : i32
    return %c0_i32, %c0_i32_0 : i32, i32
  }
  func.func @transform_3(%arg0: i32) -> (i32, i32) {
    %c0_i32 = arith.constant 0 : i32
    %c0_i32_0 = arith.constant 0 : i32
    %c0_i32_1 = arith.constant 0 : i32
    return %c0_i32, %c0_i32_0 : i32, i32
  }
  func.func @transform_4(%arg0: i32) -> (i32, i32) {
    %c0_i32 = arith.constant 0 : i32
    %c0_i32_0 = arith.constant 0 : i32
    %c0_i32_1 = arith.constant 0 : i32
    return %c0_i32, %c0_i32_0 : i32, i32
  }
  func.func @transform_5(%arg0: i32) -> (i32, i32, i32) {
    %c0_i32 = arith.constant 0 : i32
    %c0_i32_0 = arith.constant 0 : i32
    %c0_i32_1 = arith.constant 0 : i32
    %c0_i32_2 = arith.constant 0 : i32
    return %c0_i32, %c0_i32_0, %c0_i32_1 : i32, i32, i32
  }
  func.func @transform_6(%arg0: i32) -> (i32, i32, i32) {
    %c0_i32 = arith.constant 0 : i32
    %c0_i32_0 = arith.constant 0 : i32
    %c0_i32_1 = arith.constant 0 : i32
    %c0_i32_2 = arith.constant 0 : i32
    return %c0_i32, %c0_i32_0, %c0_i32_1 : i32, i32, i32
  }
  func.func @transform_7(%arg0: i32) -> (i32, i32, i32) {
    %c0_i32 = arith.constant 0 : i32
    %c0_i32_0 = arith.constant 0 : i32
    %c0_i32_1 = arith.constant 0 : i32
    %c0_i32_2 = arith.constant 0 : i32
    return %c0_i32, %c0_i32_0, %c0_i32_1 : i32, i32, i32
  }
  func.func @transform_8(%arg0: i32) -> (i32, i32, i32) {
    %c0_i32 = arith.constant 0 : i32
    %c0_i32_0 = arith.constant 0 : i32
    %c0_i32_1 = arith.constant 0 : i32
    %c0_i32_2 = arith.constant 0 : i32
    return %c0_i32, %c0_i32_0, %c0_i32_1 : i32, i32, i32
  }
  func.func @transform_9(%arg0: i32) -> (i32, i32, i32) {
    %c0_i32 = arith.constant 0 : i32
    %c0_i32_0 = arith.constant 0 : i32
    %c0_i32_1 = arith.constant 0 : i32
    %c0_i32_2 = arith.constant 0 : i32
    return %c0_i32, %c0_i32_0, %c0_i32_1 : i32, i32, i32
  }
  func.func @transform_10(%arg0: i32) -> (i32, i32, i32) {
    %c0_i32 = arith.constant 0 : i32
    %c0_i32_0 = arith.constant 0 : i32
    %c0_i32_1 = arith.constant 0 : i32
    %c0_i32_2 = arith.constant 0 : i32
    return %c0_i32, %c0_i32_0, %c0_i32_1 : i32, i32, i32
  }
  func.func @transform_11(%arg0: i32) -> (i32, i32, i32) {
    %c0_i32 = arith.constant 0 : i32
    %c0_i32_0 = arith.constant 0 : i32
    %c0_i32_1 = arith.constant 0 : i32
    %c0_i32_2 = arith.constant 0 : i32
    return %c0_i32, %c0_i32_0, %c0_i32_1 : i32, i32, i32
  }
  func.func @transform_12(%arg0: i32) -> (i32, i32, i32) {
    %c0_i32 = arith.constant 0 : i32
    %c0_i32_0 = arith.constant 0 : i32
    %c0_i32_1 = arith.constant 0 : i32
    %c0_i32_2 = arith.constant 0 : i32
    return %c0_i32, %c0_i32_0, %c0_i32_1 : i32, i32, i32
  }
  func.func @transform_13(%arg0: i32) -> (i32, i32, i32) {
    %c0_i32 = arith.constant 0 : i32
    %c0_i32_0 = arith.constant 0 : i32
    %c0_i32_1 = arith.constant 0 : i32
    %c0_i32_2 = arith.constant 0 : i32
    return %c0_i32, %c0_i32_0, %c0_i32_1 : i32, i32, i32
  }
  func.func @transform_14(%arg0: i32) -> (i32, i32, i32) {
    %c0_i32 = arith.constant 0 : i32
    %c0_i32_0 = arith.constant 0 : i32
    %c0_i32_1 = arith.constant 0 : i32
    %c0_i32_2 = arith.constant 0 : i32
    return %c0_i32, %c0_i32_0, %c0_i32_1 : i32, i32, i32
  }
  func.func @transform_15(%arg0: i32) -> (i32, i32, i32) {
    %c0_i32 = arith.constant 0 : i32
    %c0_i32_0 = arith.constant 0 : i32
    %c0_i32_1 = arith.constant 0 : i32
    %c0_i32_2 = arith.constant 0 : i32
    return %c0_i32, %c0_i32_0, %c0_i32_1 : i32, i32, i32
  }
  func.func @transform_16(%arg0: i32) -> (i32, i32, i32) {
    %c0_i32 = arith.constant 0 : i32
    %c0_i32_0 = arith.constant 0 : i32
    %c0_i32_1 = arith.constant 0 : i32
    %c0_i32_2 = arith.constant 0 : i32
    return %c0_i32, %c0_i32_0, %c0_i32_1 : i32, i32, i32
  }
  func.func @transform_17(%arg0: i32) -> (i32, i32) {
    %c0_i32 = arith.constant 0 : i32
    %c0_i32_0 = arith.constant 0 : i32
    %c0_i32_1 = arith.constant 0 : i32
    return %c0_i32, %c0_i32_0 : i32, i32
  }
  func.func @transform_18(%arg0: i32) -> (i32, i32) {
    %c0_i32 = arith.constant 0 : i32
    %c0_i32_0 = arith.constant 0 : i32
    %c0_i32_1 = arith.constant 0 : i32
    return %c0_i32, %c0_i32_0 : i32, i32
  }
  func.func @transform_19(%arg0: i32) -> (i32, i32) {
    %c0_i32 = arith.constant 0 : i32
    %c0_i32_0 = arith.constant 0 : i32
    %c0_i32_1 = arith.constant 0 : i32
    return %c0_i32, %c0_i32_0 : i32, i32
  }
  func.func @transform_20(%arg0: i32) -> (i32, i32, i32) {
    %c0_i32 = arith.constant 0 : i32
    %c0_i32_0 = arith.constant 0 : i32
    %c0_i32_1 = arith.constant 0 : i32
    return %arg0, %c0_i32, %c0_i32_0 : i32, i32, i32
  }
}

module attributes {stable_mosaic.version = 11 : i64} {
  func.func @_text_kernel(%arg0: i32, %arg1: memref<2xi32, #tpu.memory_space<smem>>, %arg2: memref<1x8x1xi32, #tpu.memory_space<vmem>>, %arg3: memref<64x32xf32, #tpu.memory_space<vmem>>, %arg4: memref<8x32xf32, #tpu.memory_space<vmem>>, %arg5: memref<2x1x32xf32, #tpu.memory_space<vmem>>, %arg6: memref<2x1x32xf32, #tpu.memory_space<vmem>>, %arg7: memref<2x32x96xf32, #tpu.memory_space<vmem>>, %arg8: memref<2x1x96xf32, #tpu.memory_space<vmem>>, %arg9: memref<2x32x32xf32, #tpu.memory_space<vmem>>, %arg10: memref<2x1x32xf32, #tpu.memory_space<vmem>>, %arg11: memref<2x1x32xf32, #tpu.memory_space<vmem>>, %arg12: memref<2x1x32xf32, #tpu.memory_space<vmem>>, %arg13: memref<2x32x128xf32, #tpu.memory_space<vmem>>, %arg14: memref<2x1x128xf32, #tpu.memory_space<vmem>>, %arg15: memref<2x128x32xf32, #tpu.memory_space<vmem>>, %arg16: memref<2x1x32xf32, #tpu.memory_space<vmem>>, %arg17: memref<1x32xf32, #tpu.memory_space<vmem>>, %arg18: memref<1x32xf32, #tpu.memory_space<vmem>>, %arg19: memref<32x16xf32, #tpu.memory_space<vmem>>, %arg20: memref<1x1x16xf32, #tpu.memory_space<vmem>>) attributes {dimension_semantics = [#tpu.dimension_semantics<parallel>], iteration_bounds = array<i64: 2>, scalar_prefetch = 1 : i64, scratch_operands = 0 : i64, tpu.core_type = #tpu.core_type<tc>, window_params = [{transform_indices = @transform_0, window_bounds = array<i64: 1, 8, 1>}, {pipeline_mode = #tpu.pipeline_mode<synchronous>, transform_indices = @transform_1, window_bounds = array<i64: 64, 32>}, {pipeline_mode = #tpu.pipeline_mode<synchronous>, transform_indices = @transform_2, window_bounds = array<i64: 8, 32>}, {pipeline_mode = #tpu.pipeline_mode<synchronous>, transform_indices = @transform_3, window_bounds = array<i64: 2, 1, 32>}, {pipeline_mode = #tpu.pipeline_mode<synchronous>, transform_indices = @transform_4, window_bounds = array<i64: 2, 1, 32>}, {pipeline_mode = #tpu.pipeline_mode<synchronous>, transform_indices = @transform_5, window_bounds = array<i64: 2, 32, 96>}, {pipeline_mode = #tpu.pipeline_mode<synchronous>, transform_indices = @transform_6, window_bounds = array<i64: 2, 1, 96>}, {pipeline_mode = #tpu.pipeline_mode<synchronous>, transform_indices = @transform_7, window_bounds = array<i64: 2, 32, 32>}, {pipeline_mode = #tpu.pipeline_mode<synchronous>, transform_indices = @transform_8, window_bounds = array<i64: 2, 1, 32>}, {pipeline_mode = #tpu.pipeline_mode<synchronous>, transform_indices = @transform_9, window_bounds = array<i64: 2, 1, 32>}, {pipeline_mode = #tpu.pipeline_mode<synchronous>, transform_indices = @transform_10, window_bounds = array<i64: 2, 1, 32>}, {pipeline_mode = #tpu.pipeline_mode<synchronous>, transform_indices = @transform_11, window_bounds = array<i64: 2, 32, 128>}, {pipeline_mode = #tpu.pipeline_mode<synchronous>, transform_indices = @transform_12, window_bounds = array<i64: 2, 1, 128>}, {pipeline_mode = #tpu.pipeline_mode<synchronous>, transform_indices = @transform_13, window_bounds = array<i64: 2, 128, 32>}, {pipeline_mode = #tpu.pipeline_mode<synchronous>, transform_indices = @transform_14, window_bounds = array<i64: 2, 1, 32>}, {pipeline_mode = #tpu.pipeline_mode<synchronous>, transform_indices = @transform_15, window_bounds = array<i64: 1, 32>}, {pipeline_mode = #tpu.pipeline_mode<synchronous>, transform_indices = @transform_16, window_bounds = array<i64: 1, 32>}, {pipeline_mode = #tpu.pipeline_mode<synchronous>, transform_indices = @transform_17, window_bounds = array<i64: 32, 16>}, {transform_indices = @transform_18, window_bounds = array<i64: 1, 1, 16>}]} {
    %c0 = arith.constant 0 : index
    %c0_0 = arith.constant 0 : index
    %c0_1 = arith.constant 0 : index
    %0 = vector.load %arg2[%c0, %c0_0, %c0_1] : memref<1x8x1xi32, #tpu.memory_space<vmem>>, vector<1x8x1xi32>
    %1 = vector.shape_cast %0 : vector<1x8x1xi32> to vector<8x1xi32>
    %2 = tpu.iota {dimensions = array<i32: 1>} : vector<8x64xi32>
    %3 = vector.broadcast %1 : vector<8x1xi32> to vector<8x64xi32>
    %4 = arith.cmpi eq, %2, %3 : vector<8x64xi32>
    %5 = arith.extui %4 : vector<8x64xi1> to vector<8x64xi32>
    %6 = arith.sitofp %5 : vector<8x64xi32> to vector<8x64xf32>
    %c0_2 = arith.constant 0 : index
    %c0_3 = arith.constant 0 : index
    %7 = vector.load %arg3[%c0_2, %c0_3] : memref<64x32xf32, #tpu.memory_space<vmem>>, vector<64x32xf32>
    %cst = arith.constant dense<0.000000e+00> : vector<8x32xf32>
    %8 = tpu.matmul %6, %7, %cst {dimension_numbers = #tpu.dot_dimension_numbers<[1], [0], [0], [1], [0, 0, 1, 1], [], []>} : vector<8x64xf32>, vector<64x32xf32>, vector<8x32xf32> -> vector<8x32xf32>
    %c0_4 = arith.constant 0 : index
    %c0_5 = arith.constant 0 : index
    %9 = vector.load %arg4[%c0_4, %c0_5] : memref<8x32xf32, #tpu.memory_space<vmem>>, vector<8x32xf32>
    %10 = arith.addf %8, %9 : vector<8x32xf32>
    %11 = tpu.iota {dimensions = array<i32: 0>} : vector<8x8xi32>
    %12 = tpu.iota {dimensions = array<i32: 1>} : vector<8x8xi32>
    %13 = arith.cmpi sgt, %12, %11 : vector<8x8xi32>
    %cst_6 = arith.constant -1.000000e+09 : f32
    %cst_7 = arith.constant 0.000000e+00 : f32
    %14 = vector.broadcast %cst_6 : f32 to vector<8x8xf32>
    %15 = vector.broadcast %cst_7 : f32 to vector<8x8xf32>
    %16 = arith.select %13, %14, %15 : vector<8x8xi1>, vector<8x8xf32>
    %c0_8 = arith.constant 0 : index
    %c0_9 = arith.constant 0 : index
    %c0_10 = arith.constant 0 : index
    %17 = vector.load %arg5[%c0_8, %c0_9, %c0_10] : memref<2x1x32xf32, #tpu.memory_space<vmem>>, vector<1x1x32xf32>
    %18 = vector.shape_cast %17 : vector<1x1x32xf32> to vector<1x32xf32>
    %c0_11 = arith.constant 0 : index
    %c0_12 = arith.constant 0 : index
    %c0_13 = arith.constant 0 : index
    %19 = vector.load %arg6[%c0_11, %c0_12, %c0_13] : memref<2x1x32xf32, #tpu.memory_space<vmem>>, vector<1x1x32xf32>
    %20 = vector.shape_cast %19 : vector<1x1x32xf32> to vector<1x32xf32>
    %cst_14 = arith.constant dense<0.000000e+00> : vector<8xf32>
    %21 = vector.multi_reduction <add>, %10, %cst_14 [1] : vector<8x32xf32> to vector<8xf32>
    %22 = vector.shape_cast %21 : vector<8xf32> to vector<8x1xf32>
    %cst_15 = arith.constant 3.200000e+01 : f32
    %23 = vector.broadcast %cst_15 : f32 to vector<8x1xf32>
    %24 = arith.divf %22, %23 : vector<8x1xf32>
    %25 = vector.broadcast %24 : vector<8x1xf32> to vector<8x32xf32>
    %26 = arith.subf %10, %25 : vector<8x32xf32>
    %27 = arith.mulf %26, %26 : vector<8x32xf32>
    %cst_16 = arith.constant dense<0.000000e+00> : vector<8xf32>
    %28 = vector.multi_reduction <add>, %27, %cst_16 [1] : vector<8x32xf32> to vector<8xf32>
    %29 = vector.shape_cast %28 : vector<8xf32> to vector<8x1xf32>
    %cst_17 = arith.constant 3.200000e+01 : f32
    %30 = vector.broadcast %cst_17 : f32 to vector<8x1xf32>
    %31 = arith.divf %29, %30 : vector<8x1xf32>
    %32 = vector.broadcast %24 : vector<8x1xf32> to vector<8x32xf32>
    %33 = arith.subf %10, %32 : vector<8x32xf32>
    %cst_18 = arith.constant 9.99999974E-6 : f32
    %34 = vector.broadcast %cst_18 : f32 to vector<8x1xf32>
    %35 = arith.addf %31, %34 : vector<8x1xf32>
    %36 = math.rsqrt %35 : vector<8x1xf32>
    %37 = vector.broadcast %36 : vector<8x1xf32> to vector<8x32xf32>
    %38 = arith.mulf %33, %37 : vector<8x32xf32>
    %39 = vector.broadcast %18 : vector<1x32xf32> to vector<8x32xf32>
    %40 = arith.mulf %38, %39 : vector<8x32xf32>
    %41 = vector.broadcast %20 : vector<1x32xf32> to vector<8x32xf32>
    %42 = arith.addf %40, %41 : vector<8x32xf32>
    %c0_19 = arith.constant 0 : index
    %c0_20 = arith.constant 0 : index
    %c0_21 = arith.constant 0 : index
    %43 = vector.load %arg7[%c0_19, %c0_20, %c0_21] : memref<2x32x96xf32, #tpu.memory_space<vmem>>, vector<1x32x96xf32>
    %44 = vector.shape_cast %43 : vector<1x32x96xf32> to vector<32x96xf32>
    %cst_22 = arith.constant dense<0.000000e+00> : vector<8x96xf32>
    %45 = tpu.matmul %42, %44, %cst_22 {dimension_numbers = #tpu.dot_dimension_numbers<[1], [0], [0], [1], [0, 0, 1, 1], [], []>} : vector<8x32xf32>, vector<32x96xf32>, vector<8x96xf32> -> vector<8x96xf32>
    %c0_23 = arith.constant 0 : index
    %c0_24 = arith.constant 0 : index
    %c0_25 = arith.constant 0 : index
    %46 = vector.load %arg8[%c0_23, %c0_24, %c0_25] : memref<2x1x96xf32, #tpu.memory_space<vmem>>, vector<1x1x96xf32>
    %47 = vector.shape_cast %46 : vector<1x1x96xf32> to vector<1x96xf32>
    %48 = vector.broadcast %47 : vector<1x96xf32> to vector<8x96xf32>
    %49 = arith.addf %45, %48 : vector<8x96xf32>
    %c0_26 = arith.constant 0 : index
    %c0_27 = arith.constant 0 : index
    %c0_28 = arith.constant 0 : index
    %50 = vector.load %arg9[%c0_26, %c0_27, %c0_28] : memref<2x32x32xf32, #tpu.memory_space<vmem>>, vector<1x32x32xf32>
    %51 = vector.shape_cast %50 : vector<1x32x32xf32> to vector<32x32xf32>
    %cst_29 = arith.constant 0.000000e+00 : f32
    %52 = vector.broadcast %cst_29 : f32 to vector<8x32xf32>
    %53 = vector.extract_strided_slice %49 {offsets = [0, 0], sizes = [8, 16], strides = [1, 1]} : vector<8x96xf32> to vector<8x16xf32>
    %54 = vector.extract_strided_slice %49 {offsets = [0, 32], sizes = [8, 16], strides = [1, 1]} : vector<8x96xf32> to vector<8x16xf32>
    %55 = vector.extract_strided_slice %49 {offsets = [0, 64], sizes = [8, 16], strides = [1, 1]} : vector<8x96xf32> to vector<8x16xf32>
    %cst_30 = arith.constant dense<0.000000e+00> : vector<8x8xf32>
    %56 = tpu.matmul %53, %54, %cst_30 {dimension_numbers = #tpu.dot_dimension_numbers<[1], [1], [0], [0], [0, 0, 1, 0], [], []>} : vector<8x16xf32>, vector<8x16xf32>, vector<8x8xf32> -> vector<8x8xf32>
    %cst_31 = arith.constant 2.500000e-01 : f32
    %57 = vector.broadcast %cst_31 : f32 to vector<8x8xf32>
    %58 = arith.mulf %56, %57 : vector<8x8xf32>
    %59 = arith.addf %58, %16 : vector<8x8xf32>
    %cst_32 = arith.constant dense<0xFF800000> : vector<8xf32>
    %60 = vector.multi_reduction <maximumf>, %59, %cst_32 [1] : vector<8x8xf32> to vector<8xf32>
    %61 = vector.shape_cast %60 : vector<8xf32> to vector<8x1xf32>
    %62 = vector.broadcast %61 : vector<8x1xf32> to vector<8x8xf32>
    %63 = arith.subf %59, %62 : vector<8x8xf32>
    %64 = math.exp %63 : vector<8x8xf32>
    %cst_33 = arith.constant dense<0.000000e+00> : vector<8xf32>
    %65 = vector.multi_reduction <add>, %64, %cst_33 [1] : vector<8x8xf32> to vector<8xf32>
    %66 = vector.shape_cast %65 : vector<8xf32> to vector<8x1xf32>
    %67 = tpu.reciprocal %66 {approx = true} : vector<8x1xf32> -> vector<8x1xf32>
    %68 = vector.broadcast %67 : vector<8x1xf32> to vector<8x8xf32>
    %69 = arith.mulf %64, %68 : vector<8x8xf32>
    %cst_34 = arith.constant dense<0.000000e+00> : vector<8x16xf32>
    %70 = tpu.matmul %69, %55, %cst_34 {dimension_numbers = #tpu.dot_dimension_numbers<[1], [0], [0], [1], [0, 0, 1, 1], [], []>} : vector<8x8xf32>, vector<8x16xf32>, vector<8x16xf32> -> vector<8x16xf32>
    %71 = vector.extract_strided_slice %51 {offsets = [0, 0], sizes = [16, 32], strides = [1, 1]} : vector<32x32xf32> to vector<16x32xf32>
    %cst_35 = arith.constant dense<0.000000e+00> : vector<8x32xf32>
    %72 = tpu.matmul %70, %71, %cst_35 {dimension_numbers = #tpu.dot_dimension_numbers<[1], [0], [0], [1], [0, 0, 1, 1], [], []>} : vector<8x16xf32>, vector<16x32xf32>, vector<8x32xf32> -> vector<8x32xf32>
    %73 = arith.addf %52, %72 : vector<8x32xf32>
    %74 = vector.extract_strided_slice %49 {offsets = [0, 16], sizes = [8, 16], strides = [1, 1]} : vector<8x96xf32> to vector<8x16xf32>
    %75 = vector.extract_strided_slice %49 {offsets = [0, 48], sizes = [8, 16], strides = [1, 1]} : vector<8x96xf32> to vector<8x16xf32>
    %76 = vector.extract_strided_slice %49 {offsets = [0, 80], sizes = [8, 16], strides = [1, 1]} : vector<8x96xf32> to vector<8x16xf32>
    %cst_36 = arith.constant dense<0.000000e+00> : vector<8x8xf32>
    %77 = tpu.matmul %74, %75, %cst_36 {dimension_numbers = #tpu.dot_dimension_numbers<[1], [1], [0], [0], [0, 0, 1, 0], [], []>} : vector<8x16xf32>, vector<8x16xf32>, vector<8x8xf32> -> vector<8x8xf32>
    %cst_37 = arith.constant 2.500000e-01 : f32
    %78 = vector.broadcast %cst_37 : f32 to vector<8x8xf32>
    %79 = arith.mulf %77, %78 : vector<8x8xf32>
    %80 = arith.addf %79, %16 : vector<8x8xf32>
    %cst_38 = arith.constant dense<0xFF800000> : vector<8xf32>
    %81 = vector.multi_reduction <maximumf>, %80, %cst_38 [1] : vector<8x8xf32> to vector<8xf32>
    %82 = vector.shape_cast %81 : vector<8xf32> to vector<8x1xf32>
    %83 = vector.broadcast %82 : vector<8x1xf32> to vector<8x8xf32>
    %84 = arith.subf %80, %83 : vector<8x8xf32>
    %85 = math.exp %84 : vector<8x8xf32>
    %cst_39 = arith.constant dense<0.000000e+00> : vector<8xf32>
    %86 = vector.multi_reduction <add>, %85, %cst_39 [1] : vector<8x8xf32> to vector<8xf32>
    %87 = vector.shape_cast %86 : vector<8xf32> to vector<8x1xf32>
    %88 = tpu.reciprocal %87 {approx = true} : vector<8x1xf32> -> vector<8x1xf32>
    %89 = vector.broadcast %88 : vector<8x1xf32> to vector<8x8xf32>
    %90 = arith.mulf %85, %89 : vector<8x8xf32>
    %cst_40 = arith.constant dense<0.000000e+00> : vector<8x16xf32>
    %91 = tpu.matmul %90, %76, %cst_40 {dimension_numbers = #tpu.dot_dimension_numbers<[1], [0], [0], [1], [0, 0, 1, 1], [], []>} : vector<8x8xf32>, vector<8x16xf32>, vector<8x16xf32> -> vector<8x16xf32>
    %92 = vector.extract_strided_slice %51 {offsets = [16, 0], sizes = [16, 32], strides = [1, 1]} : vector<32x32xf32> to vector<16x32xf32>
    %cst_41 = arith.constant dense<0.000000e+00> : vector<8x32xf32>
    %93 = tpu.matmul %91, %92, %cst_41 {dimension_numbers = #tpu.dot_dimension_numbers<[1], [0], [0], [1], [0, 0, 1, 1], [], []>} : vector<8x16xf32>, vector<16x32xf32>, vector<8x32xf32> -> vector<8x32xf32>
    %94 = arith.addf %73, %93 : vector<8x32xf32>
    %95 = arith.addf %10, %94 : vector<8x32xf32>
    %c0_42 = arith.constant 0 : index
    %c0_43 = arith.constant 0 : index
    %c0_44 = arith.constant 0 : index
    %96 = vector.load %arg10[%c0_42, %c0_43, %c0_44] : memref<2x1x32xf32, #tpu.memory_space<vmem>>, vector<1x1x32xf32>
    %97 = vector.shape_cast %96 : vector<1x1x32xf32> to vector<1x32xf32>
    %98 = vector.broadcast %97 : vector<1x32xf32> to vector<8x32xf32>
    %99 = arith.addf %95, %98 : vector<8x32xf32>
    %c0_45 = arith.constant 0 : index
    %c0_46 = arith.constant 0 : index
    %c0_47 = arith.constant 0 : index
    %100 = vector.load %arg11[%c0_45, %c0_46, %c0_47] : memref<2x1x32xf32, #tpu.memory_space<vmem>>, vector<1x1x32xf32>
    %101 = vector.shape_cast %100 : vector<1x1x32xf32> to vector<1x32xf32>
    %c0_48 = arith.constant 0 : index
    %c0_49 = arith.constant 0 : index
    %c0_50 = arith.constant 0 : index
    %102 = vector.load %arg12[%c0_48, %c0_49, %c0_50] : memref<2x1x32xf32, #tpu.memory_space<vmem>>, vector<1x1x32xf32>
    %103 = vector.shape_cast %102 : vector<1x1x32xf32> to vector<1x32xf32>
    %cst_51 = arith.constant dense<0.000000e+00> : vector<8xf32>
    %104 = vector.multi_reduction <add>, %99, %cst_51 [1] : vector<8x32xf32> to vector<8xf32>
    %105 = vector.shape_cast %104 : vector<8xf32> to vector<8x1xf32>
    %cst_52 = arith.constant 3.200000e+01 : f32
    %106 = vector.broadcast %cst_52 : f32 to vector<8x1xf32>
    %107 = arith.divf %105, %106 : vector<8x1xf32>
    %108 = vector.broadcast %107 : vector<8x1xf32> to vector<8x32xf32>
    %109 = arith.subf %99, %108 : vector<8x32xf32>
    %110 = arith.mulf %109, %109 : vector<8x32xf32>
    %cst_53 = arith.constant dense<0.000000e+00> : vector<8xf32>
    %111 = vector.multi_reduction <add>, %110, %cst_53 [1] : vector<8x32xf32> to vector<8xf32>
    %112 = vector.shape_cast %111 : vector<8xf32> to vector<8x1xf32>
    %cst_54 = arith.constant 3.200000e+01 : f32
    %113 = vector.broadcast %cst_54 : f32 to vector<8x1xf32>
    %114 = arith.divf %112, %113 : vector<8x1xf32>
    %115 = vector.broadcast %107 : vector<8x1xf32> to vector<8x32xf32>
    %116 = arith.subf %99, %115 : vector<8x32xf32>
    %cst_55 = arith.constant 9.99999974E-6 : f32
    %117 = vector.broadcast %cst_55 : f32 to vector<8x1xf32>
    %118 = arith.addf %114, %117 : vector<8x1xf32>
    %119 = math.rsqrt %118 : vector<8x1xf32>
    %120 = vector.broadcast %119 : vector<8x1xf32> to vector<8x32xf32>
    %121 = arith.mulf %116, %120 : vector<8x32xf32>
    %122 = vector.broadcast %101 : vector<1x32xf32> to vector<8x32xf32>
    %123 = arith.mulf %121, %122 : vector<8x32xf32>
    %124 = vector.broadcast %103 : vector<1x32xf32> to vector<8x32xf32>
    %125 = arith.addf %123, %124 : vector<8x32xf32>
    %c0_56 = arith.constant 0 : index
    %c0_57 = arith.constant 0 : index
    %c0_58 = arith.constant 0 : index
    %126 = vector.load %arg13[%c0_56, %c0_57, %c0_58] : memref<2x32x128xf32, #tpu.memory_space<vmem>>, vector<1x32x128xf32>
    %127 = vector.shape_cast %126 : vector<1x32x128xf32> to vector<32x128xf32>
    %cst_59 = arith.constant dense<0.000000e+00> : vector<8x128xf32>
    %128 = tpu.matmul %125, %127, %cst_59 {dimension_numbers = #tpu.dot_dimension_numbers<[1], [0], [0], [1], [0, 0, 1, 1], [], []>} : vector<8x32xf32>, vector<32x128xf32>, vector<8x128xf32> -> vector<8x128xf32>
    %c0_60 = arith.constant 0 : index
    %c0_61 = arith.constant 0 : index
    %c0_62 = arith.constant 0 : index
    %129 = vector.load %arg14[%c0_60, %c0_61, %c0_62] : memref<2x1x128xf32, #tpu.memory_space<vmem>>, vector<1x1x128xf32>
    %130 = vector.shape_cast %129 : vector<1x1x128xf32> to vector<1x128xf32>
    %131 = vector.broadcast %130 : vector<1x128xf32> to vector<8x128xf32>
    %132 = arith.addf %128, %131 : vector<8x128xf32>
    %cst_63 = arith.constant 1.702000e+00 : f32
    %133 = vector.broadcast %cst_63 : f32 to vector<8x128xf32>
    %134 = arith.mulf %133, %132 : vector<8x128xf32>
    %135 = arith.negf %134 : vector<8x128xf32>
    %136 = math.exp %135 : vector<8x128xf32>
    %cst_64 = arith.constant 1.000000e+00 : f32
    %137 = vector.broadcast %cst_64 : f32 to vector<8x128xf32>
    %138 = arith.addf %137, %136 : vector<8x128xf32>
    %139 = arith.divf %137, %138 : vector<8x128xf32>
    %140 = arith.mulf %132, %139 : vector<8x128xf32>
    %c0_65 = arith.constant 0 : index
    %c0_66 = arith.constant 0 : index
    %c0_67 = arith.constant 0 : index
    %141 = vector.load %arg15[%c0_65, %c0_66, %c0_67] : memref<2x128x32xf32, #tpu.memory_space<vmem>>, vector<1x128x32xf32>
    %142 = vector.shape_cast %141 : vector<1x128x32xf32> to vector<128x32xf32>
    %cst_68 = arith.constant dense<0.000000e+00> : vector<8x32xf32>
    %143 = tpu.matmul %140, %142, %cst_68 {dimension_numbers = #tpu.dot_dimension_numbers<[1], [0], [0], [1], [0, 0, 1, 1], [], []>} : vector<8x128xf32>, vector<128x32xf32>, vector<8x32xf32> -> vector<8x32xf32>
    %c0_69 = arith.constant 0 : index
    %c0_70 = arith.constant 0 : index
    %c0_71 = arith.constant 0 : index
    %144 = vector.load %arg16[%c0_69, %c0_70, %c0_71] : memref<2x1x32xf32, #tpu.memory_space<vmem>>, vector<1x1x32xf32>
    %145 = vector.shape_cast %144 : vector<1x1x32xf32> to vector<1x32xf32>
    %146 = vector.broadcast %145 : vector<1x32xf32> to vector<8x32xf32>
    %147 = arith.addf %143, %146 : vector<8x32xf32>
    %148 = arith.addf %99, %147 : vector<8x32xf32>
    %c1 = arith.constant 1 : index
    %c0_72 = arith.constant 0 : index
    %c0_73 = arith.constant 0 : index
    %149 = vector.load %arg5[%c1, %c0_72, %c0_73] : memref<2x1x32xf32, #tpu.memory_space<vmem>>, vector<1x1x32xf32>
    %150 = vector.shape_cast %149 : vector<1x1x32xf32> to vector<1x32xf32>
    %c1_74 = arith.constant 1 : index
    %c0_75 = arith.constant 0 : index
    %c0_76 = arith.constant 0 : index
    %151 = vector.load %arg6[%c1_74, %c0_75, %c0_76] : memref<2x1x32xf32, #tpu.memory_space<vmem>>, vector<1x1x32xf32>
    %152 = vector.shape_cast %151 : vector<1x1x32xf32> to vector<1x32xf32>
    %cst_77 = arith.constant dense<0.000000e+00> : vector<8xf32>
    %153 = vector.multi_reduction <add>, %148, %cst_77 [1] : vector<8x32xf32> to vector<8xf32>
    %154 = vector.shape_cast %153 : vector<8xf32> to vector<8x1xf32>
    %cst_78 = arith.constant 3.200000e+01 : f32
    %155 = vector.broadcast %cst_78 : f32 to vector<8x1xf32>
    %156 = arith.divf %154, %155 : vector<8x1xf32>
    %157 = vector.broadcast %156 : vector<8x1xf32> to vector<8x32xf32>
    %158 = arith.subf %148, %157 : vector<8x32xf32>
    %159 = arith.mulf %158, %158 : vector<8x32xf32>
    %cst_79 = arith.constant dense<0.000000e+00> : vector<8xf32>
    %160 = vector.multi_reduction <add>, %159, %cst_79 [1] : vector<8x32xf32> to vector<8xf32>
    %161 = vector.shape_cast %160 : vector<8xf32> to vector<8x1xf32>
    %cst_80 = arith.constant 3.200000e+01 : f32
    %162 = vector.broadcast %cst_80 : f32 to vector<8x1xf32>
    %163 = arith.divf %161, %162 : vector<8x1xf32>
    %164 = vector.broadcast %156 : vector<8x1xf32> to vector<8x32xf32>
    %165 = arith.subf %148, %164 : vector<8x32xf32>
    %cst_81 = arith.constant 9.99999974E-6 : f32
    %166 = vector.broadcast %cst_81 : f32 to vector<8x1xf32>
    %167 = arith.addf %163, %166 : vector<8x1xf32>
    %168 = math.rsqrt %167 : vector<8x1xf32>
    %169 = vector.broadcast %168 : vector<8x1xf32> to vector<8x32xf32>
    %170 = arith.mulf %165, %169 : vector<8x32xf32>
    %171 = vector.broadcast %150 : vector<1x32xf32> to vector<8x32xf32>
    %172 = arith.mulf %170, %171 : vector<8x32xf32>
    %173 = vector.broadcast %152 : vector<1x32xf32> to vector<8x32xf32>
    %174 = arith.addf %172, %173 : vector<8x32xf32>
    %c1_82 = arith.constant 1 : index
    %c0_83 = arith.constant 0 : index
    %c0_84 = arith.constant 0 : index
    %175 = vector.load %arg7[%c1_82, %c0_83, %c0_84] : memref<2x32x96xf32, #tpu.memory_space<vmem>>, vector<1x32x96xf32>
    %176 = vector.shape_cast %175 : vector<1x32x96xf32> to vector<32x96xf32>
    %cst_85 = arith.constant dense<0.000000e+00> : vector<8x96xf32>
    %177 = tpu.matmul %174, %176, %cst_85 {dimension_numbers = #tpu.dot_dimension_numbers<[1], [0], [0], [1], [0, 0, 1, 1], [], []>} : vector<8x32xf32>, vector<32x96xf32>, vector<8x96xf32> -> vector<8x96xf32>
    %c1_86 = arith.constant 1 : index
    %c0_87 = arith.constant 0 : index
    %c0_88 = arith.constant 0 : index
    %178 = vector.load %arg8[%c1_86, %c0_87, %c0_88] : memref<2x1x96xf32, #tpu.memory_space<vmem>>, vector<1x1x96xf32>
    %179 = vector.shape_cast %178 : vector<1x1x96xf32> to vector<1x96xf32>
    %180 = vector.broadcast %179 : vector<1x96xf32> to vector<8x96xf32>
    %181 = arith.addf %177, %180 : vector<8x96xf32>
    %c1_89 = arith.constant 1 : index
    %c0_90 = arith.constant 0 : index
    %c0_91 = arith.constant 0 : index
    %182 = vector.load %arg9[%c1_89, %c0_90, %c0_91] : memref<2x32x32xf32, #tpu.memory_space<vmem>>, vector<1x32x32xf32>
    %183 = vector.shape_cast %182 : vector<1x32x32xf32> to vector<32x32xf32>
    %cst_92 = arith.constant 0.000000e+00 : f32
    %184 = vector.broadcast %cst_92 : f32 to vector<8x32xf32>
    %185 = vector.extract_strided_slice %181 {offsets = [0, 0], sizes = [8, 16], strides = [1, 1]} : vector<8x96xf32> to vector<8x16xf32>
    %186 = vector.extract_strided_slice %181 {offsets = [0, 32], sizes = [8, 16], strides = [1, 1]} : vector<8x96xf32> to vector<8x16xf32>
    %187 = vector.extract_strided_slice %181 {offsets = [0, 64], sizes = [8, 16], strides = [1, 1]} : vector<8x96xf32> to vector<8x16xf32>
    %cst_93 = arith.constant dense<0.000000e+00> : vector<8x8xf32>
    %188 = tpu.matmul %185, %186, %cst_93 {dimension_numbers = #tpu.dot_dimension_numbers<[1], [1], [0], [0], [0, 0, 1, 0], [], []>} : vector<8x16xf32>, vector<8x16xf32>, vector<8x8xf32> -> vector<8x8xf32>
    %cst_94 = arith.constant 2.500000e-01 : f32
    %189 = vector.broadcast %cst_94 : f32 to vector<8x8xf32>
    %190 = arith.mulf %188, %189 : vector<8x8xf32>
    %191 = arith.addf %190, %16 : vector<8x8xf32>
    %cst_95 = arith.constant dense<0xFF800000> : vector<8xf32>
    %192 = vector.multi_reduction <maximumf>, %191, %cst_95 [1] : vector<8x8xf32> to vector<8xf32>
    %193 = vector.shape_cast %192 : vector<8xf32> to vector<8x1xf32>
    %194 = vector.broadcast %193 : vector<8x1xf32> to vector<8x8xf32>
    %195 = arith.subf %191, %194 : vector<8x8xf32>
    %196 = math.exp %195 : vector<8x8xf32>
    %cst_96 = arith.constant dense<0.000000e+00> : vector<8xf32>
    %197 = vector.multi_reduction <add>, %196, %cst_96 [1] : vector<8x8xf32> to vector<8xf32>
    %198 = vector.shape_cast %197 : vector<8xf32> to vector<8x1xf32>
    %199 = tpu.reciprocal %198 {approx = true} : vector<8x1xf32> -> vector<8x1xf32>
    %200 = vector.broadcast %199 : vector<8x1xf32> to vector<8x8xf32>
    %201 = arith.mulf %196, %200 : vector<8x8xf32>
    %cst_97 = arith.constant dense<0.000000e+00> : vector<8x16xf32>
    %202 = tpu.matmul %201, %187, %cst_97 {dimension_numbers = #tpu.dot_dimension_numbers<[1], [0], [0], [1], [0, 0, 1, 1], [], []>} : vector<8x8xf32>, vector<8x16xf32>, vector<8x16xf32> -> vector<8x16xf32>
    %203 = vector.extract_strided_slice %183 {offsets = [0, 0], sizes = [16, 32], strides = [1, 1]} : vector<32x32xf32> to vector<16x32xf32>
    %cst_98 = arith.constant dense<0.000000e+00> : vector<8x32xf32>
    %204 = tpu.matmul %202, %203, %cst_98 {dimension_numbers = #tpu.dot_dimension_numbers<[1], [0], [0], [1], [0, 0, 1, 1], [], []>} : vector<8x16xf32>, vector<16x32xf32>, vector<8x32xf32> -> vector<8x32xf32>
    %205 = arith.addf %184, %204 : vector<8x32xf32>
    %206 = vector.extract_strided_slice %181 {offsets = [0, 16], sizes = [8, 16], strides = [1, 1]} : vector<8x96xf32> to vector<8x16xf32>
    %207 = vector.extract_strided_slice %181 {offsets = [0, 48], sizes = [8, 16], strides = [1, 1]} : vector<8x96xf32> to vector<8x16xf32>
    %208 = vector.extract_strided_slice %181 {offsets = [0, 80], sizes = [8, 16], strides = [1, 1]} : vector<8x96xf32> to vector<8x16xf32>
    %cst_99 = arith.constant dense<0.000000e+00> : vector<8x8xf32>
    %209 = tpu.matmul %206, %207, %cst_99 {dimension_numbers = #tpu.dot_dimension_numbers<[1], [1], [0], [0], [0, 0, 1, 0], [], []>} : vector<8x16xf32>, vector<8x16xf32>, vector<8x8xf32> -> vector<8x8xf32>
    %cst_100 = arith.constant 2.500000e-01 : f32
    %210 = vector.broadcast %cst_100 : f32 to vector<8x8xf32>
    %211 = arith.mulf %209, %210 : vector<8x8xf32>
    %212 = arith.addf %211, %16 : vector<8x8xf32>
    %cst_101 = arith.constant dense<0xFF800000> : vector<8xf32>
    %213 = vector.multi_reduction <maximumf>, %212, %cst_101 [1] : vector<8x8xf32> to vector<8xf32>
    %214 = vector.shape_cast %213 : vector<8xf32> to vector<8x1xf32>
    %215 = vector.broadcast %214 : vector<8x1xf32> to vector<8x8xf32>
    %216 = arith.subf %212, %215 : vector<8x8xf32>
    %217 = math.exp %216 : vector<8x8xf32>
    %cst_102 = arith.constant dense<0.000000e+00> : vector<8xf32>
    %218 = vector.multi_reduction <add>, %217, %cst_102 [1] : vector<8x8xf32> to vector<8xf32>
    %219 = vector.shape_cast %218 : vector<8xf32> to vector<8x1xf32>
    %220 = tpu.reciprocal %219 {approx = true} : vector<8x1xf32> -> vector<8x1xf32>
    %221 = vector.broadcast %220 : vector<8x1xf32> to vector<8x8xf32>
    %222 = arith.mulf %217, %221 : vector<8x8xf32>
    %cst_103 = arith.constant dense<0.000000e+00> : vector<8x16xf32>
    %223 = tpu.matmul %222, %208, %cst_103 {dimension_numbers = #tpu.dot_dimension_numbers<[1], [0], [0], [1], [0, 0, 1, 1], [], []>} : vector<8x8xf32>, vector<8x16xf32>, vector<8x16xf32> -> vector<8x16xf32>
    %224 = vector.extract_strided_slice %183 {offsets = [16, 0], sizes = [16, 32], strides = [1, 1]} : vector<32x32xf32> to vector<16x32xf32>
    %cst_104 = arith.constant dense<0.000000e+00> : vector<8x32xf32>
    %225 = tpu.matmul %223, %224, %cst_104 {dimension_numbers = #tpu.dot_dimension_numbers<[1], [0], [0], [1], [0, 0, 1, 1], [], []>} : vector<8x16xf32>, vector<16x32xf32>, vector<8x32xf32> -> vector<8x32xf32>
    %226 = arith.addf %205, %225 : vector<8x32xf32>
    %227 = arith.addf %148, %226 : vector<8x32xf32>
    %c1_105 = arith.constant 1 : index
    %c0_106 = arith.constant 0 : index
    %c0_107 = arith.constant 0 : index
    %228 = vector.load %arg10[%c1_105, %c0_106, %c0_107] : memref<2x1x32xf32, #tpu.memory_space<vmem>>, vector<1x1x32xf32>
    %229 = vector.shape_cast %228 : vector<1x1x32xf32> to vector<1x32xf32>
    %230 = vector.broadcast %229 : vector<1x32xf32> to vector<8x32xf32>
    %231 = arith.addf %227, %230 : vector<8x32xf32>
    %c1_108 = arith.constant 1 : index
    %c0_109 = arith.constant 0 : index
    %c0_110 = arith.constant 0 : index
    %232 = vector.load %arg11[%c1_108, %c0_109, %c0_110] : memref<2x1x32xf32, #tpu.memory_space<vmem>>, vector<1x1x32xf32>
    %233 = vector.shape_cast %232 : vector<1x1x32xf32> to vector<1x32xf32>
    %c1_111 = arith.constant 1 : index
    %c0_112 = arith.constant 0 : index
    %c0_113 = arith.constant 0 : index
    %234 = vector.load %arg12[%c1_111, %c0_112, %c0_113] : memref<2x1x32xf32, #tpu.memory_space<vmem>>, vector<1x1x32xf32>
    %235 = vector.shape_cast %234 : vector<1x1x32xf32> to vector<1x32xf32>
    %cst_114 = arith.constant dense<0.000000e+00> : vector<8xf32>
    %236 = vector.multi_reduction <add>, %231, %cst_114 [1] : vector<8x32xf32> to vector<8xf32>
    %237 = vector.shape_cast %236 : vector<8xf32> to vector<8x1xf32>
    %cst_115 = arith.constant 3.200000e+01 : f32
    %238 = vector.broadcast %cst_115 : f32 to vector<8x1xf32>
    %239 = arith.divf %237, %238 : vector<8x1xf32>
    %240 = vector.broadcast %239 : vector<8x1xf32> to vector<8x32xf32>
    %241 = arith.subf %231, %240 : vector<8x32xf32>
    %242 = arith.mulf %241, %241 : vector<8x32xf32>
    %cst_116 = arith.constant dense<0.000000e+00> : vector<8xf32>
    %243 = vector.multi_reduction <add>, %242, %cst_116 [1] : vector<8x32xf32> to vector<8xf32>
    %244 = vector.shape_cast %243 : vector<8xf32> to vector<8x1xf32>
    %cst_117 = arith.constant 3.200000e+01 : f32
    %245 = vector.broadcast %cst_117 : f32 to vector<8x1xf32>
    %246 = arith.divf %244, %245 : vector<8x1xf32>
    %247 = vector.broadcast %239 : vector<8x1xf32> to vector<8x32xf32>
    %248 = arith.subf %231, %247 : vector<8x32xf32>
    %cst_118 = arith.constant 9.99999974E-6 : f32
    %249 = vector.broadcast %cst_118 : f32 to vector<8x1xf32>
    %250 = arith.addf %246, %249 : vector<8x1xf32>
    %251 = math.rsqrt %250 : vector<8x1xf32>
    %252 = vector.broadcast %251 : vector<8x1xf32> to vector<8x32xf32>
    %253 = arith.mulf %248, %252 : vector<8x32xf32>
    %254 = vector.broadcast %233 : vector<1x32xf32> to vector<8x32xf32>
    %255 = arith.mulf %253, %254 : vector<8x32xf32>
    %256 = vector.broadcast %235 : vector<1x32xf32> to vector<8x32xf32>
    %257 = arith.addf %255, %256 : vector<8x32xf32>
    %c1_119 = arith.constant 1 : index
    %c0_120 = arith.constant 0 : index
    %c0_121 = arith.constant 0 : index
    %258 = vector.load %arg13[%c1_119, %c0_120, %c0_121] : memref<2x32x128xf32, #tpu.memory_space<vmem>>, vector<1x32x128xf32>
    %259 = vector.shape_cast %258 : vector<1x32x128xf32> to vector<32x128xf32>
    %cst_122 = arith.constant dense<0.000000e+00> : vector<8x128xf32>
    %260 = tpu.matmul %257, %259, %cst_122 {dimension_numbers = #tpu.dot_dimension_numbers<[1], [0], [0], [1], [0, 0, 1, 1], [], []>} : vector<8x32xf32>, vector<32x128xf32>, vector<8x128xf32> -> vector<8x128xf32>
    %c1_123 = arith.constant 1 : index
    %c0_124 = arith.constant 0 : index
    %c0_125 = arith.constant 0 : index
    %261 = vector.load %arg14[%c1_123, %c0_124, %c0_125] : memref<2x1x128xf32, #tpu.memory_space<vmem>>, vector<1x1x128xf32>
    %262 = vector.shape_cast %261 : vector<1x1x128xf32> to vector<1x128xf32>
    %263 = vector.broadcast %262 : vector<1x128xf32> to vector<8x128xf32>
    %264 = arith.addf %260, %263 : vector<8x128xf32>
    %cst_126 = arith.constant 1.702000e+00 : f32
    %265 = vector.broadcast %cst_126 : f32 to vector<8x128xf32>
    %266 = arith.mulf %265, %264 : vector<8x128xf32>
    %267 = arith.negf %266 : vector<8x128xf32>
    %268 = math.exp %267 : vector<8x128xf32>
    %cst_127 = arith.constant 1.000000e+00 : f32
    %269 = vector.broadcast %cst_127 : f32 to vector<8x128xf32>
    %270 = arith.addf %269, %268 : vector<8x128xf32>
    %271 = arith.divf %269, %270 : vector<8x128xf32>
    %272 = arith.mulf %264, %271 : vector<8x128xf32>
    %c1_128 = arith.constant 1 : index
    %c0_129 = arith.constant 0 : index
    %c0_130 = arith.constant 0 : index
    %273 = vector.load %arg15[%c1_128, %c0_129, %c0_130] : memref<2x128x32xf32, #tpu.memory_space<vmem>>, vector<1x128x32xf32>
    %274 = vector.shape_cast %273 : vector<1x128x32xf32> to vector<128x32xf32>
    %cst_131 = arith.constant dense<0.000000e+00> : vector<8x32xf32>
    %275 = tpu.matmul %272, %274, %cst_131 {dimension_numbers = #tpu.dot_dimension_numbers<[1], [0], [0], [1], [0, 0, 1, 1], [], []>} : vector<8x128xf32>, vector<128x32xf32>, vector<8x32xf32> -> vector<8x32xf32>
    %c1_132 = arith.constant 1 : index
    %c0_133 = arith.constant 0 : index
    %c0_134 = arith.constant 0 : index
    %276 = vector.load %arg16[%c1_132, %c0_133, %c0_134] : memref<2x1x32xf32, #tpu.memory_space<vmem>>, vector<1x1x32xf32>
    %277 = vector.shape_cast %276 : vector<1x1x32xf32> to vector<1x32xf32>
    %278 = vector.broadcast %277 : vector<1x32xf32> to vector<8x32xf32>
    %279 = arith.addf %275, %278 : vector<8x32xf32>
    %280 = arith.addf %231, %279 : vector<8x32xf32>
    %281 = arith.index_cast %arg0 : i32 to index
    %282 = memref.load %arg1[%281] : memref<2xi32, #tpu.memory_space<smem>>
    %283 = tpu.iota {dimensions = array<i32: 1>} : vector<1x8xi32>
    %284 = vector.broadcast %282 : i32 to vector<1x8xi32>
    %285 = arith.cmpi eq, %283, %284 : vector<1x8xi32>
    %286 = arith.extui %285 : vector<1x8xi1> to vector<1x8xi32>
    %287 = arith.sitofp %286 : vector<1x8xi32> to vector<1x8xf32>
    %cst_135 = arith.constant dense<0.000000e+00> : vector<1x32xf32>
    %288 = tpu.matmul %287, %280, %cst_135 {dimension_numbers = #tpu.dot_dimension_numbers<[1], [0], [0], [1], [0, 0, 1, 1], [], []>} : vector<1x8xf32>, vector<8x32xf32>, vector<1x32xf32> -> vector<1x32xf32>
    %c0_136 = arith.constant 0 : index
    %c0_137 = arith.constant 0 : index
    %289 = vector.load %arg17[%c0_136, %c0_137] : memref<1x32xf32, #tpu.memory_space<vmem>>, vector<1x32xf32>
    %c0_138 = arith.constant 0 : index
    %c0_139 = arith.constant 0 : index
    %290 = vector.load %arg18[%c0_138, %c0_139] : memref<1x32xf32, #tpu.memory_space<vmem>>, vector<1x32xf32>
    %cst_140 = arith.constant dense<0.000000e+00> : vector<1xf32>
    %291 = vector.multi_reduction <add>, %288, %cst_140 [1] : vector<1x32xf32> to vector<1xf32>
    %292 = vector.shape_cast %291 : vector<1xf32> to vector<1x1xf32>
    %cst_141 = arith.constant 3.200000e+01 : f32
    %293 = vector.broadcast %cst_141 : f32 to vector<1x1xf32>
    %294 = arith.divf %292, %293 : vector<1x1xf32>
    %295 = vector.broadcast %294 : vector<1x1xf32> to vector<1x32xf32>
    %296 = arith.subf %288, %295 : vector<1x32xf32>
    %297 = arith.mulf %296, %296 : vector<1x32xf32>
    %cst_142 = arith.constant dense<0.000000e+00> : vector<1xf32>
    %298 = vector.multi_reduction <add>, %297, %cst_142 [1] : vector<1x32xf32> to vector<1xf32>
    %299 = vector.shape_cast %298 : vector<1xf32> to vector<1x1xf32>
    %cst_143 = arith.constant 3.200000e+01 : f32
    %300 = vector.broadcast %cst_143 : f32 to vector<1x1xf32>
    %301 = arith.divf %299, %300 : vector<1x1xf32>
    %302 = vector.broadcast %294 : vector<1x1xf32> to vector<1x32xf32>
    %303 = arith.subf %288, %302 : vector<1x32xf32>
    %cst_144 = arith.constant 9.99999974E-6 : f32
    %304 = vector.broadcast %cst_144 : f32 to vector<1x1xf32>
    %305 = arith.addf %301, %304 : vector<1x1xf32>
    %306 = math.rsqrt %305 : vector<1x1xf32>
    %307 = vector.broadcast %306 : vector<1x1xf32> to vector<1x32xf32>
    %308 = arith.mulf %303, %307 : vector<1x32xf32>
    %309 = arith.mulf %308, %289 : vector<1x32xf32>
    %310 = arith.addf %309, %290 : vector<1x32xf32>
    %c0_145 = arith.constant 0 : index
    %c0_146 = arith.constant 0 : index
    %311 = vector.load %arg19[%c0_145, %c0_146] : memref<32x16xf32, #tpu.memory_space<vmem>>, vector<32x16xf32>
    %cst_147 = arith.constant dense<0.000000e+00> : vector<1x16xf32>
    %312 = tpu.matmul %310, %311, %cst_147 {dimension_numbers = #tpu.dot_dimension_numbers<[1], [0], [0], [1], [0, 0, 1, 1], [], []>} : vector<1x32xf32>, vector<32x16xf32>, vector<1x16xf32> -> vector<1x16xf32>
    %c0_148 = arith.constant 0 : index
    %c0_149 = arith.constant 0 : index
    %c0_150 = arith.constant 0 : index
    %313 = vector.load %arg20[%c0_148, %c0_149, %c0_150] : memref<1x1x16xf32, #tpu.memory_space<vmem>>, vector<1x1x16xf32>
    %314 = vector.shape_cast %313 : vector<1x1x16xf32> to vector<1x16xf32>
    %315 = vector.shape_cast %312 : vector<1x16xf32> to vector<1x1x16xf32>
    tpu.vector_store %arg20[%c0_148, %c0_149, %c0_150], %315 {strides = array<i32>} : memref<1x1x16xf32, #tpu.memory_space<vmem>>, vector<1x1x16xf32>,
    return
  }
  func.func @transform_0(%arg0: i32, %arg1: memref<2xi32, #tpu.memory_space<smem>>) -> (i32, i32, i32) {
    %c0_i32 = arith.constant 0 : i32
    %c0_i32_0 = arith.constant 0 : i32
    %c0_i32_1 = arith.constant 0 : i32
    return %arg0, %c0_i32, %c0_i32_0 : i32, i32, i32
  }
  func.func @transform_1(%arg0: i32, %arg1: memref<2xi32, #tpu.memory_space<smem>>) -> (i32, i32) {
    %c0_i32 = arith.constant 0 : i32
    %c0_i32_0 = arith.constant 0 : i32
    %c0_i32_1 = arith.constant 0 : i32
    return %c0_i32, %c0_i32_0 : i32, i32
  }
  func.func @transform_2(%arg0: i32, %arg1: memref<2xi32, #tpu.memory_space<smem>>) -> (i32, i32) {
    %c0_i32 = arith.constant 0 : i32
    %c0_i32_0 = arith.constant 0 : i32
    %c0_i32_1 = arith.constant 0 : i32
    return %c0_i32, %c0_i32_0 : i32, i32
  }
  func.func @transform_3(%arg0: i32, %arg1: memref<2xi32, #tpu.memory_space<smem>>) -> (i32, i32, i32) {
    %c0_i32 = arith.constant 0 : i32
    %c0_i32_0 = arith.constant 0 : i32
    %c0_i32_1 = arith.constant 0 : i32
    %c0_i32_2 = arith.constant 0 : i32
    return %c0_i32, %c0_i32_0, %c0_i32_1 : i32, i32, i32
  }
  func.func @transform_4(%arg0: i32, %arg1: memref<2xi32, #tpu.memory_space<smem>>) -> (i32, i32, i32) {
    %c0_i32 = arith.constant 0 : i32
    %c0_i32_0 = arith.constant 0 : i32
    %c0_i32_1 = arith.constant 0 : i32
    %c0_i32_2 = arith.constant 0 : i32
    return %c0_i32, %c0_i32_0, %c0_i32_1 : i32, i32, i32
  }
  func.func @transform_5(%arg0: i32, %arg1: memref<2xi32, #tpu.memory_space<smem>>) -> (i32, i32, i32) {
    %c0_i32 = arith.constant 0 : i32
    %c0_i32_0 = arith.constant 0 : i32
    %c0_i32_1 = arith.constant 0 : i32
    %c0_i32_2 = arith.constant 0 : i32
    return %c0_i32, %c0_i32_0, %c0_i32_1 : i32, i32, i32
  }
  func.func @transform_6(%arg0: i32, %arg1: memref<2xi32, #tpu.memory_space<smem>>) -> (i32, i32, i32) {
    %c0_i32 = arith.constant 0 : i32
    %c0_i32_0 = arith.constant 0 : i32
    %c0_i32_1 = arith.constant 0 : i32
    %c0_i32_2 = arith.constant 0 : i32
    return %c0_i32, %c0_i32_0, %c0_i32_1 : i32, i32, i32
  }
  func.func @transform_7(%arg0: i32, %arg1: memref<2xi32, #tpu.memory_space<smem>>) -> (i32, i32, i32) {
    %c0_i32 = arith.constant 0 : i32
    %c0_i32_0 = arith.constant 0 : i32
    %c0_i32_1 = arith.constant 0 : i32
    %c0_i32_2 = arith.constant 0 : i32
    return %c0_i32, %c0_i32_0, %c0_i32_1 : i32, i32, i32
  }
  func.func @transform_8(%arg0: i32, %arg1: memref<2xi32, #tpu.memory_space<smem>>) -> (i32, i32, i32) {
    %c0_i32 = arith.constant 0 : i32
    %c0_i32_0 = arith.constant 0 : i32
    %c0_i32_1 = arith.constant 0 : i32
    %c0_i32_2 = arith.constant 0 : i32
    return %c0_i32, %c0_i32_0, %c0_i32_1 : i32, i32, i32
  }
  func.func @transform_9(%arg0: i32, %arg1: memref<2xi32, #tpu.memory_space<smem>>) -> (i32, i32, i32) {
    %c0_i32 = arith.constant 0 : i32
    %c0_i32_0 = arith.constant 0 : i32
    %c0_i32_1 = arith.constant 0 : i32
    %c0_i32_2 = arith.constant 0 : i32
    return %c0_i32, %c0_i32_0, %c0_i32_1 : i32, i32, i32
  }
  func.func @transform_10(%arg0: i32, %arg1: memref<2xi32, #tpu.memory_space<smem>>) -> (i32, i32, i32) {
    %c0_i32 = arith.constant 0 : i32
    %c0_i32_0 = arith.constant 0 : i32
    %c0_i32_1 = arith.constant 0 : i32
    %c0_i32_2 = arith.constant 0 : i32
    return %c0_i32, %c0_i32_0, %c0_i32_1 : i32, i32, i32
  }
  func.func @transform_11(%arg0: i32, %arg1: memref<2xi32, #tpu.memory_space<smem>>) -> (i32, i32, i32) {
    %c0_i32 = arith.constant 0 : i32
    %c0_i32_0 = arith.constant 0 : i32
    %c0_i32_1 = arith.constant 0 : i32
    %c0_i32_2 = arith.constant 0 : i32
    return %c0_i32, %c0_i32_0, %c0_i32_1 : i32, i32, i32
  }
  func.func @transform_12(%arg0: i32, %arg1: memref<2xi32, #tpu.memory_space<smem>>) -> (i32, i32, i32) {
    %c0_i32 = arith.constant 0 : i32
    %c0_i32_0 = arith.constant 0 : i32
    %c0_i32_1 = arith.constant 0 : i32
    %c0_i32_2 = arith.constant 0 : i32
    return %c0_i32, %c0_i32_0, %c0_i32_1 : i32, i32, i32
  }
  func.func @transform_13(%arg0: i32, %arg1: memref<2xi32, #tpu.memory_space<smem>>) -> (i32, i32, i32) {
    %c0_i32 = arith.constant 0 : i32
    %c0_i32_0 = arith.constant 0 : i32
    %c0_i32_1 = arith.constant 0 : i32
    %c0_i32_2 = arith.constant 0 : i32
    return %c0_i32, %c0_i32_0, %c0_i32_1 : i32, i32, i32
  }
  func.func @transform_14(%arg0: i32, %arg1: memref<2xi32, #tpu.memory_space<smem>>) -> (i32, i32, i32) {
    %c0_i32 = arith.constant 0 : i32
    %c0_i32_0 = arith.constant 0 : i32
    %c0_i32_1 = arith.constant 0 : i32
    %c0_i32_2 = arith.constant 0 : i32
    return %c0_i32, %c0_i32_0, %c0_i32_1 : i32, i32, i32
  }
  func.func @transform_15(%arg0: i32, %arg1: memref<2xi32, #tpu.memory_space<smem>>) -> (i32, i32) {
    %c0_i32 = arith.constant 0 : i32
    %c0_i32_0 = arith.constant 0 : i32
    %c0_i32_1 = arith.constant 0 : i32
    return %c0_i32, %c0_i32_0 : i32, i32
  }
  func.func @transform_16(%arg0: i32, %arg1: memref<2xi32, #tpu.memory_space<smem>>) -> (i32, i32) {
    %c0_i32 = arith.constant 0 : i32
    %c0_i32_0 = arith.constant 0 : i32
    %c0_i32_1 = arith.constant 0 : i32
    return %c0_i32, %c0_i32_0 : i32, i32
  }
  func.func @transform_17(%arg0: i32, %arg1: memref<2xi32, #tpu.memory_space<smem>>) -> (i32, i32) {
    %c0_i32 = arith.constant 0 : i32
    %c0_i32_0 = arith.constant 0 : i32
    %c0_i32_1 = arith.constant 0 : i32
    return %c0_i32, %c0_i32_0 : i32, i32
  }
  func.func @transform_18(%arg0: i32, %arg1: memref<2xi32, #tpu.memory_space<smem>>) -> (i32, i32, i32) {
    %c0_i32 = arith.constant 0 : i32
    %c0_i32_0 = arith.constant 0 : i32
    %c0_i32_1 = arith.constant 0 : i32
    return %arg0, %c0_i32, %c0_i32_0 : i32, i32, i32
  }
}

</mosaic_0001>

<bundles_post_ra>
// kernel: clip_forward.2
= control target key start
LH: loop header
LB: loop body
LE: loop exit
PB: predicated region body
PF: predicated region fallthrough
CT: control target
= control target key end

     0   :  { %s3920_s0 = inlined_call_operand.vmem [shape: f32[2,8,192], index: 0, kind: input, shape index: {}]   ;;  %s3921_s1 = inlined_call_operand.vmem [shape: f32[192,32], index: 1, kind: input, shape index: {}]   ;;  %s3922_s2 = inlined_call_operand.vmem [shape: f32[8,32], index: 2, kind: input, shape index: {}]   ;;  %s3923_s3 = inlined_call_operand.vmem [shape: f32[1,32], index: 3, kind: input, shape index: {}]   ;;  %s3924_s4 = inlined_call_operand.vmem [shape: f32[1,32], index: 4, kind: input, shape index: {}]   ;;  %s3925_s5 = inlined_call_operand.vmem [shape: f32[2,1,32], index: 5, kind: input, shape index: {}]   ;;  %s3926_s6 = inlined_call_operand.vmem [shape: f32[2,1,32], index: 6, kind: input, shape index: {}]   ;;  %s3927_s7 = inlined_call_operand.vmem [shape: f32[2,32,96], index: 7, kind: input, shape index: {}]   ;;  %s3928_s8 = inlined_call_operand.vmem [shape: f32[2,1,96], index: 8, kind: input, shape index: {}]   ;;  %s3929_s9 = inlined_call_operand.vmem [shape: f32[2,32,32], index: 9, kind: input, shape index: {}]   ;;  %s3930_s10 = inlined_call_operand.vmem [shape: f32[2,1,32], index: 10, kind: input, shape index: {}]   ;;  %s3931_s11 = inlined_call_operand.vmem [shape: f32[2,1,32], index: 11, kind: input, shape index: {}]   ;;  %s3932_s12 = inlined_call_operand.vmem [shape: f32[2,1,32], index: 12, kind: input, shape index: {}]   ;;  %s3933_s13 = inlined_call_operand.vmem [shape: f32[2,32,128], index: 13, kind: input, shape index: {}]   ;;  %s3934_s14 = inlined_call_operand.vmem [shape: f32[2,1,128], index: 14, kind: input, shape index: {}]   ;;  %s3935_s15 = inlined_call_operand.vmem [shape: f32[2,128,32], index: 15, kind: input, shape index: {}]   ;;  %s3936_s16 = inlined_call_operand.vmem [shape: f32[2,1,32], index: 16, kind: input, shape index: {}]   ;;  %s3937_s17 = inlined_call_operand.vmem [shape: f32[1,32], index: 17, kind: input, shape index: {}]   ;;  %s3938_s18 = inlined_call_operand.vmem [shape: f32[1,32], index: 18, kind: input, shape index: {}]   ;;  %s3939_s19 = inlined_call_operand.vmem [shape: f32[32,16], index: 19, kind: input, shape index: {}]   ;;  %s3940_s20 = inlined_call_operand.hbm [shape: f32[2,1,16], index: 20, kind: output, shape index: {}]  }
   0x1   :  { %3950 = sst [smem:[#allocation11_spill]] %s3920_s0 }
   0x2   :  { %3951 = sst [smem:[#allocation12_spill]] %s3921_s1 }
   0x3   :  { %3952 = sst [smem:[#allocation13_spill]] %s3922_s2 }
   0x4   :  { %3953 = sst [smem:[#allocation14_spill]] %s3923_s3 }
   0x5   :  { %3954 = sst [smem:[#allocation15_spill]] %s3924_s4 }
   0x6   :  { %3955 = sst [smem:[#allocation16_spill]] %s3940_s20 }
   0x7   :  { %25 = vsyncpa [#allocation3], 0 }
   0x8   :  { %27 = vsyncpa [#allocation3 + $0x1], 0  ;;  %s3337_s1 = smov 0   ;;  %s3339_s22 = smov 0  }
   0x9   :  { %s3341_s23 = smov 0   ;;  %s3343_s24 = smov 0  }
   0xa LB: > { %3956 = sst [smem:[#allocation5_spill]] %s3209_s1  ;;  %s3358_s2 = sadd.s32 4294967295, %s3221_s24   ;;  %s3221_s24 = sphi %s3343_s24, %s3974_s24   ;;  %s3217_s23 = sphi %s3341_s23, %s3976_s23   ;;  %s3213_s22 = sphi %s3339_s22, %s3978_s22   ;;  %s3209_s1 = sphi %s3337_s1, %s3977_s1  }
   0xb   : > { %3957 = sst [smem:[#allocation6_spill]] %s3217_s23  ;;  %s2582_s25 = sadd.s32 4294967294, %s3221_s24  }
   0xc   : > { %3958 = sst [smem:[#allocation7_spill]] %s3221_s24  ;;  %s3362_s3 = sadd.s32 1, %s3221_s24  }
   0xd   : > { %3959 = sst [smem:[#allocation8_spill]] %s3362_s3  ;;  %s465_s26 = sadd.s32 1, %s3217_s23 }
   0xe   : > { %s462_s27 = ssub.s32 %s3221_s24, %s3362_s3  ;;  %p475_p0 = scmp.ne.s32.totalorder %s3217_s23, %s3213_s22 }
   0xf   : > { %p463_p1 = scmp.eq.s32.totalorder %s462_s27, 0  ;;  %p476_p2 = scmp.eq.s32.totalorder %s3358_s2, 1 }
  0x10   : > { %p481_p3 = scmp.ne.s32.totalorder %s3213_s22, %s3209_s1  ;;  %p482_p4 = scmp.eq.s32.totalorder %s2582_s25, 1 }
  0x11   : > { %s3373_s28 = scalar_select %p463_p1, %s3217_s23, %s465_s26  }
  0x12   : > { %p3375_p5 = por %p476_p2, %p475_p0  ;;  %p3379_p6 = por %p482_p4, %p481_p3 }
  0x13   : > { %3960 = sst [smem:[#allocation9_spill]] %s3373_s28  ;;  %p2585_p7 = scmp.ge.s32.totalorder %s3221_s24, 1 }
  0x14   : > { %s3962_s29 = scalar_select %p3379_p6, 1, 0 }
  0x15   : > { %p565_p8 = scmp.lt.s32.totalorder %s3221_s24, 3 }
  0x16   : > { %3963 = sst [smem:[#allocation10_spill]] %s3962_s29 }
  0x17   : > { %p566_p9 = pnand %p2585_p7, %p565_p8 }
  0x18   : > { %s3964_s21 = sld [smem:[#allocation12_spill]] (!%p566_p9)  ;;  %p622_p10 = scmp.lt.s32.totalorder (!%p566_p9), %s3358_s2, 1  ;;  %v3223_v3 = vmov (!%p566_p9), 0.0|0.0   ;;  %vm654_vm0 = vcmask (!%p566_p9), 523264   ;;  %vm730_vm1 = vcmask (!%p566_p9), 261120   ;;  %vm3224_vm2 = vmmov (!%p566_p9), 0  }
  0x19   : > { %569 = sbr.rel (%p566_p9) target bundleno = 6974 (0x1b3e), region = 100  ;;  %2950 = vmatprep.subr.bf16.mxu0 (!%p566_p9), %v3223_v3  ;;  %s3965_s24 = sld [smem:[#allocation11_spill]] (!%p566_p9)  ;;  %vm883_vm3 = vcmask (!%p566_p9), 130048   ;;  %vm960_vm5 = vcmask (!%p566_p9), 64512   ;;  %vm2419_vm6 = vcmask (!%p566_p9), 253952   ;;  %vm2512_vm7 = vcmask (!%p566_p9), 122880  }
  0x1a   : > { %s3226_s0 = smov (!%p566_p9), 96   ;;  %s3227_s25 = smov (!%p566_p9), 80  }
  0x1b   : > { %s3228_s1 = smov (!%p566_p9), 64   ;;  %s620_s29 = sand.u32 (!%p566_p9), 1, %s3213_s22  }
  0x1c   : > { %s3970_s28 = sld [smem:[#allocation16_spill]] (!%p566_p9) }
  0x1e   : > { %v629_v0 = vld [vmem:[%s3964_s21] sm:$0xff] (!%p566_p9)  ;;  %v630_v1 = vld [vmem:[%s3964_s21 + $0x8] sm:$0xff] (!%p566_p9)  ;;  %v631_v2 = vld [vmem:[%s3964_s21 + $0x10] sm:$0xff] (!%p566_p9) }
  0x1f   : > { %v2951_v4 = vpack.c.bf16 (!%p566_p9), %v630_v1, %v629_v0  ;;  %v632_v5 = vld [vmem:[%s3964_s21 + $0x18] sm:$0xff] (!%p566_p9)  ;;  %v633_v7 = vld [vmem:[%s3964_s21 + $0x20] sm:$0xff] (!%p566_p9)  ;;  %v634_v8 = vld [vmem:[%s3964_s21 + $0x28] sm:$0xff] (!%p566_p9) }
  0x20   : > { %s623_s30 = scalar_select %p622_p10, %s3358_s2, 1  ;;  %v2954_v6 = vpack.c.bf16 %v632_v5, %v631_v2  ;;  %v2957_v9 = vpack.c.bf16 %v634_v8, %v633_v7  ;;  %v635_v10 = vld [vmem:[%s3964_s21 + $0x30] sm:$0xff]  ;;  %v636_v11 = vld [vmem:[%s3964_s21 + $0x38] sm:$0xff]  ;;  %v637_v14 = vld [vmem:[%s3964_s21 + $0x40] sm:$0xff]  ;;  %v3225_v7 = vmov 0.0  }
  0x21   : > { %2952 = vmatpush1.bf16.msra.mxu0 %v2951_v4  ;;  %v2960_v13 = vpack.c.bf16 %v636_v11, %v635_v10  ;;  %v638_v15 = vld [vmem:[%s3964_s21 + $0x48] sm:$0xff]  ;;  %v639_v17 = vld [vmem:[%s3964_s21 + $0x50] sm:$0xff]  ;;  %v640_v18 = vld [vmem:[%s3964_s21 + $0x58] sm:$0xff]  ;;  %2768 = vmatprep.subr.mxu1 %v3225_v7 }
  0x22   : > { %2953 = vmatprep.subr.bf16.mxu0 %v3223_v3  ;;  %s2669_s27 = sshll.u32 %s623_s30, 4  ;;  %v2963_v16 = vpack.c.bf16 %v638_v15, %v637_v14  ;;  %v2966_v19 = vpack.c.bf16 %v640_v18, %v639_v17  ;;  %v641_v20 = vld [vmem:[%s3964_s21 + $0x60] sm:$0xff]  ;;  %v642_v21 = vld [vmem:[%s3964_s21 + $0x68] sm:$0xff]  ;;  %v643_v23 = vld [vmem:[%s3964_s21 + $0x70] sm:$0xff]  ;;  %s3967_s30 = sld [smem:[#allocation14_spill]]  ;;  %2770 = vmatprep.mubr.msk.f32.mxu1 %vm3224_vm2, %v3225_v7 }
  0x23   : > { %s3410_s20 = scalar_lea.vmem %s3965_s24, %s2669_s27  ;;  %v2969_v22 = vpack.c.bf16 %v642_v21, %v641_v20  ;;  %v644_v24 = vld [vmem:[%s3964_s21 + $0x78] sm:$0xff]  ;;  %v645_v26 = vld [vmem:[%s3964_s21 + $0x80] sm:$0xff]  ;;  %v646_v27 = vld [vmem:[%s3964_s21 + $0x88] sm:$0xff]  ;;  %s3966_s24 = sld [smem:[#allocation13_spill]] }
  0x24   : > { %v628_v12 = vld [vmem:[%s3410_s20 + $0x8] sm:$0xff]  ;;  %v2972_v25 = vpack.c.bf16 %v644_v24, %v643_v23  ;;  %v2975_v28 = vpack.c.bf16 %v646_v27, %v645_v26  ;;  %v647_v29 = vld [vmem:[%s3964_s21 + $0x90] sm:$0xff]  ;;  %v648_v30 = vld [vmem:[%s3964_s21 + $0x98] sm:$0xff]  ;;  %s3968_s27 = sld [smem:[#allocation15_spill]] }
  0x25   : > { %2955 = vmatpush1.bf16.msra.mxu0 %v2954_v6  ;;  %2588 = vmatprep.mubr.msk.f32.mxu0 %vm654_vm0, %v628_v12  ;;  %v2978_v31 = vpack.c.bf16 %v648_v30, %v647_v29  ;;  %v649_v32 = vld [vmem:[%s3964_s21 + $0xa0] sm:$0xff]  ;;  %v650_v33 = vld [vmem:[%s3964_s21 + $0xa8] sm:$0xff]  ;;  %v651_v35 = vld [vmem:[%s3964_s21 + $0xb0] sm:$0xff] }
  0x26   : > { %2956 = vmatprep.subr.bf16.mxu0 %v3223_v3  ;;  %v2981_v34 = vpack.c.bf16 %v650_v33, %v649_v32  ;;  %v652_v36 = vld [vmem:[%s3964_s21 + $0xb8] sm:$0xff]  ;;  %v627_v38 = vld [vmem:[%s3410_s20] sm:$0xff]  ;;  %v793_v1 = vld [vmem:[%s3927_s7 + $0x8] sm:$0xff]  ;;  %s3949_s20 = smov 48  }
  0x27   : > { %v2984_v37 = vpack.c.bf16 %v652_v36, %v651_v35  ;;  %v792_v0 = vld [vmem:[%s3927_s7] sm:$0xff]  ;;  %v794_v4 = vld [vmem:[%s3927_s7 + $0x10] sm:$0xff]  ;;  %v795_v5 = vld [vmem:[%s3927_s7 + $0x18] sm:$0xff] }
  0x28   : > { %v2589_v53 = vld [vmem:[%s3967_s30] ss:$0 sm:$0xff]  ;;  %v2987_v2 = vpack.c.bf16 %v793_v1, %v792_v0  ;;  %v2990_v6 = vpack.c.bf16 %v795_v5, %v794_v4  ;;  %s621_s30 = scalar_lea.vmem [#allocation2], %s620_s29 }
  0x29   : > { %2958 = vmatpush1.bf16.msra.mxu0 %v2957_v9  ;;  %v653_v39 = vld [vmem:[%s3966_s24] sm:$0xff]  ;;  %s3229_s24 = smov 112  }
  0x2a   : > { %2959 = vmatprep.subr.bf16.mxu0 %v3223_v3  ;;  %v2590_v55 = vld [vmem:[%s3968_s27] ss:$0 sm:$0xff]  ;;  %s2515_s27 = scalar_lea.sflag [#allocation3], %s620_s29 }
  0x2b   : > { %v2591_v12 = vld [vmem:[%s3925_s5] ss:$0 sm:$0xff] }
  0x2c   : > { %v2592_v14 = vld [vmem:[%s3926_s6] ss:$0 sm:$0xff] }
  0x2d   : > { %2961 = vmatpush1.bf16.msra.mxu0 %v2960_v13  ;;  %v2593_v17 = vld [vmem:[%s3928_s8] ss:$0 sm:$0xff] }
  0x2e   : > { %2962 = vmatprep.subr.bf16.mxu0 %v3223_v3 }
  0x31   : > { %2964 = vmatpush1.bf16.msra.mxu0 %v2963_v16 }
  0x32   : > { %2965 = vmatprep.subr.bf16.mxu0 %v3223_v3 }
  0x35   : > { %2967 = vmatpush1.bf16.msra.mxu0 %v2966_v19 }
  0x36   : > { %2968 = vmatprep.subr.bf16.mxu0 %v3223_v3 }
  0x39   : > { %2970 = vmatpush1.bf16.msra.mxu0 %v2969_v22  ;;  %v759_v22 = vlaneseq }
  0x3a   : > { %2971 = vmatprep.subr.bf16.mxu0 %v3223_v3 }
  0x3b   : > { %v760_v23 = vand.u32 127, %v759_v22 }
  0x3d   : > { %2973 = vmatpush1.bf16.msra.mxu0 %v2972_v25  ;;  %vm761_vm4 = vcmp.ge.s32.totalorder %v760_v23, 5 }
  0x3e   : > { %2974 = vmatprep.subr.bf16.mxu0 %v3223_v3  ;;  %v3535_v25 = vsel %vm761_vm4, -1e+09, %v3225_v7 }
  0x41   : > { %2976 = vmatpush1.bf16.msra.mxu0 %v2975_v28 }
  0x42   : > { %2977 = vmatprep.subr.bf16.mxu0 %v3223_v3 }
  0x45   : > { %2979 = vmatpush1.bf16.msra.mxu0 %v2978_v31 }
  0x46   : > { %2980 = vmatprep.subr.bf16.mxu0 %v3223_v3 }
  0x49   : > { %2982 = vmatpush1.bf16.msra.mxu0 %v2981_v34 }
  0x4a   : > { %2983 = vmatprep.subr.bf16.mxu0 %v3223_v3 }
  0x4d   : > { %2985 = vmatpush1.bf16.msra.mxu0 %v2984_v37 }
  0x4e   : > { %2986 = vmatprep.subr.bf16.mxu0 %v3223_v3 }
  0x50   : > { %723 = vmatmul.mubr.f32.vlgmr.msra.gmra.mrb[0].mxu0 %v627_v38 }
  0x51   : > { %2988 = vmatpush3.bf16.msra.mxu0 %v2987_v2  ;;  %2765 = vmatprep.mubr.msk.f32.mxu0 %vm3224_vm2, %v3225_v7 }
  0x52   : > { %2989 = vmatprep.subr.bf16.mxu0 %v3223_v3 }
  0x55   : > { %2991 = vmatpush3.bf16.msra.mxu0 %v2990_v6 }
  0x56   : > { %3028 = vmatprep.subr.bf16.mxu0 %v3223_v3 }
 0x123   : > { %v724_v40 = vpop.f32.mrb[0].mxu0 }
 0x124   : > { %v725_v41 = vadd.f32 %v724_v40, %v653_v39  ;;  %v726_v42 = vpop.f32.mrb[1].mxu0 }
 0x126   : > { %v731_v43 = vsel %vm730_vm1, %v725_v41, 0.0 }
 0x127   : > { %732 = vadd.xlane.f32.xlu0 %v731_v43 }
 0x1b4   : > { %v733_v44 = vpop.xlane.xlu0 %732 }
 0x1b5   : > { %v735_v45 = vmul.f32 0.03125, %v733_v44 }
 0x1b7   : > { %v736_v46 = vsub.f32 %v725_v41, %v735_v45 }
 0x1b9   : > { %v737_v47 = vmul.f32 %v736_v46, %v736_v46 }
 0x1bb   : > { %v738_v48 = vsel %vm730_vm1, %v737_v47, 0.0 }
 0x1bc   : > { %739 = vadd.xlane.f32.xlu0 %v738_v48 }
 0x249   : > { %v740_v49 = vpop.xlane.xlu0 %739 }
 0x24a   : > { %v741_v50 = vmul.f32 0.03125, %v740_v49 }
 0x24c   : > { %v742_v51 = vadd.f32 1e-05, %v741_v50 }
 0x24e   : > { %3123 = vrsqrt.f32 %v742_v51 }
 0x258   : > { %v3124_v52 = vpop.eup %3123 }
 0x259   : > { %v744_v54 = vmul.f32 %v3124_v52, %v736_v46 }
 0x25b   : > { %v751_v56 = vmul.f32 %v2589_v53, %v744_v54 }
 0x25d   : > { %v3490_v57 = vadd.f32 %v2590_v55, %v751_v56  ;;  %v878_v55 = vld [vmem:[%s3929_s9 + $0x10] sm:$0xff]  ;;  %v879_v56 = vld [vmem:[%s3929_s9 + $0x18] sm:$0xff] }
 0x25f   : > { %v765_v58 = vsel %vm730_vm1, %v3490_v57, 0.0 }
 0x260   : > { %766 = vadd.xlane.f32.xlu1 %v765_v58 }
 0x2ed   : > { %v767_v59 = vpop.xlane.xlu1 %766 }
 0x2ee   : > { %v768_v60 = vmul.f32 0.03125, %v767_v59  ;;  %v2993_v59 = vpack.c.bf16 %v879_v56, %v878_v55  ;;  %v1506_v55 = vld [vmem:[%s3935_s15 + $0x78] sm:$0xff] }
 0x2f0   : > { %v769_v61 = vsub.f32 %v3490_v57, %v768_v60 }
 0x2f2   : > { %v770_v62 = vmul.f32 %v769_v61, %v769_v61 }
 0x2f4   : > { %v771_v63 = vsel %vm730_vm1, %v770_v62, 0.0  ;;  %v877_v62 = vld [vmem:[%s3929_s9 + $0x8] sm:$0xff] }
 0x2f5   : > { %772 = vadd.xlane.f32.xlu1 %v771_v63 }
 0x382   : > { %v773_v8 = vpop.xlane.xlu1 %772 }
 0x383   : > { %v774_v9 = vmul.f32 0.03125, %v773_v8 }
 0x385   : > { %v775_v10 = vadd.f32 1e-05, %v774_v9  ;;  %v2603_v9 = vld [vmem:[%s3930_s10] ss:$0 sm:$0xff] }
 0x387   : > { %3125 = vrsqrt.f32 %v775_v10 }
 0x391   : > { %v3126_v11 = vpop.eup %3125 }
 0x392   : > { %v777_v13 = vmul.f32 %v3126_v11, %v769_v61  ;;  %v876_v61 = vld [vmem:[%s3929_s9] sm:$0xff] }
 0x393   : > { %v2996_v63 = vpack.c.bf16 %v877_v62, %v876_v61 }
 0x394   : > { %v784_v15 = vmul.f32 %v2591_v12, %v777_v13 }
 0x396   : > { %v791_v16 = vadd.f32 %v2592_v14, %v784_v15 }
 0x398   : > { %2766 = vmatmul.mubr.msk.f32.vlgmr.msra.gmra.mrb[2].mxu0 %vm730_vm1, %v791_v16 }
 0x399   : > { %2856 = vmatprep.mubr.msk.f32.mxu0 %vm3224_vm2, %v3225_v7 }
 0x46b   : > { %v872_v18 = vpop.f32.mrb[2].mxu0 }
 0x46c   : > { %v873_v19 = vadd.f32 %v2593_v17, %v872_v18  ;;  %v2767_v20 = vpop.f32.mrb[3].mxu0  ;;  %v1399_v18 = vld [vmem:[%s3933_s13] sm:$0xff] }
 0x46d   : > { %v1401_v20 = vld [vmem:[%s3933_s13 + $0x10] sm:$0xff] }
 0x46e   : > { %881 = vrot.lane.b32.xlu0 %v873_v19, %s3226_s0 }
 0x472   : > { %1050 = vrot.lane.b32.xlu0 %v873_v19, %s3227_s25 }
 0x4e0   : > { %v882_v21 = vpop.permute.xlu0 %881 }
 0x4e1   : > { %2769 = vmatpush3.xpose.msk.msra.mxu1 %vm883_vm3, %v882_v21  ;;  %v1402_v21 = vld [vmem:[%s3933_s13 + $0x18] sm:$0xff] }
 0x4e2   : > { %2773 = vmatprep.subr.mxu1 %v3225_v7  ;;  %v3002_v22 = vpack.c.bf16 %v1402_v21, %v1401_v20  ;;  %v2617_v20 = vld [vmem:[%s3927_s7 + $0x38] sm:$0xff] }
 0x4e4   : > { %2771 = vmatmul.mubr.msk.f32.vlgmr.msra.gmra.mrb[0].mxu1 %vm883_vm3, %v873_v19  ;;  %v1051_v39 = vpop.permute.xlu0 %1050 }
 0x4e5   : > { %2775 = vmatprep.mubr.msk.f32.mxu1 %vm3224_vm2, %v3225_v7 }
 0x5b7   : > { %v954_v24 = vpop.f32.mrb[0].mxu1 }
 0x5b8   : > { %v958_v26 = vmul.f32 0.25, %v954_v24  ;;  %v2772_v27 = vpop.f32.mrb[1].mxu1 }
 0x5ba   : > { %v959_v28 = vadd.f32 %v958_v26, %v3535_v25 }
 0x5bc   : > { %v961_v29 = vsel %vm960_vm5, %v959_v28, -inf }
 0x5bd   : > { %962 = vmax.xlane.f32.xlu1 %v961_v29 }
 0x5ce   : > { %972 = vrot.lane.b32.xlu1 %v873_v19, %s3228_s1 }
 0x64a   : > { %v963_v30 = vpop.xlane.xlu1 %962 }
 0x64b   : > { %v964_v31 = vsub.f32 %v959_v28, %v963_v30  ;;  %v2604_v28 = vld [vmem:[%s3931_s11] ss:$0 sm:$0xff] }
 0x64c   : > { %v2605_v30 = vld [vmem:[%s3932_s12] ss:$0 sm:$0xff] }
 0x64d   : > { %v965_v32 = vmul.f32 1.442695, %v964_v31 }
 0x64e   : > { %v973_v33 = vpop.permute.xlu1 %972 }
 0x64f   : > { %3127 = vpow2.f32 %v965_v32  ;;  %2774 = vmatpush3.msra.mxu1 %v973_v33  ;;  %v1491_v33 = vld [vmem:[%s3935_s15] sm:$0xff] }
 0x650   : > { %2778 = vmatprep.subr.mxu1 %v3225_v7 }
 0x659   : > { %v3128_v34 = vpop.eup %3127 }
 0x65a   : > { %v967_v35 = vsel %vm960_vm5, %v3128_v34, 0.0 }
 0x65b   : > { %968 = vadd.xlane.f32.xlu1 %v967_v35 }
 0x66c   : > { %1048 = vrot.lane.b32.xlu1 %v873_v19, %s3229_s24 }
 0x6e8   : > { %v969_v36 = vpop.xlane.xlu1 %968 }
 0x6e9   : > { %3129 = vrcp.f32 %v969_v36  ;;  %v1493_v36 = vld [vmem:[%s3935_s15 + $0x10] sm:$0xff] }
 0x6ec   : > { %v1049_v40 = vpop.permute.xlu1 %1048 }
 0x6f3   : > { %v3130_v37 = vpop.eup %3129 }
 0x6f4   : > { %v971_v38 = vmul.f32 %v3130_v37, %v3128_v34  ;;  %v1492_v34 = vld [vmem:[%s3935_s15 + $0x8] sm:$0xff]  ;;  %v1494_v37 = vld [vmem:[%s3935_s15 + $0x18] sm:$0xff] }
 0x6f5   : > { %v3005_v35 = vpack.c.bf16 %v1492_v34, %v1491_v33 }
 0x6f6   : > { %2776 = vmatmul.mubr.msk.f32.vlgmr.msra.gmra.mrb[2].mxu1 %vm960_vm5, %v971_v38  ;;  %v3008_v38 = vpack.c.bf16 %v1494_v37, %v1493_v36 }
 0x6f7   : > { %2779 = vmatpush3.xpose.msk.msra.mxu1 %vm883_vm3, %v1051_v39  ;;  %2780 = vmatprep.mubr.msk.f32.mxu1 %vm3224_vm2, %v3225_v7  ;;  %v1495_v39 = vld [vmem:[%s3935_s15 + $0x20] sm:$0xff] }
 0x6f8   : > { %2783 = vmatprep.subr.mxu1 %v3225_v7 }
 0x6fa   : > { %2781 = vmatmul.mubr.msk.f32.vlgmr.msra.gmra.mrb[4].mxu1 %vm883_vm3, %v1049_v40  ;;  %v1496_v40 = vld [vmem:[%s3935_s15 + $0x28] sm:$0xff] }
 0x6fb   : > { %2785 = vmatprep.mubr.msk.f32.mxu1 %vm3224_vm2, %v3225_v7 }
 0x7c9   : > { %v1044_v41 = vpop.f32.mrb[2].mxu1 }
 0x7ca   : > { %v2777_v42 = vpop.f32.mrb[3].mxu1 }
 0x7cb   : > { %v1497_v42 = vld [vmem:[%s3935_s15 + $0x30] sm:$0xff] }
 0x7cd   : > { %v1122_v43 = vpop.f32.mrb[4].mxu1 }
 0x7ce   : > { %v1126_v44 = vmul.f32 0.25, %v1122_v43  ;;  %v2782_v45 = vpop.f32.mrb[5].mxu1  ;;  %v1498_v43 = vld [vmem:[%s3935_s15 + $0x38] sm:$0xff] }
 0x7cf   : > { %v1499_v45 = vld [vmem:[%s3935_s15 + $0x40] sm:$0xff] }
 0x7d0   : > { %v1127_v46 = vadd.f32 %v1126_v44, %v3535_v25  ;;  %v3014_v44 = vpack.c.bf16 %v1498_v43, %v1497_v42 }
 0x7d2   : > { %v1128_v47 = vsel %vm960_vm5, %v1127_v46, -inf }
 0x7d3   : > { %1129 = vmax.xlane.f32.xlu0 %v1128_v47 }
 0x7e9   : > { %1139 = vrot.lane.b32.xlu0 %v873_v19, %s3949_s20 }
 0x860   : > { %v1130_v48 = vpop.xlane.xlu0 %1129 }
 0x861   : > { %v1131_v49 = vsub.f32 %v1127_v46, %v1130_v48  ;;  %v1500_v46 = vld [vmem:[%s3935_s15 + $0x48] sm:$0xff]  ;;  %v1501_v48 = vld [vmem:[%s3935_s15 + $0x50] sm:$0xff] }
 0x862   : > { %v3017_v47 = vpack.c.bf16 %v1500_v46, %v1499_v45 }
 0x863   : > { %v1132_v50 = vmul.f32 1.442695, %v1131_v49  ;;  %v1502_v49 = vld [vmem:[%s3935_s15 + $0x58] sm:$0xff] }
 0x864   : > { %v1140_v51 = vpop.permute.xlu0 %1139 }
 0x865   : > { %3131 = vpow2.f32 %v1132_v50  ;;  %2784 = vmatpush3.msra.mxu1 %v1140_v51  ;;  %v3020_v50 = vpack.c.bf16 %v1502_v49, %v1501_v48  ;;  %v1503_v51 = vld [vmem:[%s3935_s15 + $0x60] sm:$0xff]  ;;  %v2622_v49 = vld [vmem:[%s3929_s9 + $0x28] sm:$0xff] }
 0x866   : > { %2992 = vmatprep.subr.bf16.mxu1 %v3223_v3  ;;  %v2621_v48 = vld [vmem:[%s3929_s9 + $0x20] sm:$0xff] }
 0x86f   : > { %v3132_v52 = vpop.eup %3131 }
 0x870   : > { %v1134_v53 = vsel %vm960_vm5, %v3132_v52, 0.0 }
 0x871   : > { %1135 = vadd.xlane.f32.xlu1 %v1134_v53 }
 0x8fe   : > { %v1136_v54 = vpop.xlane.xlu1 %1135 }
 0x8ff   : > { %3133 = vrcp.f32 %v1136_v54  ;;  %v1505_v54 = vld [vmem:[%s3935_s15 + $0x70] sm:$0xff] }
 0x900   : > { %v3026_v56 = vpack.c.bf16 %v1506_v55, %v1505_v54 }
 0x909   : > { %v3134_v58 = vpop.eup %3133 }
 0x90a   : > { %v1138_v60 = vmul.f32 %v3134_v58, %v3132_v52  ;;  %v1504_v52 = vld [vmem:[%s3935_s15 + $0x68] sm:$0xff]  ;;  %v2606_v58 = vld [vmem:[%s3934_s14] ss:$0 sm:$0xff] }
 0x90b   : > { %v3023_v53 = vpack.c.bf16 %v1504_v52, %v1503_v51 }
 0x90c   : > { %2786 = vmatmul.mubr.msk.f32.vlgmr.msra.gmra.mrb[6].mxu1 %vm960_vm5, %v1138_v60 }
 0x90d   : > { %2994 = vmatpush3.bf16.msra.mxu1 %v2993_v59  ;;  %2792 = vmatprep.mubr.msk.f32.mxu1 %vm3224_vm2, %v3225_v7 }
 0x90e   : > { %2995 = vmatprep.subr.bf16.mxu1 %v3223_v3 }
 0x9df   : > { %v1211_v0 = vpop.f32.mrb[6].mxu1 }
 0x9e0   : > { %v2787_v1 = vpop.f32.mrb[7].mxu1  ;;  %2793 = vmatmul.mubr.msk.f32.vlgmr.msra.gmra.mrb[8].mxu1 %vm883_vm3, %v1211_v0 }
 0x9e1   : > { %2997 = vmatpush3.bf16.msra.mxu1 %v2996_v63  ;;  %2799 = vmatprep.mubr.msk.f32.mxu1 %vm3224_vm2, %v3225_v7 }
 0x9e2   : > { %2998 = vmatprep.subr.bf16.mxu1 %v3223_v3 }
 0x9e4   : > { %2800 = vmatmul.mubr.msk.f32.vlgmr.msra.gmra.mrb[10].mxu1 %vm883_vm3, %v1044_v41  ;;  %v3011_v41 = vpack.c.bf16 %v1496_v40, %v1495_v39 }
 0x9e5   : > { %2810 = vmatprep.mubr.msk.f32.mxu1 %vm3224_vm2, %v3225_v7 }
 0xab3   : > { %v1284_v2 = vpop.f32.mrb[8].mxu1 }
 0xab4   : > { %v2794_v4 = vpop.f32.mrb[9].mxu1 }
 0xab7   : > { %v1357_v5 = vpop.f32.mrb[10].mxu1 }
 0xab8   : > { %v1358_v6 = vadd.f32 %v1357_v5, %v1284_v2  ;;  %v2801_v8 = vpop.f32.mrb[11].mxu1  ;;  %v2609_v5 = vld [vmem:[%s3936_s16] ss:$0 sm:$0xff] }
 0xaba   : > { %v1361_v10 = vadd.f32 %v1358_v6, %v3490_v57  ;;  %v1400_v57 = vld [vmem:[%s3933_s13 + $0x8] sm:$0xff] }
 0xabb   : > { %v2999_v19 = vpack.c.bf16 %v1400_v57, %v1399_v18  ;;  %v2614_v18 = vld [vmem:[%s3927_s7 + $0x20] sm:$0xff] }
 0xabc   : > { %v3583_v11 = vadd.f32 %v2603_v9, %v1361_v10 }
 0xabd   : > { %3000 = vmatpush3.bf16.msra.mxu1 %v2999_v19  ;;  %v2616_v19 = vld [vmem:[%s3927_s7 + $0x30] sm:$0xff] }
 0xabe   : > { %v1372_v12 = vsel %vm730_vm1, %v3583_v11, 0.0  ;;  %3001 = vmatprep.subr.bf16.mxu1 %v3223_v3  ;;  %v3032_v21 = vpack.c.bf16 %v2617_v20, %v2616_v19  ;;  %v2634_v20 = vld [vmem:[%s3930_s10 + $0x1] ss:$0 sm:$0xff] }
 0xabf   : > { %1373 = vadd.xlane.f32.xlu1 %v1372_v12 }
 0xac1   : > { %3003 = vmatpush3.bf16.msra.mxu1 %v3002_v22 }
 0xac2   : > { %3004 = vmatprep.subr.bf16.mxu1 %v3223_v3 }
 0xb4c   : > { %v1374_v13 = vpop.xlane.xlu1 %1373 }
 0xb4d   : > { %v1375_v14 = vmul.f32 0.03125, %v1374_v13 }
 0xb4f   : > { %v1376_v15 = vsub.f32 %v3583_v11, %v1375_v14 }
 0xb51   : > { %v1377_v16 = vmul.f32 %v1376_v15, %v1376_v15 }
 0xb53   : > { %v1378_v17 = vsel %vm730_vm1, %v1377_v16, 0.0 }
 0xb54   : > { %1379 = vadd.xlane.f32.xlu1 %v1378_v17 }
 0xbe1   : > { %v1380_v23 = vpop.xlane.xlu1 %1379 }
 0xbe2   : > { %v1381_v24 = vmul.f32 0.03125, %v1380_v23 }
 0xbe4   : > { %v1382_v26 = vadd.f32 1e-05, %v1381_v24 }
 0xbe6   : > { %3135 = vrsqrt.f32 %v1382_v26 }
 0xbf0   : > { %v3136_v27 = vpop.eup %3135 }
 0xbf1   : > { %v1384_v29 = vmul.f32 %v3136_v27, %v1376_v15  ;;  %v2612_v27 = vld [vmem:[%s3925_s5 + $0x1] ss:$0 sm:$0xff] }
 0xbf3   : > { %v1391_v31 = vmul.f32 %v2604_v28, %v1384_v29  ;;  %v2613_v29 = vld [vmem:[%s3926_s6 + $0x1] ss:$0 sm:$0xff] }
 0xbf5   : > { %v1398_v32 = vadd.f32 %v2605_v30, %v1391_v31 }
 0xbf7   : > { %2811 = vmatmul.mubr.msk.f32.vlgmr.msra.gmra.mrb[12].mxu1 %vm730_vm1, %v1398_v32  ;;  %v2619_v32 = vld [vmem:[%s3928_s8 + $0x1] ss:$0 sm:$0xff] }
 0xbf8   : > { %2845 = vmatprep.mubr.msk.f32.mxu1 %vm3224_vm2, %v3225_v7  ;;  %3006 = vmatpush3.bf16.msra.mxu1 %v3005_v35 }
 0xbf9   : > { %3007 = vmatprep.subr.bf16.mxu1 %v3223_v3 }
 0xbfc   : > { %3009 = vmatpush3.bf16.msra.mxu1 %v3008_v38 }
 0xbfd   : > { %3010 = vmatprep.subr.bf16.mxu1 %v3223_v3 }
 0xc00   : > { %3012 = vmatpush3.bf16.msra.mxu1 %v3011_v41 }
 0xc01   : > { %3013 = vmatprep.subr.bf16.mxu1 %v3223_v3 }
 0xc04   : > { %3015 = vmatpush3.bf16.msra.mxu1 %v3014_v44 }
 0xc05   : > { %3016 = vmatprep.subr.bf16.mxu1 %v3223_v3 }
 0xc08   : > { %3018 = vmatpush3.bf16.msra.mxu1 %v3017_v47 }
 0xc09   : > { %3019 = vmatprep.subr.bf16.mxu1 %v3223_v3 }
 0xc0c   : > { %3021 = vmatpush3.bf16.msra.mxu1 %v3020_v50  ;;  %v3038_v50 = vpack.c.bf16 %v2622_v49, %v2621_v48  ;;  %v2651_v49 = vld [vmem:[%s3935_s15 + $0xa0] sm:$0xff] }
 0xc0d   : > { %3022 = vmatprep.subr.bf16.mxu1 %v3223_v3 }
 0xc10   : > { %3024 = vmatpush3.bf16.msra.mxu1 %v3023_v53 }
 0xc11   : > { %3025 = vmatprep.subr.bf16.mxu1 %v3223_v3 }
 0xc14   : > { %3027 = vmatpush3.bf16.msra.mxu1 %v3026_v56 }
 0xc15   : > { %3037 = vmatprep.subr.bf16.mxu1 %v3223_v3 }
 0xcca   : > { %v1479_v59 = vpop.f32.mrb[12].mxu1 }
 0xccb   : > { %v1480_v60 = vadd.f32 %v2606_v58, %v1479_v59  ;;  %v2812_v61 = vpop.f32.mrb[13].mxu1 }
 0xccd   : > { %v2608_v62 = vmul.f32 -1.702, %v1480_v60 }
 0xccf   : > { %v1485_v63 = vmul.f32 1.442695, %v2608_v62 }
 0xcd1   : > { %3137 = vpow2.f32 %v1485_v63 }
 0xcdb   : > { %v3138_v0 = vpop.eup %3137 }
 0xcdc   : > { %v1487_v1 = vadd.f32 1.0, %v3138_v0 }
 0xcde   : > { %3139 = vrcp.f32 %v1487_v1 }
 0xce8   : > { %v3140_v2 = vpop.eup %3139 }
 0xce9   : > { %v1490_v4 = vmul.f32 %v3140_v2, %v1480_v60 }
 0xceb   : > { %2846 = vmatmul.mubr.f32.vlgmr.msra.gmra.mrb[14].mxu1 %v1490_v4 }
 0xcec   : > { %2890 = vmatprep.mubr.msk.f32.mxu1 %vm3224_vm2, %v3225_v7  ;;  %3039 = vmatpush3.bf16.msra.mxu1 %v3038_v50  ;;  %v2652_v50 = vld [vmem:[%s3935_s15 + $0xa8] sm:$0xff] }
 0xced   : > { %3046 = vmatprep.subr.bf16.mxu1 %v3223_v3 }
 0xdbe   : > { %v1580_v6 = vpop.f32.mrb[14].mxu1 }
 0xdbf   : > { %v1581_v8 = vadd.f32 %v2609_v5, %v1580_v6  ;;  %v2847_v9 = vpop.f32.mrb[15].mxu1 }
 0xdc1   : > { %v3677_v10 = vadd.f32 %v1581_v8, %v3583_v11  ;;  %v2615_v11 = vld [vmem:[%s3927_s7 + $0x28] sm:$0xff] }
 0xdc2   : > { %v3029_v57 = vpack.c.bf16 %v2615_v11, %v2614_v18 }
 0xdc3   : > { %v1589_v12 = vsel %vm730_vm1, %v3677_v10, 0.0 }
 0xdc4   : > { %1590 = vadd.xlane.f32.xlu1 %v1589_v12  ;;  %3030 = vmatpush3.bf16.msra.mxu0 %v3029_v57 }
 0xdc5   : > { %3031 = vmatprep.subr.bf16.mxu0 %v3223_v3 }
 0xdc8   : > { %3033 = vmatpush3.bf16.msra.mxu0 %v3032_v21 }
 0xdc9   : > { %2859 = vmatprep.subr.mxu0 %v3225_v7 }
 0xe51   : > { %v1591_v13 = vpop.xlane.xlu1 %1590 }
 0xe52   : > { %v1592_v14 = vmul.f32 0.03125, %v1591_v13  ;;  %v2624_v13 = vld [vmem:[%s3929_s9 + $0x38] sm:$0xff] }
 0xe54   : > { %v1593_v15 = vsub.f32 %v3677_v10, %v1592_v14 }
 0xe56   : > { %v1594_v16 = vmul.f32 %v1593_v15, %v1593_v15 }
 0xe58   : > { %v1595_v17 = vsel %vm730_vm1, %v1594_v16, 0.0 }
 0xe59   : > { %1596 = vadd.xlane.f32.xlu1 %v1595_v17 }
 0xee6   : > { %v1597_v22 = vpop.xlane.xlu1 %1596 }
 0xee7   : > { %v1598_v23 = vmul.f32 0.03125, %v1597_v22 }
 0xee9   : > { %v1599_v24 = vadd.f32 1e-05, %v1598_v23 }
 0xeeb   : > { %3141 = vrsqrt.f32 %v1599_v24 }
 0xef5   : > { %v3142_v26 = vpop.eup %3141 }
 0xef6   : > { %v1601_v28 = vmul.f32 %v3142_v26, %v1593_v15 }
 0xef8   : > { %v1608_v30 = vmul.f32 %v2612_v27, %v1601_v28 }
 0xefa   : > { %v1615_v31 = vadd.f32 %v2613_v29, %v1608_v30  ;;  %v2639_v30 = vld [vmem:[%s3933_s13 + $0x20] sm:$0xff] }
 0xefc   : > { %2857 = vmatmul.mubr.msk.f32.vlgmr.msra.gmra.mrb[4].mxu0 %vm730_vm1, %v1615_v31 }
 0xefd   : > { %2861 = vmatprep.mubr.msk.f32.mxu0 %vm3224_vm2, %v3225_v7 }
 0xfcf   : > { %v1698_v33 = vpop.f32.mrb[4].mxu0 }
 0xfd0   : > { %v1699_v34 = vadd.f32 %v2619_v32, %v1698_v33  ;;  %v2858_v35 = vpop.f32.mrb[5].mxu0  ;;  %v2641_v32 = vld [vmem:[%s3933_s13 + $0x30] sm:$0xff]  ;;  %v2642_v33 = vld [vmem:[%s3933_s13 + $0x38] sm:$0xff] }
 0xfd2   : > { %1708 = vrot.lane.b32.xlu0 %v1699_v34, %s3226_s0  ;;  %s2666_s0 = sshll.u32 %s3358_s2, 4  ;;  %s3231_s2 = smov [#allocation2]  }
 0xfd3   : > { %s3878_s26 = scalar_lea.hbm %s3970_s28, %s2666_s0  ;;  %s3163_s3 = sshll.u32 %s3231_s2, 4  ;;  %s3164_s3 = int_to_ptr.vmem [resolvable:$false] %s3163_s3 }
 0xfd4   : > { %s3165_s20 = scalar_lea.vmem %s3164_s3, 32 }
0x1044   : > { %v1709_v36 = vpop.permute.xlu0 %1708 }
0x1045   : > { %2860 = vmatpush3.xpose.msk.msra.mxu0 %vm883_vm3, %v1709_v36 }
0x1046   : > { %2864 = vmatprep.subr.mxu0 %v3225_v7 }
0x1048   : > { %2862 = vmatmul.mubr.msk.f32.vlgmr.msra.gmra.mrb[6].mxu0 %vm883_vm3, %v1699_v34 }
0x1049   : > { %2866 = vmatprep.mubr.msk.f32.mxu0 %vm3224_vm2, %v3225_v7 }
0x111b   : > { %v1780_v37 = vpop.f32.mrb[6].mxu0 }
0x111c   : > { %v1784_v38 = vmul.f32 0.25, %v1780_v37  ;;  %v2863_v39 = vpop.f32.mrb[7].mxu0 }
0x111d   : > { %v2637_v39 = vld [vmem:[%s3931_s11 + $0x1] ss:$0 sm:$0xff] }
0x111e   : > { %v1785_v40 = vadd.f32 %v1784_v38, %v3535_v25 }
0x1120   : > { %v1786_v41 = vsel %vm960_vm5, %v1785_v40, -inf }
0x1121   : > { %1787 = vmax.xlane.f32.xlu1 %v1786_v41  ;;  %v2638_v41 = vld [vmem:[%s3932_s12 + $0x1] ss:$0 sm:$0xff] }
0x1132   : > { %1797 = vrot.lane.b32.xlu1 %v1699_v34, %s3228_s1  ;;  %s2527_s1 = sshll.u32 %s621_s30, 4  ;;  %s3880_s1 = int_to_ptr.vmem [resolvable:$true] %s2527_s1 }
0x1133   : > { %s3159_s23 = scalar_lea.vmem %s3880_s1, 16  ;;  %p3166_p0 = scmp.lt.s32.totalorder %s3880_s1, %s3164_s3 }
0x1134   : > { %p3160_p11 = scmp.ne.s32.totalorder %s3880_s1, %s3159_s23  ;;  %p3167_p1 = scmp.lt.s32.totalorder %s3165_s20, %s3159_s23 }
0x1136   : > { %1875 = vrot.lane.b32.xlu1 %v1699_v34, %s3227_s25  ;;  %p3161_p12 = pnand %p3160_p11, %p3375_p5  ;;  %p3168_p2 = por %p3167_p1, %p3166_p0 }
0x1138   : > { %p3162_p13 = pneg %p3161_p12 }
0x113a   : > { %1873 = vrot.lane.b32.xlu1 %v1699_v34, %s3229_s24  ;;  %s3969_s24 = smov 48   ;;  %p3169_p3 = pnand %p3168_p2, %p3162_p13 }
0x11ae   : > { %v1788_v42 = vpop.xlane.xlu1 %1787 }
0x11af   : > { %v1789_v43 = vsub.f32 %v1785_v40, %v1788_v42 }
0x11b1   : > { %v1790_v44 = vmul.f32 1.442695, %v1789_v43 }
0x11b2   : > { %v1798_v45 = vpop.permute.xlu1 %1797 }
0x11b3   : > { %3143 = vpow2.f32 %v1790_v44  ;;  %2865 = vmatpush3.msra.mxu0 %v1798_v45  ;;  %v2647_v44 = vld [vmem:[%s3935_s15 + $0x80] sm:$0xff]  ;;  %v2648_v45 = vld [vmem:[%s3935_s15 + $0x88] sm:$0xff] }
0x11b4   : > { %2869 = vmatprep.subr.mxu0 %v3225_v7 }
0x11b6   : > { %v1876_v53 = vpop.permute.xlu1 %1875 }
0x11ba   : > { %v1874_v55 = vpop.permute.xlu1 %1873 }
0x11bd   : > { %v3144_v46 = vpop.eup %3143 }
0x11be   : > { %v1792_v47 = vsel %vm960_vm5, %v3144_v46, 0.0 }
0x11bf   : > { %1793 = vadd.xlane.f32.xlu0 %v1792_v47  ;;  %v2649_v47 = vld [vmem:[%s3935_s15 + $0x90] sm:$0xff] }
0x124c   : > { %v1794_v51 = vpop.xlane.xlu0 %1793 }
0x124d   : > { %3145 = vrcp.f32 %v1794_v51  ;;  %v3053_v51 = vpack.c.bf16 %v2652_v50, %v2651_v49 }
0x1257   : > { %v3146_v52 = vpop.eup %3145 }
0x1258   : > { %v1796_v54 = vmul.f32 %v3146_v52, %v3144_v46  ;;  %v3047_v46 = vpack.c.bf16 %v2648_v45, %v2647_v44  ;;  %v2653_v52 = vld [vmem:[%s3935_s15 + $0xb0] sm:$0xff] }
0x125a   : > { %2867 = vmatmul.mubr.msk.f32.vlgmr.msra.gmra.mrb[8].mxu0 %vm960_vm5, %v1796_v54 }
0x125b   : > { %2870 = vmatpush3.xpose.msk.msra.mxu0 %vm883_vm3, %v1876_v53  ;;  %2871 = vmatprep.mubr.msk.f32.mxu0 %vm3224_vm2, %v3225_v7  ;;  %v2654_v53 = vld [vmem:[%s3935_s15 + $0xb8] sm:$0xff] }
0x125c   : > { %2874 = vmatprep.subr.mxu0 %v3225_v7  ;;  %v3056_v54 = vpack.c.bf16 %v2654_v53, %v2653_v52 }
0x125e   : > { %2872 = vmatmul.mubr.msk.f32.vlgmr.msra.gmra.mrb[10].mxu0 %vm883_vm3, %v1874_v55  ;;  %v2655_v55 = vld [vmem:[%s3935_s15 + $0xc0] sm:$0xff] }
0x125f   : > { %2876 = vmatprep.mubr.msk.f32.mxu0 %vm3224_vm2, %v3225_v7 }
0x132d   : > { %v1869_v56 = vpop.f32.mrb[8].mxu0 }
0x132e   : > { %v2868_v58 = vpop.f32.mrb[9].mxu0  ;;  %2891 = vmatmul.mubr.msk.f32.vlgmr.msra.gmra.mrb[16].mxu1 %vm883_vm3, %v1869_v56  ;;  %v2656_v56 = vld [vmem:[%s3935_s15 + $0xc8] sm:$0xff] }
0x132f   : > { %2936 = vmatprep.mubr.msk.f32.mxu1 %vm3224_vm2, %v3225_v7  ;;  %3048 = vmatpush3.bf16.msra.mxu1 %v3047_v46  ;;  %v3059_v58 = vpack.c.bf16 %v2656_v56, %v2655_v55 }
0x1330   : > { %3049 = vmatprep.subr.bf16.mxu1 %v3223_v3 }
0x1331   : > { %v1947_v59 = vpop.f32.mrb[10].mxu0 }
0x1332   : > { %v1951_v60 = vmul.f32 0.25, %v1947_v59  ;;  %v2873_v61 = vpop.f32.mrb[11].mxu0  ;;  %v2657_v59 = vld [vmem:[%s3935_s15 + $0xd0] sm:$0xff] }
0x1334   : > { %v1952_v62 = vadd.f32 %v1951_v60, %v3535_v25  ;;  %v2623_v25 = vld [vmem:[%s3929_s9 + $0x30] sm:$0xff]  ;;  %v2658_v60 = vld [vmem:[%s3935_s15 + $0xd8] sm:$0xff] }
0x1335   : > { %v3035_v15 = vpack.c.bf16 %v2624_v13, %v2623_v25  ;;  %v3062_v61 = vpack.c.bf16 %v2658_v60, %v2657_v59 }
0x1336   : > { %v1953_v63 = vsel %vm960_vm5, %v1952_v62, -inf }
0x1337   : > { %1954 = vmax.xlane.f32.xlu1 %v1953_v63  ;;  %v2660_v63 = vld [vmem:[%s3935_s15 + $0xe8] sm:$0xff] }
0x13c4   : > { %v1955_v0 = vpop.xlane.xlu1 %1954 }
0x13c5   : > { %v1956_v1 = vsub.f32 %v1952_v62, %v1955_v0  ;;  %v2659_v62 = vld [vmem:[%s3935_s15 + $0xe0] sm:$0xff] }
0x13c6   : > { %v3065_v0 = vpack.c.bf16 %v2660_v63, %v2659_v62 }
0x13c7   : > { %v1957_v2 = vmul.f32 1.442695, %v1956_v1  ;;  %v2661_v1 = vld [vmem:[%s3935_s15 + $0xf0] sm:$0xff] }
0x13c9   : > { %3147 = vpow2.f32 %v1957_v2  ;;  %v2662_v2 = vld [vmem:[%s3935_s15 + $0xf8] sm:$0xff] }
0x13d3   : > { %v3148_v4 = vpop.eup %3147 }
0x13d4   : > { %v1959_v5 = vsel %vm960_vm5, %v3148_v4, 0.0 }
0x13d5   : > { %1960 = vadd.xlane.f32.xlu0 %v1959_v5  ;;  %v2644_v5 = vld [vmem:[%s3934_s14 + $0x1] ss:$0 sm:$0xff] }
0x13eb   : > { %1964 = vrot.lane.b32.xlu0 %v1699_v34, %s3969_s24  ;;  %v3044_v34 = vpack.c.bf16 %v2642_v33, %v2641_v32 }
0x1401   : > { %v2182_v6 = vpop.f32.mrb[16].mxu1 }
0x1402   : > { %v2892_v8 = vpop.f32.mrb[17].mxu1 }
0x1462   : > { %v1961_v9 = vpop.xlane.xlu0 %1960 }
0x1463   : > { %3149 = vrcp.f32 %v1961_v9 }
0x1466   : > { %v1965_v12 = vpop.permute.xlu0 %1964 }
0x1467   : > { %2875 = vmatpush3.msra.mxu0 %v1965_v12 }
0x1468   : > { %3034 = vmatprep.subr.bf16.mxu0 %v3223_v3 }
0x146d   : > { %v3150_v14 = vpop.eup %3149 }
0x146e   : > { %v1963_v16 = vmul.f32 %v3150_v14, %v3148_v4  ;;  %v3068_v4 = vpack.c.bf16 %v2662_v2, %v2661_v1 }
0x1470   : > { %2877 = vmatmul.mubr.msk.f32.vlgmr.msra.gmra.mrb[12].mxu0 %vm960_vm5, %v1963_v16 }
0x1471   : > { %3036 = vmatpush3.bf16.msra.mxu0 %v3035_v15  ;;  %2883 = vmatprep.mubr.msk.f32.mxu0 %vm3224_vm2, %v3225_v7 }
0x1472   : > { %3040 = vmatprep.subr.bf16.mxu0 %v3223_v3 }
0x1543   : > { %v2036_v17 = vpop.f32.mrb[12].mxu0 }
0x1544   : > { %v2878_v18 = vpop.f32.mrb[13].mxu0  ;;  %2884 = vmatmul.mubr.msk.f32.vlgmr.msra.gmra.mrb[14].mxu0 %vm883_vm3, %v2036_v17  ;;  %v2664_v17 = vld [vmem:[%s3936_s16 + $0x1] ss:$0 sm:$0xff] }
0x1545   : > { %2901 = vmatprep.mubr.msk.f32.mxu0 %vm3224_vm2, %v3225_v7 }
0x1617   : > { %v2109_v11 = vpop.f32.mrb[14].mxu0 }
0x1618   : > { %v2183_v57 = vadd.f32 %v2182_v6, %v2109_v11  ;;  %v2885_v19 = vpop.f32.mrb[15].mxu0 }
0x161a   : > { %v2186_v21 = vadd.f32 %v2183_v57, %v3677_v10  ;;  %v2640_v10 = vld [vmem:[%s3933_s13 + $0x28] sm:$0xff] }
0x161b   : > { %v3041_v31 = vpack.c.bf16 %v2640_v10, %v2639_v30  ;;  %v2438_v10 = vld [vmem:[%s3939_s19 + $0x18] sm:$0xff] }
0x161c   : > { %v3762_v22 = vadd.f32 %v2634_v20, %v2186_v21 }
0x161d   : > { %3042 = vmatpush3.bf16.msra.mxu0 %v3041_v31 }
0x161e   : > { %v2200_v23 = vsel %vm730_vm1, %v3762_v22, 0.0  ;;  %3043 = vmatprep.subr.bf16.mxu0 %v3223_v3 }
0x161f   : > { %2201 = vadd.xlane.f32.xlu0 %v2200_v23 }
0x1621   : > { %3045 = vmatpush3.bf16.msra.mxu0 %v3044_v34 }
0x1622   : > { %3070 = vmatprep.subr.bf16.mxu0 %v3223_v3 }
0x16ac   : > { %v2202_v24 = vpop.xlane.xlu0 %2201 }
0x16ad   : > { %v2203_v26 = vmul.f32 0.03125, %v2202_v24 }
0x16af   : > { %v2204_v27 = vsub.f32 %v3762_v22, %v2203_v26 }
0x16b1   : > { %v2205_v28 = vmul.f32 %v2204_v27, %v2204_v27 }
0x16b3   : > { %v2206_v29 = vsel %vm730_vm1, %v2205_v28, 0.0  ;;  %v2435_v28 = vld [vmem:[%s3939_s19] sm:$0xff] }
0x16b4   : > { %2207 = vadd.xlane.f32.xlu1 %v2206_v29  ;;  %v2436_v29 = vld [vmem:[%s3939_s19 + $0x8] sm:$0xff] }
0x16b5   : > { %v3071_v30 = vpack.c.bf16 %v2436_v29, %v2435_v28 }
0x1741   : > { %v2208_v35 = vpop.xlane.xlu1 %2207 }
0x1742   : > { %v2209_v36 = vmul.f32 0.03125, %v2208_v35 }
0x1744   : > { %v2210_v37 = vadd.f32 1e-05, %v2209_v36 }
0x1746   : > { %3151 = vrsqrt.f32 %v2210_v37  ;;  %v2418_v37 = vld [vmem:[%s3938_s18] sm:$0x1] }
0x1750   : > { %v3152_v38 = vpop.eup %3151 }
0x1751   : > { %v2212_v40 = vmul.f32 %v3152_v38, %v2204_v27 }
0x1753   : > { %v2219_v42 = vmul.f32 %v2637_v39, %v2212_v40 }
0x1755   : > { %v2226_v43 = vadd.f32 %v2638_v41, %v2219_v42 }
0x1757   : > { %2902 = vmatmul.mubr.msk.f32.vlgmr.msra.gmra.mrb[16].mxu0 %vm730_vm1, %v2226_v43 }
0x1758   : > { %2947 = vmatprep.mubr.msk.f32.mxu0 %vm3224_vm2, %v3225_v7  ;;  %v2650_v7 = vld [vmem:[%s3935_s15 + $0x98] sm:$0xff]  ;;  %3072 = vmatpush3.bf16.msra.mxu0 %v3071_v30 }
0x1759   : > { %v3050_v48 = vpack.c.bf16 %v2650_v7, %v2649_v47  ;;  %3073 = vmatprep.subr.bf16.mxu0 %v3223_v3 }
0x175b   : > { %3051 = vmatpush3.bf16.msra.mxu1 %v3050_v48 }
0x175c   : > { %3052 = vmatprep.subr.bf16.mxu1 %v3223_v3 }
0x175f   : > { %3054 = vmatpush3.bf16.msra.mxu1 %v3053_v51 }
0x1760   : > { %3055 = vmatprep.subr.bf16.mxu1 %v3223_v3 }
0x1763   : > { %3057 = vmatpush3.bf16.msra.mxu1 %v3056_v54 }
0x1764   : > { %3058 = vmatprep.subr.bf16.mxu1 %v3223_v3 }
0x1767   : > { %3060 = vmatpush3.bf16.msra.mxu1 %v3059_v58 }
0x1768   : > { %3061 = vmatprep.subr.bf16.mxu1 %v3223_v3 }
0x176b   : > { %3063 = vmatpush3.bf16.msra.mxu1 %v3062_v61 }
0x176c   : > { %3064 = vmatprep.subr.bf16.mxu1 %v3223_v3 }
0x176f   : > { %3066 = vmatpush3.bf16.msra.mxu1 %v3065_v0 }
0x1770   : > { %3067 = vmatprep.subr.bf16.mxu1 %v3223_v3  ;;  %v2417_v3 = vld [vmem:[%s3937_s17] sm:$0x1] }
0x1773   : > { %3069 = vmatpush3.bf16.msra.mxu1 %v3068_v4 }
0x182a   : > { %v2309_v6 = vpop.f32.mrb[16].mxu0 }
0x182b   : > { %v2310_v8 = vadd.f32 %v2644_v5, %v2309_v6  ;;  %v2903_v9 = vpop.f32.mrb[17].mxu0 }
0x182d   : > { %v2646_v12 = vmul.f32 -1.702, %v2310_v8 }
0x182f   : > { %v2315_v25 = vmul.f32 1.442695, %v2646_v12 }
0x1831   : > { %3153 = vpow2.f32 %v2315_v25 }
0x183b   : > { %v3154_v13 = vpop.eup %3153 }
0x183c   : > { %v2317_v14 = vadd.f32 1.0, %v3154_v13 }
0x183e   : > { %3155 = vrcp.f32 %v2317_v14 }
0x1848   : > { %v3156_v15 = vpop.eup %3155 }
0x1849   : > { %v2320_v16 = vmul.f32 %v3156_v15, %v2310_v8 }
0x184b   : > { %2937 = vmatmul.mubr.f32.vlgmr.msra.gmra.mrb[18].mxu1 %v2320_v16 }
0x191e   : > { %v2412_v18 = vpop.f32.mrb[18].mxu1 }
0x191f   : > { %v2413_v11 = vadd.f32 %v2664_v17, %v2412_v18  ;;  %v2938_v57 = vpop.f32.mrb[19].mxu1 }
0x1921   : > { %v2416_v19 = vadd.f32 %v2413_v11, %v3762_v22  ;;  %v2437_v22 = vld [vmem:[%s3939_s19 + $0x10] sm:$0xff] }
0x1922   : > { %v3074_v31 = vpack.c.bf16 %v2438_v10, %v2437_v22 }
0x1923   : > { %v2420_v20 = vsel %vm2419_vm6, %v2416_v19, 0.0 }
0x1924   : > { %2421 = vadd.xlane.f32.xlu1 %v2420_v20  ;;  %3075 = vmatpush3.bf16.msra.mxu0 %v3074_v31 }
0x19b1   : > { %v2422_v21 = vpop.xlane.xlu1 %2421 }
0x19b2   : > { %v2423_v23 = vmul.f32 0.03125, %v2422_v21 }
0x19b4   : > { %v2424_v24 = vsub.f32 %v2416_v19, %v2423_v23 }
0x19b6   : > { %v2425_v26 = vmul.f32 %v2424_v24, %v2424_v24 }
0x19b8   : > { %v2426_v27 = vsel %vm2419_vm6, %v2425_v26, 0.0 }
0x19b9   : > { %2427 = vadd.xlane.f32.xlu1 %v2426_v27 }
0x1a46   : > { %v2428_v32 = vpop.xlane.xlu1 %2427 }
0x1a47   : > { %v2429_v33 = vmul.f32 0.03125, %v2428_v32 }
0x1a49   : > { %v2430_v34 = vadd.f32 1e-05, %v2429_v33 }
0x1a4b   : > { %3157 = vrsqrt.f32 %v2430_v34 }
0x1a55   : > { %v3158_v35 = vpop.eup %3157 }
0x1a56   : > { %v2432_v36 = vmul.f32 %v3158_v35, %v2424_v24 }
0x1a58   : > { %v2433_v38 = vmul.f32 %v2432_v36, %v2417_v3 }
0x1a5a   : > { %v2434_v39 = vadd.f32 %v2433_v38, %v2418_v37 }
0x1a5c   : > { %2948 = vmatmul.mubr.msk.f32.vlgmr.msra.gmra.mrb[18].mxu0 %vm730_vm1, %v2434_v39 }
0x1b2f   : > { %v2508_v40 = vpop.f32.mrb[18].mxu0 }
0x1b30   : > { %2513 = vst.msk [vmem:[%s621_s30] sm:$0x1] %vm2512_vm7, %v2508_v40  ;;  %v2949_v41 = vpop.f32.mrb[19].mxu0 }
0x1b31   : > { %3172 = shalt.err (!%p3169_p3)
}
0x1b32   : > { %s3173_s29 = scalar_lea.hbm %s3878_s26, 16  ;;  %s3177_s25 = scalar_lea.hbm %s3970_s28, 32 }
0x1b33   : > { %p3174_p4 = scmp.ne.s32.totalorder %s3878_s26, %s3173_s29  ;;  %p3178_p9 = scmp.lt.u32.totalorder %s3878_s26, %s3970_s28 }
0x1b34   : > { %p3179_p10 = scmp.lt.u32.totalorder %s3177_s25, %s3173_s29  ;;  %p3181_p12 = scmp.lt.u32.totalorder %s3173_s29, %s3878_s26 }
0x1b35   : > { %p3175_p7 = pnand %p3174_p4, %p3375_p5 }
0x1b36   : > { %p3180_p11 = por %p3179_p10, %p3178_p9 }
0x1b37   : > { %p3176_p8 = pneg %p3175_p7 }
0x1b38   : > { %p3182_p13 = por %p3181_p12, %p3180_p11 }
0x1b3a   : > { %p3183_p0 = pnand %p3182_p13, %p3176_p8 }
0x1b3c   : > { %3186 = shalt.err (!%p3183_p0)
}
0x1b3d   : > { %3076 = dma.vmem_to_hbm [thread:$0]  (%p3375_p5), %s3880_s1, 16, %s3878_s26, %s2515_s27  }
0x1b3e PF: > { %s3971_s23 = sld [smem:[#allocation7_spill]]  ;;  %s3972_s3 = sld [smem:[#allocation5_spill]] }
0x1b44   : > { %p3082_p1 = scmp.ge.s32.totalorder %s3971_s23, 2  ;;  %s2539_s0 = sand.u32 1, %s3972_s3  }
0x1b45   : > { %s2540_s30 = scalar_lea.sflag [#allocation3], %s2539_s0 }
0x1b46   : > { %p3079_p2 = pnand %p3082_p1, %p3379_p6 }
0x1b48   : > { %3204 = dma.done.wait (!%p3079_p2), %s2540_s30, 16  }
0x1b49   : > { %3206 = vsyncadd (!%p3079_p2), %s2540_s30, 4294967280  ;;  %s3974_s24 = sld [smem:[#allocation8_spill]]  ;;  %s3975_s29 = sld [smem:[#allocation6_spill]] }
0x1b4a   : > { %s3976_s23 = sld [smem:[#allocation9_spill]]  ;;  %s3977_s1 = smov %s3213_s22 }
0x1b4f   : > { %p30_p3 = scmp.ge.s32.totalorder %s3974_s24, 4   ;;  %s3978_s22 = smov %s3975_s29 }
0x1b51   :  { %32 = sbr.rel (!%p30_p3) target bundleno = 10 (0xa), region = 147 }
0x1b58   :  { %2544 = vsyncpa [#allocation3], 1 }
0x1b59   :  { %2546 = vsyncpa [#allocation3 + $0x1], 1 }

// kernel: clip_forward.3
= control target key start
LH: loop header
LB: loop body
LE: loop exit
PB: predicated region body
PF: predicated region fallthrough
CT: control target
= control target key end

     0   :  { %s3883_s0 = inlined_call_operand.vmem [shape: s32[2], index: 0, kind: input, shape index: {}]   ;;  %s3884_s1 = inlined_call_operand.vmem [shape: s32[2,8,1], index: 1, kind: input, shape index: {}]   ;;  %s3885_s2 = inlined_call_operand.vmem [shape: f32[64,32], index: 2, kind: input, shape index: {}]   ;;  %s3886_s3 = inlined_call_operand.vmem [shape: f32[8,32], index: 3, kind: input, shape index: {}]   ;;  %s3887_s4 = inlined_call_operand.vmem [shape: f32[2,1,32], index: 4, kind: input, shape index: {}]   ;;  %s3888_s5 = inlined_call_operand.vmem [shape: f32[2,1,32], index: 5, kind: input, shape index: {}]   ;;  %s3889_s6 = inlined_call_operand.vmem [shape: f32[2,32,96], index: 6, kind: input, shape index: {}]   ;;  %s3890_s7 = inlined_call_operand.vmem [shape: f32[2,1,96], index: 7, kind: input, shape index: {}]   ;;  %s3891_s8 = inlined_call_operand.vmem [shape: f32[2,32,32], index: 8, kind: input, shape index: {}]   ;;  %s3892_s9 = inlined_call_operand.vmem [shape: f32[2,1,32], index: 9, kind: input, shape index: {}]   ;;  %s3893_s10 = inlined_call_operand.vmem [shape: f32[2,1,32], index: 10, kind: input, shape index: {}]   ;;  %s3894_s11 = inlined_call_operand.vmem [shape: f32[2,1,32], index: 11, kind: input, shape index: {}]   ;;  %s3895_s12 = inlined_call_operand.vmem [shape: f32[2,32,128], index: 12, kind: input, shape index: {}]   ;;  %s3896_s13 = inlined_call_operand.vmem [shape: f32[2,1,128], index: 13, kind: input, shape index: {}]   ;;  %s3897_s14 = inlined_call_operand.vmem [shape: f32[2,128,32], index: 14, kind: input, shape index: {}]   ;;  %s3898_s15 = inlined_call_operand.vmem [shape: f32[2,1,32], index: 15, kind: input, shape index: {}]   ;;  %s3899_s16 = inlined_call_operand.vmem [shape: f32[1,32], index: 16, kind: input, shape index: {}]   ;;  %s3900_s17 = inlined_call_operand.vmem [shape: f32[1,32], index: 17, kind: input, shape index: {}]   ;;  %s3901_s18 = inlined_call_operand.vmem [shape: f32[32,16], index: 18, kind: input, shape index: {}]   ;;  %s3902_s19 = inlined_call_operand.hbm [shape: f32[2,1,16], index: 19, kind: output, shape index: {}]  }
   0x1   :  { %3913 = sst [smem:[#allocation13_spill]] %s3883_s0 }
   0x2   :  { %3914 = sst [smem:[#allocation14_spill]] %s3884_s1  ;;  %s3918_s20 = sld [smem:[#allocation13_spill]] }
   0x3   :  { %3915 = sst [smem:[#allocation15_spill]] %s3885_s2 }
   0x4   :  { %3916 = sst [smem:[#allocation16_spill]] %s3886_s3 }
   0x5   :  { %3917 = sst [smem:[#allocation17_spill]] %s3896_s13 }
   0x8   :  { %s24_s13 = sshll.u32 %s3918_s20, 4  ;;  %s25_s13 = int_to_ptr.vmem [resolvable:$true] %s24_s13 }
   0x9   :  { %s3160_s21 = scalar_lea.vmem %s25_s13, 16  ;;  %p3165_p1 = scmp.lt.s32.totalorder %s25_s13, %s25_s13 }
   0xa   :  { %p3161_p0 = scmp.ne.s32.totalorder %s25_s13, %s3160_s21  ;;  %p3166_p2 = scmp.lt.s32.totalorder %s3160_s21, %s3160_s21 }
   0xc   :  { %p3167_p3 = por %p3166_p2, %p3165_p1 }
   0xe   :  { %p3168_p4 = pnand %p3167_p3, %p3161_p0 }
  0x10   :  { %3171 = shalt.err (!%p3168_p4)  }
  0x11   :  { %s3238_s1 = smov [#allocation3]  }
  0x12   :  { %27 = dma.vmem_to_smem %s25_s13, 16, %s3238_s1, [#allocation2] }
  0x13   :  { %3216 = dma.done.wait [#allocation2], 16 }
  0x14   :  { %3217 = vsyncadd [#allocation2], 4294967280 }
  0x15   :  { %29 = sfence }
  0x16   :  { %30 = vsyncpa [#allocation5], 0 }
  0x17   :  { %32 = vsyncpa [#allocation5 + $0x1], 0  ;;  %s3352_s22 = smov 0   ;;  %s3354_s2 = smov 0  }
  0x18   :  { %s3356_s23 = smov 0   ;;  %s3358_s24 = smov 0  }
  0x19 LB: > { %3919 = sst [smem:[#allocation8_spill]] %s3224_s22  ;;  %s3373_s13 = sadd.s32 4294967295, %s3236_s24   ;;  %s3236_s24 = sphi %s3358_s24, %s3935_s24   ;;  %s3232_s23 = sphi %s3356_s23, %s3937_s23   ;;  %s3228_s2 = sphi %s3354_s2, %s3939_s2   ;;  %s3224_s22 = sphi %s3352_s22, %s3938_s22  }
  0x1a   : > { %3920 = sst [smem:[#allocation9_spill]] %s3232_s23  ;;  %s2572_s25 = sadd.s32 4294967294, %s3236_s24  }
  0x1b   : > { %s3377_s3 = sadd.s32 1, %s3236_s24   ;;  %s428_s26 = sadd.s32 1, %s3232_s23 }
  0x1c   : > { %3921 = sst [smem:[#allocation10_spill]] %s3377_s3  ;;  %s425_s27 = ssub.s32 %s3236_s24, %s3377_s3 }
  0x1d   : > { %p438_p5 = scmp.ne.s32.totalorder %s3232_s23, %s3228_s2  ;;  %p426_p6 = scmp.eq.s32.totalorder %s425_s27, 0 }
  0x1e   : > { %p439_p7 = scmp.eq.s32.totalorder %s3373_s13, 1  ;;  %p444_p8 = scmp.ne.s32.totalorder %s3228_s2, %s3224_s22 }
  0x1f   : > { %p445_p9 = scmp.eq.s32.totalorder %s2572_s25, 1  ;;  %p2575_p12 = scmp.ge.s32.totalorder %s3236_s24, 1 }
  0x20   : > { %s3388_s28 = scalar_select %p426_p6, %s3232_s23, %s428_s26  }
  0x21   : > { %p3390_p10 = por %p439_p7, %p438_p5  ;;  %p3394_p11 = por %p445_p9, %p444_p8 }
  0x22   : > { %3922 = sst [smem:[#allocation11_spill]] %s3388_s28  ;;  %p521_p13 = scmp.lt.s32.totalorder %s3236_s24, 3 }
  0x23   : > { %s3924_s0 = scalar_select %p3394_p11, 1, 0 }
  0x24   : > { %p522_p0 = pnand %p2575_p12, %p521_p13 }
  0x25   : > { %3925 = sst [smem:[#allocation12_spill]] %s3924_s0  ;;  %p573_p1 = scmp.lt.s32.totalorder (!%p522_p0), %s3373_s13, 1  ;;  %v3239_v3 = vmov (!%p522_p0), 0   ;;  %v3240_v4 = vmov (!%p522_p0), 0.0|0.0   ;;  %v3241_v7 = vmov (!%p522_p0), 0.0   ;;  %vm3242_vm0 = vmmov (!%p522_p0), 0  }
  0x26   : > { %525 = sbr.rel (%p522_p0) target bundleno = 6441 (0x1929), region = 92  ;;  %s3926_s21 = sld [smem:[#allocation15_spill]] (!%p522_p0)  ;;  %3125 = vset.pattern.permute.xlu0 (!%p522_p0), %v3239_v3  ;;  %2974 = vmatprep.subr.bf16.mxu0 (!%p522_p0), %v3240_v4  ;;  %v578_v16 = vlaneseq (!%p522_p0)  ;;  %vm595_vm1 = vcmask (!%p522_p0), 523264   ;;  %vm675_vm3 = vcmask (!%p522_p0), 261120   ;;  %v704_v30 = vld [vmem:[%s3889_s6] sm:$0xff] (!%p522_p0)  ;;  %v705_v31 = vld [vmem:[%s3889_s6 + $0x8] sm:$0xff] (!%p522_p0) }
  0x27   : > { %2787 = vmatprep.subr.mxu1 (!%p522_p0), %v3241_v7  ;;  %s3927_s28 = sld [smem:[#allocation14_spill]] (!%p522_p0)  ;;  %2773 = vmatprep.mubr.msk.f32.mxu0 (!%p522_p0), %vm3242_vm0, %v3241_v7  ;;  %v2987_v32 = vpack.c.bf16 (!%p522_p0), %v705_v31, %v704_v30  ;;  %v706_v33 = vld [vmem:[%s3889_s6 + $0x10] sm:$0xff] (!%p522_p0)  ;;  %v707_v34 = vld [vmem:[%s3889_s6 + $0x18] sm:$0xff] (!%p522_p0)  ;;  %v2579_v40 = vld [vmem:[%s3887_s4] ss:$0 sm:$0xff] (!%p522_p0)  ;;  %s3243_s23 = smov (!%p522_p0), 96  }
  0x28   : > { %2789 = vmatprep.mubr.msk.f32.mxu1 (!%p522_p0), %vm3242_vm0, %v3241_v7  ;;  %v3440_v17 = vand.u32 (!%p522_p0), 127, %v578_v16  ;;  %v2990_v35 = vpack.c.bf16 (!%p522_p0), %v707_v34, %v706_v33  ;;  %v2580_v42 = vld [vmem:[%s3888_s5] ss:$0 sm:$0xff] (!%p522_p0)  ;;  %vm795_vm4 = vcmask (!%p522_p0), 130048   ;;  %v670_v52 = vshrl.u32 (!%p522_p0), %v578_v16, 7  ;;  %s3910_s1 = smov (!%p522_p0), 48  }
  0x29   : > { %v2581_v45 = vld [vmem:[%s3890_s7] ss:$0 sm:$0xff] (!%p522_p0)  ;;  %vm872_vm6 = vcmask (!%p522_p0), 64512   ;;  %s3911_s25 = smov (!%p522_p0), 64   ;;  %s3932_s3 = smov (!%p522_p0), 48   ;;  %vm2409_vm8 = vcmask (!%p522_p0), 253952  }
  0x2a   : > { %vm671_vm5 = vcmp.gt.s32.totalorder (!%p522_p0), %v3440_v17, %v670_v52  ;;  %s571_s27 = sand.u32 (!%p522_p0), 1, %s3228_s2   ;;  %s2656_s22 = sshll.u32 (!%p522_p0), %s3373_s13, 4  ;;  %vm2502_vm9 = vcmask (!%p522_p0), 122880  }
  0x2b   : > { %v3497_v54 = vsel (!%p522_p0), %vm671_vm5, -1e+09, %v3241_v7 }
  0x2c   : > { %v586_v0 = vld [vmem:[%s3926_s21] sm:$0xff] (!%p522_p0)  ;;  %v587_v1 = vld [vmem:[%s3926_s21 + $0x8] sm:$0xff] (!%p522_p0)  ;;  %v588_v2 = vld [vmem:[%s3926_s21 + $0x10] sm:$0xff] (!%p522_p0) }
  0x2d   : > { %v2975_v5 = vpack.c.bf16 %v587_v1, %v586_v0  ;;  %v589_v6 = vld [vmem:[%s3926_s21 + $0x18] sm:$0xff]  ;;  %s574_s30 = scalar_select %p573_p1, %s3373_s13, 1  ;;  %v590_v9 = vld [vmem:[%s3926_s21 + $0x20] sm:$0xff]  ;;  %v591_v10 = vld [vmem:[%s3926_s21 + $0x28] sm:$0xff] }
  0x2e   : > { %v2978_v8 = vpack.c.bf16 %v589_v6, %v588_v2  ;;  %v2981_v12 = vpack.c.bf16 %v591_v10, %v590_v9  ;;  %v592_v13 = vld [vmem:[%s3926_s21 + $0x30] sm:$0xff]  ;;  %v593_v14 = vld [vmem:[%s3926_s21 + $0x38] sm:$0xff] }
  0x2f   : > { %2976 = vmatpush3.bf16.msra.mxu0 %v2975_v5  ;;  %s2576_s20 = sshll.u32 %s574_s30, 3  ;;  %v2984_v15 = vpack.c.bf16 %v593_v14, %v592_v13  ;;  %s3912_s30 = smov 112  }
  0x30   : > { %2977 = vmatprep.subr.bf16.mxu0 %v3240_v4  ;;  %s576_s0 = scalar_lea.vmem %s3927_s28, %s2576_s20  ;;  %s3244_s28 = smov 80  }
  0x31   : > { %v577_v11 = vld [vmem:[%s576_s0] sm:$0xff]  ;;  %s3928_s0 = sld [smem:[#allocation16_spill]]  ;;  %s3930_s20 = smov 112  }
  0x32   : > { %581 = vperm.xlu0 %3125, %v577_v11  }
  0x33   : > { %2979 = vmatpush3.bf16.msra.mxu0 %v2978_v8 }
  0x34   : > { %2980 = vmatprep.subr.bf16.mxu0 %v3240_v4 }
  0x37   : > { %2982 = vmatpush3.bf16.msra.mxu0 %v2981_v12  ;;  %v594_v20 = vld [vmem:[%s3928_s0] sm:$0xff]  ;;  %s3929_s0 = sld [smem:[#allocation17_spill]] }
  0x38   : > { %2983 = vmatprep.subr.bf16.mxu0 %v3240_v4 }
  0x3b   : > { %2985 = vmatpush3.bf16.msra.mxu0 %v2984_v15 }
  0x3c   : > { %2986 = vmatprep.subr.bf16.mxu0 %v3240_v4 }
  0xb1   : > { %v582_v18 = vpop.permute.xlu0 %581 }
  0xb2   : > { %vm583_vm2 = vcmp.eq.s32.totalorder %v3440_v17, %v582_v18  ;;  %v788_v18 = vld [vmem:[%s3891_s8] sm:$0xff] }
  0xb3   : > { %v2577_v19 = vsel %vm583_vm2, 1.0, %v3241_v7 }
  0xb4   : > { %2774 = vmatmul.mubr.msk.f32.vlgmr.msra.gmra.mrb[0].mxu0 %vm595_vm1, %v2577_v19  ;;  %v789_v19 = vld [vmem:[%s3891_s8 + $0x8] sm:$0xff] }
  0xb5   : > { %2784 = vmatprep.mubr.msk.f32.mxu0 %vm3242_vm0, %v3241_v7  ;;  %2988 = vmatpush3.bf16.msra.mxu0 %v2987_v32 }
  0xb6   : > { %2989 = vmatprep.subr.bf16.mxu0 %v3240_v4 }
  0xb9   : > { %2991 = vmatpush3.bf16.msra.mxu0 %v2990_v35 }
  0xba   : > { %2797 = vmatprep.subr.mxu0 %v3241_v7 }
 0x187   : > { %v665_v21 = vpop.f32.mrb[0].mxu0 }
 0x188   : > { %v3449_v22 = vadd.f32 %v665_v21, %v594_v20  ;;  %v2775_v23 = vpop.f32.mrb[1].mxu0 }
 0x189   : > { %v2996_v23 = vpack.c.bf16 %v789_v19, %v788_v18  ;;  %v1415_v18 = vld [vmem:[%s3897_s14 + $0x60] sm:$0xff]  ;;  %v1416_v19 = vld [vmem:[%s3897_s14 + $0x68] sm:$0xff] }
 0x18a   : > { %v676_v24 = vsel %vm675_vm3, %v3449_v22, 0.0 }
 0x18b   : > { %677 = vadd.xlane.f32.xlu0 %v676_v24 }
 0x218   : > { %v678_v25 = vpop.xlane.xlu0 %677 }
 0x219   : > { %v680_v26 = vmul.f32 0.03125, %v678_v25  ;;  %v790_v25 = vld [vmem:[%s3891_s8 + $0x10] sm:$0xff] }
 0x21b   : > { %v681_v27 = vsub.f32 %v3449_v22, %v680_v26  ;;  %v791_v26 = vld [vmem:[%s3891_s8 + $0x18] sm:$0xff] }
 0x21d   : > { %v682_v28 = vmul.f32 %v681_v27, %v681_v27 }
 0x21f   : > { %v683_v29 = vsel %vm675_vm3, %v682_v28, 0.0 }
 0x220   : > { %684 = vadd.xlane.f32.xlu1 %v683_v29 }
 0x2ad   : > { %v685_v36 = vpop.xlane.xlu1 %684 }
 0x2ae   : > { %v686_v37 = vmul.f32 0.03125, %v685_v36 }
 0x2b0   : > { %v687_v38 = vadd.f32 1e-05, %v686_v37  ;;  %v2591_v37 = vld [vmem:[%s3892_s9] ss:$0 sm:$0xff] }
 0x2b2   : > { %3126 = vrsqrt.f32 %v687_v38 }
 0x2bc   : > { %v3127_v39 = vpop.eup %3126 }
 0x2bd   : > { %v689_v41 = vmul.f32 %v3127_v39, %v681_v27  ;;  %v2993_v27 = vpack.c.bf16 %v791_v26, %v790_v25  ;;  %v2594_v25 = vld [vmem:[%s3929_s0] ss:$0 sm:$0xff] }
 0x2bf   : > { %v696_v43 = vmul.f32 %v2579_v40, %v689_v41 }
 0x2c1   : > { %v703_v44 = vadd.f32 %v2580_v42, %v696_v43 }
 0x2c3   : > { %2785 = vmatmul.mubr.msk.f32.vlgmr.msra.gmra.mrb[2].mxu0 %vm675_vm3, %v703_v44 }
 0x2c4   : > { %2799 = vmatprep.mubr.msk.f32.mxu0 %vm3242_vm0, %v3241_v7 }
 0x396   : > { %v784_v46 = vpop.f32.mrb[2].mxu0 }
 0x397   : > { %v785_v47 = vadd.f32 %v2581_v45, %v784_v46  ;;  %v2786_v48 = vpop.f32.mrb[3].mxu0  ;;  %v1311_v46 = vld [vmem:[%s3895_s12] sm:$0xff] }
 0x398   : > { %v1313_v48 = vld [vmem:[%s3895_s12 + $0x10] sm:$0xff] }
 0x399   : > { %793 = vrot.lane.b32.xlu1 %v785_v47, %s3243_s23 }
 0x39d   : > { %962 = vrot.lane.b32.xlu1 %v785_v47, %s3244_s28 }
 0x3a1   : > { %960 = vrot.lane.b32.xlu1 %v785_v47, %s3912_s30 }
 0x40b   : > { %v794_v49 = vpop.permute.xlu1 %793 }
 0x40c   : > { %2788 = vmatpush3.xpose.msk.msra.mxu1 %vm795_vm4, %v794_v49  ;;  %v1314_v49 = vld [vmem:[%s3895_s12 + $0x18] sm:$0xff] }
 0x40d   : > { %2792 = vmatprep.subr.mxu1 %v3241_v7 }
 0x40f   : > { %2790 = vmatmul.mubr.msk.f32.vlgmr.msra.gmra.mrb[0].mxu1 %vm795_vm4, %v785_v47  ;;  %v963_v50 = vpop.permute.xlu1 %962 }
 0x410   : > { %2798 = vmatpush3.xpose.msk.msra.mxu0 %vm795_vm4, %v963_v50  ;;  %2794 = vmatprep.mubr.msk.f32.mxu1 %vm3242_vm0, %v3241_v7  ;;  %v3002_v50 = vpack.c.bf16 %v1314_v49, %v1313_v48  ;;  %v2604_v48 = vld [vmem:[%s3889_s6 + $0x30] sm:$0xff]  ;;  %v2605_v49 = vld [vmem:[%s3889_s6 + $0x38] sm:$0xff] }
 0x411   : > { %2992 = vmatprep.subr.bf16.mxu0 %v3240_v4 }
 0x413   : > { %v961_v51 = vpop.permute.xlu1 %960 }
 0x414   : > { %2800 = vmatmul.mubr.msk.f32.vlgmr.msra.gmra.mrb[4].mxu0 %vm795_vm4, %v961_v51 }
 0x415   : > { %2811 = vmatprep.mubr.msk.f32.mxu0 %vm3242_vm0, %v3241_v7  ;;  %2994 = vmatpush3.bf16.msra.mxu0 %v2993_v27 }
 0x416   : > { %2998 = vmatprep.subr.bf16.mxu0 %v3240_v4 }
 0x4e2   : > { %v866_v53 = vpop.f32.mrb[0].mxu1 }
 0x4e3   : > { %v870_v55 = vmul.f32 0.25, %v866_v53  ;;  %v2791_v56 = vpop.f32.mrb[1].mxu1 }
 0x4e4   : > { %v2592_v56 = vld [vmem:[%s3893_s10] ss:$0 sm:$0xff] }
 0x4e5   : > { %v871_v57 = vadd.f32 %v870_v55, %v3497_v54 }
 0x4e7   : > { %v1034_v58 = vpop.f32.mrb[4].mxu0  ;;  %v873_v59 = vsel %vm872_vm6, %v871_v57, -inf }
 0x4e8   : > { %v1038_v60 = vmul.f32 0.25, %v1034_v58  ;;  %874 = vmax.xlane.f32.xlu1 %v873_v59  ;;  %v2801_v61 = vpop.f32.mrb[5].mxu0  ;;  %v2593_v58 = vld [vmem:[%s3894_s11] ss:$0 sm:$0xff] }
 0x4e9   : > { %v1403_v61 = vld [vmem:[%s3897_s14] sm:$0xff] }
 0x4ea   : > { %v1039_v62 = vadd.f32 %v1038_v60, %v3497_v54 }
 0x4ec   : > { %v1040_v63 = vsel %vm872_vm6, %v1039_v62, -inf }
 0x4ed   : > { %1041 = vmax.xlane.f32.xlu0 %v1040_v63 }
 0x4f9   : > { %1051 = vrot.lane.b32.xlu1 %v785_v47, %s3910_s1 }
 0x575   : > { %v875_v0 = vpop.xlane.xlu1 %874 }
 0x576   : > { %v876_v1 = vsub.f32 %v871_v57, %v875_v0  ;;  %v1405_v0 = vld [vmem:[%s3897_s14 + $0x10] sm:$0xff] }
 0x578   : > { %v877_v2 = vmul.f32 1.442695, %v876_v1  ;;  %v1406_v1 = vld [vmem:[%s3897_s14 + $0x18] sm:$0xff] }
 0x579   : > { %v1052_v20 = vpop.permute.xlu1 %1051 }
 0x57a   : > { %3128 = vpow2.f32 %v877_v2  ;;  %v1042_v3 = vpop.xlane.xlu0 %1041  ;;  %v3008_v2 = vpack.c.bf16 %v1406_v1, %v1405_v0 }
 0x57b   : > { %v1043_v5 = vsub.f32 %v1039_v62, %v1042_v3  ;;  %v1404_v62 = vld [vmem:[%s3897_s14 + $0x8] sm:$0xff]  ;;  %v1407_v3 = vld [vmem:[%s3897_s14 + $0x20] sm:$0xff] }
 0x57c   : > { %v3005_v63 = vpack.c.bf16 %v1404_v62, %v1403_v61  ;;  %v2607_v61 = vld [vmem:[%s3890_s7 + $0x1] ss:$0 sm:$0xff] }
 0x57d   : > { %v1044_v6 = vmul.f32 1.442695, %v1043_v5  ;;  %v1408_v5 = vld [vmem:[%s3897_s14 + $0x28] sm:$0xff] }
 0x57f   : > { %3130 = vpow2.f32 %v1044_v6  ;;  %v3011_v6 = vpack.c.bf16 %v1408_v5, %v1407_v3 }
 0x584   : > { %v3129_v8 = vpop.eup %3128 }
 0x585   : > { %v879_v9 = vsel %vm872_vm6, %v3129_v8, 0.0 }
 0x586   : > { %880 = vadd.xlane.f32.xlu0 %v879_v9  ;;  %v1410_v9 = vld [vmem:[%s3897_s14 + $0x38] sm:$0xff] }
 0x589   : > { %v3131_v10 = vpop.eup %3130 }
 0x58a   : > { %v1046_v11 = vsel %vm872_vm6, %v3131_v10, 0.0 }
 0x58b   : > { %1047 = vadd.xlane.f32.xlu0 %v1046_v11  ;;  %v1411_v11 = vld [vmem:[%s3897_s14 + $0x40] sm:$0xff] }
 0x5a1   : > { %884 = vrot.lane.b32.xlu0 %v785_v47, %s3911_s25  ;;  %s2329_s25 = sld [smem:[#allocation3 + %s3373_s13]]  ;;  %s3248_s13 = smov [#allocation4]  }
 0x5a2   : > { %s3176_s26 = sshll.u32 %s3248_s13, 4  ;;  %s3177_s26 = int_to_ptr.vmem [resolvable:$false] %s3176_s26 }
 0x5a3   : > { %s3178_s30 = scalar_lea.vmem %s3177_s26, 32 }
 0x613   : > { %v881_v12 = vpop.xlane.xlu0 %880 }
 0x614   : > { %3132 = vrcp.f32 %v881_v12  ;;  %v1412_v12 = vld [vmem:[%s3897_s14 + $0x48] sm:$0xff] }
 0x618   : > { %v1048_v13 = vpop.xlane.xlu0 %1047 }
 0x619   : > { %3134 = vrcp.f32 %v1048_v13  ;;  %v3017_v13 = vpack.c.bf16 %v1412_v12, %v1411_v11 }
 0x61c   : > { %v885_v14 = vpop.permute.xlu0 %884 }
 0x61d   : > { %2793 = vmatpush3.msra.mxu1 %v885_v14  ;;  %v1413_v14 = vld [vmem:[%s3897_s14 + $0x50] sm:$0xff] }
 0x61e   : > { %v3133_v15 = vpop.eup %3132  ;;  %2802 = vmatprep.subr.mxu1 %v3241_v7 }
 0x61f   : > { %v883_v16 = vmul.f32 %v3133_v15, %v3129_v8  ;;  %v1409_v8 = vld [vmem:[%s3897_s14 + $0x30] sm:$0xff]  ;;  %v1414_v15 = vld [vmem:[%s3897_s14 + $0x58] sm:$0xff] }
 0x621   : > { %2795 = vmatmul.mubr.msk.f32.vlgmr.msra.gmra.mrb[2].mxu1 %vm872_vm6, %v883_v16  ;;  %v3020_v16 = vpack.c.bf16 %v1414_v15, %v1413_v14  ;;  %v2609_v14 = vld [vmem:[%s3891_s8 + $0x20] sm:$0xff]  ;;  %v2610_v15 = vld [vmem:[%s3891_s8 + $0x28] sm:$0xff] }
 0x622   : > { %2803 = vmatpush3.msra.mxu1 %v1052_v20  ;;  %2804 = vmatprep.mubr.msk.f32.mxu1 %vm3242_vm0, %v3241_v7  ;;  %v3023_v20 = vpack.c.bf16 %v1416_v19, %v1415_v18 }
 0x623   : > { %v3135_v21 = vpop.eup %3134  ;;  %2995 = vmatprep.subr.bf16.mxu1 %v3240_v4 }
 0x624   : > { %v1050_v24 = vmul.f32 %v3135_v21, %v3131_v10  ;;  %v3014_v10 = vpack.c.bf16 %v1410_v9, %v1409_v8  ;;  %v1417_v21 = vld [vmem:[%s3897_s14 + $0x70] sm:$0xff] }
 0x626   : > { %2805 = vmatmul.mubr.msk.f32.vlgmr.msra.gmra.mrb[4].mxu1 %vm872_vm6, %v1050_v24 }
 0x627   : > { %2997 = vmatpush3.bf16.msra.mxu1 %v2996_v23  ;;  %2818 = vmatprep.mubr.msk.f32.mxu1 %vm3242_vm0, %v3241_v7  ;;  %v1418_v23 = vld [vmem:[%s3897_s14 + $0x78] sm:$0xff] }
 0x628   : > { %3004 = vmatprep.subr.bf16.mxu1 %v3240_v4  ;;  %v3026_v24 = vpack.c.bf16 %v1418_v23, %v1417_v21 }
 0x6f4   : > { %v956_v28 = vpop.f32.mrb[2].mxu1 }
 0x6f5   : > { %v2796_v29 = vpop.f32.mrb[3].mxu1  ;;  %2819 = vmatmul.mubr.msk.f32.vlgmr.msra.gmra.mrb[6].mxu1 %vm795_vm4, %v956_v28 }
 0x6f6   : > { %2864 = vmatprep.mubr.msk.f32.mxu1 %vm3242_vm0, %v3241_v7  ;;  %3006 = vmatpush3.bf16.msra.mxu1 %v3005_v63 }
 0x6f7   : > { %3007 = vmatprep.subr.bf16.mxu1 %v3240_v4 }
 0x6f9   : > { %v1123_v30 = vpop.f32.mrb[4].mxu1 }
 0x6fa   : > { %v2806_v31 = vpop.f32.mrb[5].mxu1  ;;  %2812 = vmatmul.mubr.msk.f32.vlgmr.msra.gmra.mrb[6].mxu0 %vm795_vm4, %v1123_v30  ;;  %3009 = vmatpush3.bf16.msra.mxu1 %v3008_v2 }
 0x6fb   : > { %2829 = vmatprep.mubr.msk.f32.mxu0 %vm3242_vm0, %v3241_v7  ;;  %3010 = vmatprep.subr.bf16.mxu1 %v3240_v4 }
 0x6fe   : > { %3012 = vmatpush3.bf16.msra.mxu1 %v3011_v6 }
 0x6ff   : > { %3013 = vmatprep.subr.bf16.mxu1 %v3240_v4 }
 0x702   : > { %3015 = vmatpush3.bf16.msra.mxu1 %v3014_v10 }
 0x703   : > { %3016 = vmatprep.subr.bf16.mxu1 %v3240_v4 }
 0x706   : > { %3018 = vmatpush3.bf16.msra.mxu1 %v3017_v13 }
 0x707   : > { %3019 = vmatprep.subr.bf16.mxu1 %v3240_v4 }
 0x70a   : > { %3021 = vmatpush3.bf16.msra.mxu1 %v3020_v16  ;;  %v3038_v16 = vpack.c.bf16 %v2610_v15, %v2609_v14  ;;  %v2637_v15 = vld [vmem:[%s3897_s14 + $0x90] sm:$0xff] }
 0x70b   : > { %3022 = vmatprep.subr.bf16.mxu1 %v3240_v4 }
 0x70e   : > { %3024 = vmatpush3.bf16.msra.mxu1 %v3023_v20 }
 0x70f   : > { %3025 = vmatprep.subr.bf16.mxu1 %v3240_v4 }
 0x712   : > { %3027 = vmatpush3.bf16.msra.mxu1 %v3026_v24 }
 0x713   : > { %3037 = vmatprep.subr.bf16.mxu1 %v3240_v4 }
 0x7c8   : > { %v1269_v32 = vpop.f32.mrb[6].mxu1 }
 0x7c9   : > { %v2820_v33 = vpop.f32.mrb[7].mxu1 }
 0x7cd   : > { %v1196_v34 = vpop.f32.mrb[6].mxu0 }
 0x7ce   : > { %v1270_v35 = vadd.f32 %v1269_v32, %v1196_v34  ;;  %v2813_v36 = vpop.f32.mrb[7].mxu0 }
 0x7d0   : > { %v1273_v38 = vadd.f32 %v1270_v35, %v3449_v22  ;;  %v1312_v22 = vld [vmem:[%s3895_s12 + $0x8] sm:$0xff]  ;;  %v2597_v35 = vld [vmem:[%s3898_s15] ss:$0 sm:$0xff] }
 0x7d1   : > { %v2999_v47 = vpack.c.bf16 %v1312_v22, %v1311_v46  ;;  %v2602_v22 = vld [vmem:[%s3889_s6 + $0x20] sm:$0xff] }
 0x7d2   : > { %v3539_v39 = vadd.f32 %v2591_v37, %v1273_v38 }
 0x7d3   : > { %3000 = vmatpush3.bf16.msra.mxu0 %v2999_v47 }
 0x7d4   : > { %v1284_v40 = vsel %vm675_vm3, %v3539_v39, 0.0  ;;  %3001 = vmatprep.subr.bf16.mxu0 %v3240_v4 }
 0x7d5   : > { %1285 = vadd.xlane.f32.xlu0 %v1284_v40 }
 0x7d7   : > { %3003 = vmatpush3.bf16.msra.mxu0 %v3002_v50  ;;  %v3032_v50 = vpack.c.bf16 %v2605_v49, %v2604_v48 }
 0x7d8   : > { %3028 = vmatprep.subr.bf16.mxu0 %v3240_v4 }
 0x862   : > { %v1286_v41 = vpop.xlane.xlu0 %1285 }
 0x863   : > { %v1287_v42 = vmul.f32 0.03125, %v1286_v41 }
 0x865   : > { %v1288_v43 = vsub.f32 %v3539_v39, %v1287_v42 }
 0x867   : > { %v1289_v44 = vmul.f32 %v1288_v43, %v1288_v43 }
 0x869   : > { %v1290_v45 = vsel %vm675_vm3, %v1289_v44, 0.0 }
 0x86a   : > { %1291 = vadd.xlane.f32.xlu1 %v1290_v45 }
 0x8f7   : > { %v1292_v51 = vpop.xlane.xlu1 %1291 }
 0x8f8   : > { %v1293_v52 = vmul.f32 0.03125, %v1292_v51 }
 0x8fa   : > { %v1294_v53 = vadd.f32 1e-05, %v1293_v52 }
 0x8fc   : > { %3136 = vrsqrt.f32 %v1294_v53 }
 0x906   : > { %v3137_v55 = vpop.eup %3136 }
 0x907   : > { %v1296_v57 = vmul.f32 %v3137_v55, %v1288_v43 }
 0x909   : > { %v1303_v59 = vmul.f32 %v2592_v56, %v1296_v57  ;;  %v2600_v56 = vld [vmem:[%s3887_s4 + $0x1] ss:$0 sm:$0xff] }
 0x90b   : > { %v1310_v60 = vadd.f32 %v2593_v58, %v1303_v59  ;;  %v2601_v58 = vld [vmem:[%s3888_s5 + $0x1] ss:$0 sm:$0xff] }
 0x90d   : > { %2830 = vmatmul.mubr.msk.f32.vlgmr.msra.gmra.mrb[8].mxu0 %vm675_vm3, %v1310_v60 }
 0x90e   : > { %2875 = vmatprep.mubr.msk.f32.mxu0 %vm3242_vm0, %v3241_v7 }
 0x9e0   : > { %v1391_v26 = vpop.f32.mrb[8].mxu0 }
 0x9e1   : > { %v1392_v27 = vadd.f32 %v2594_v25, %v1391_v26  ;;  %v2831_v28 = vpop.f32.mrb[9].mxu0 }
 0x9e3   : > { %v2596_v29 = vmul.f32 -1.702, %v1392_v27 }
 0x9e5   : > { %v1397_v30 = vmul.f32 1.442695, %v2596_v29 }
 0x9e7   : > { %3138 = vpow2.f32 %v1397_v30 }
 0x9f1   : > { %v3139_v31 = vpop.eup %3138 }
 0x9f2   : > { %v1399_v32 = vadd.f32 1.0, %v3139_v31 }
 0x9f4   : > { %3140 = vrcp.f32 %v1399_v32 }
 0x9fe   : > { %v3141_v33 = vpop.eup %3140 }
 0x9ff   : > { %v1402_v34 = vmul.f32 %v3141_v33, %v1392_v27 }
 0xa01   : > { %2865 = vmatmul.mubr.f32.vlgmr.msra.gmra.mrb[8].mxu1 %v1402_v34 }
 0xa02   : > { %2909 = vmatprep.mubr.msk.f32.mxu1 %vm3242_vm0, %v3241_v7  ;;  %3039 = vmatpush3.bf16.msra.mxu1 %v3038_v16  ;;  %v2638_v16 = vld [vmem:[%s3897_s14 + $0x98] sm:$0xff] }
 0xa03   : > { %3046 = vmatprep.subr.bf16.mxu1 %v3240_v4 }
 0xad4   : > { %v1492_v36 = vpop.f32.mrb[8].mxu1 }
 0xad5   : > { %v1493_v37 = vadd.f32 %v2597_v35, %v1492_v36  ;;  %v2866_v38 = vpop.f32.mrb[9].mxu1 }
 0xad7   : > { %v3633_v40 = vadd.f32 %v1493_v37, %v3539_v39  ;;  %v2603_v39 = vld [vmem:[%s3889_s6 + $0x28] sm:$0xff] }
 0xad8   : > { %v3029_v47 = vpack.c.bf16 %v2603_v39, %v2602_v22 }
 0xad9   : > { %v1501_v41 = vsel %vm675_vm3, %v3633_v40, 0.0 }
 0xada   : > { %1502 = vadd.xlane.f32.xlu0 %v1501_v41  ;;  %3030 = vmatpush3.bf16.msra.mxu0 %v3029_v47 }
 0xadb   : > { %3031 = vmatprep.subr.bf16.mxu0 %v3240_v4 }
 0xade   : > { %3033 = vmatpush3.bf16.msra.mxu0 %v3032_v50  ;;  %v2622_v50 = vld [vmem:[%s3892_s9 + $0x1] ss:$0 sm:$0xff] }
 0xadf   : > { %2878 = vmatprep.subr.mxu0 %v3241_v7 }
 0xb67   : > { %v1503_v42 = vpop.xlane.xlu0 %1502 }
 0xb68   : > { %v1504_v43 = vmul.f32 0.03125, %v1503_v42  ;;  %v2611_v42 = vld [vmem:[%s3891_s8 + $0x30] sm:$0xff] }
 0xb6a   : > { %v1505_v44 = vsub.f32 %v3633_v40, %v1504_v43  ;;  %v2612_v43 = vld [vmem:[%s3891_s8 + $0x38] sm:$0xff] }
 0xb6c   : > { %v1506_v45 = vmul.f32 %v1505_v44, %v1505_v44 }
 0xb6e   : > { %v1507_v46 = vsel %vm675_vm3, %v1506_v45, 0.0  ;;  %v3035_v45 = vpack.c.bf16 %v2612_v43, %v2611_v42 }
 0xb6f   : > { %1508 = vadd.xlane.f32.xlu0 %v1507_v46 }
 0xbfc   : > { %v1509_v51 = vpop.xlane.xlu0 %1508 }
 0xbfd   : > { %v1510_v52 = vmul.f32 0.03125, %v1509_v51 }
 0xbff   : > { %v1511_v53 = vadd.f32 1e-05, %v1510_v52 }
 0xc01   : > { %3142 = vrsqrt.f32 %v1511_v53 }
 0xc0b   : > { %v3143_v55 = vpop.eup %3142 }
 0xc0c   : > { %v1513_v57 = vmul.f32 %v3143_v55, %v1505_v44 }
 0xc0e   : > { %v1520_v59 = vmul.f32 %v2600_v56, %v1513_v57 }
 0xc10   : > { %v1527_v60 = vadd.f32 %v2601_v58, %v1520_v59 }
 0xc12   : > { %2876 = vmatmul.mubr.msk.f32.vlgmr.msra.gmra.mrb[10].mxu0 %vm675_vm3, %v1527_v60  ;;  %v2627_v60 = vld [vmem:[%s3895_s12 + $0x20] sm:$0xff] }
 0xc13   : > { %2880 = vmatprep.mubr.msk.f32.mxu0 %vm3242_vm0, %v3241_v7 }
 0xce5   : > { %v1610_v62 = vpop.f32.mrb[10].mxu0 }
 0xce6   : > { %v1611_v63 = vadd.f32 %v2607_v61, %v1610_v62  ;;  %v2877_v0 = vpop.f32.mrb[11].mxu0  ;;  %v2629_v62 = vld [vmem:[%s3895_s12 + $0x30] sm:$0xff] }
 0xce8   : > { %1620 = vrot.lane.b32.xlu0 %v1611_v63, %s3243_s23  ;;  %s3931_s23 = smov 64  }
 0xcec   : > { %1787 = vrot.lane.b32.xlu0 %v1611_v63, %s3244_s28 }
 0xcf0   : > { %1785 = vrot.lane.b32.xlu0 %v1611_v63, %s3930_s20  ;;  %s3841_s20 = scalar_lea.hbm %s3902_s19, %s2656_s22 }
 0xd5a   : > { %v1621_v1 = vpop.permute.xlu0 %1620 }
 0xd5b   : > { %2879 = vmatpush3.xpose.msk.msra.mxu0 %vm795_vm4, %v1621_v1 }
 0xd5c   : > { %2883 = vmatprep.subr.mxu0 %v3241_v7 }
 0xd5e   : > { %2881 = vmatmul.mubr.msk.f32.vlgmr.msra.gmra.mrb[12].mxu0 %vm795_vm4, %v1611_v63  ;;  %v1788_v21 = vpop.permute.xlu0 %1787 }
 0xd5f   : > { %2885 = vmatprep.mubr.msk.f32.mxu0 %vm3242_vm0, %v3241_v7 }
 0xd62   : > { %v1786_v24 = vpop.permute.xlu0 %1785 }
 0xe31   : > { %v1692_v2 = vpop.f32.mrb[12].mxu0 }
 0xe32   : > { %v1696_v3 = vmul.f32 0.25, %v1692_v2  ;;  %v2882_v5 = vpop.f32.mrb[13].mxu0 }
 0xe34   : > { %v1697_v6 = vadd.f32 %v1696_v3, %v3497_v54 }
 0xe36   : > { %v1698_v8 = vsel %vm872_vm6, %v1697_v6, -inf }
 0xe37   : > { %1699 = vmax.xlane.f32.xlu1 %v1698_v8 }
 0xec4   : > { %v1700_v9 = vpop.xlane.xlu1 %1699 }
 0xec5   : > { %v1701_v10 = vsub.f32 %v1697_v6, %v1700_v9  ;;  %v2625_v6 = vld [vmem:[%s3893_s10 + $0x1] ss:$0 sm:$0xff] }
 0xec6   : > { %v2626_v9 = vld [vmem:[%s3894_s11 + $0x1] ss:$0 sm:$0xff] }
 0xec7   : > { %v1702_v11 = vmul.f32 1.442695, %v1701_v10 }
 0xec9   : > { %3144 = vpow2.f32 %v1702_v11 }
 0xed3   : > { %v3145_v12 = vpop.eup %3144 }
 0xed4   : > { %v1704_v13 = vsel %vm872_vm6, %v3145_v12, 0.0 }
 0xed5   : > { %1705 = vadd.xlane.f32.xlu1 %v1704_v13  ;;  %v2636_v13 = vld [vmem:[%s3897_s14 + $0x88] sm:$0xff] }
 0xee6   : > { %1709 = vrot.lane.b32.xlu1 %v1611_v63, %s3931_s23  ;;  %s2505_s23 = scalar_lea.sflag [#allocation5], %s571_s27 }
 0xf62   : > { %v1706_v18 = vpop.xlane.xlu1 %1705 }
 0xf63   : > { %3146 = vrcp.f32 %v1706_v18  ;;  %v3050_v18 = vpack.c.bf16 %v2638_v16, %v2637_v15 }
 0xf66   : > { %v1710_v19 = vpop.permute.xlu1 %1709 }
 0xf67   : > { %2884 = vmatpush3.msra.mxu0 %v1710_v19  ;;  %v2639_v19 = vld [vmem:[%s3897_s14 + $0xa0] sm:$0xff] }
 0xf68   : > { %2888 = vmatprep.subr.mxu0 %v3241_v7 }
 0xf6d   : > { %v3147_v20 = vpop.eup %3146 }
 0xf6e   : > { %v1708_v23 = vmul.f32 %v3147_v20, %v3145_v12  ;;  %v2635_v12 = vld [vmem:[%s3897_s14 + $0x80] sm:$0xff]  ;;  %v2640_v20 = vld [vmem:[%s3897_s14 + $0xa8] sm:$0xff] }
 0xf6f   : > { %v3047_v14 = vpack.c.bf16 %v2636_v13, %v2635_v12 }
 0xf70   : > { %2886 = vmatmul.mubr.msk.f32.vlgmr.msra.gmra.mrb[14].mxu0 %vm872_vm6, %v1708_v23  ;;  %v2641_v23 = vld [vmem:[%s3897_s14 + $0xb0] sm:$0xff] }
 0xf71   : > { %2889 = vmatpush3.xpose.msk.msra.mxu0 %vm795_vm4, %v1788_v21  ;;  %2890 = vmatprep.mubr.msk.f32.mxu0 %vm3242_vm0, %v3241_v7  ;;  %v3053_v21 = vpack.c.bf16 %v2640_v20, %v2639_v19 }
 0xf72   : > { %2893 = vmatprep.subr.mxu0 %v3241_v7 }
 0xf74   : > { %2891 = vmatmul.mubr.msk.f32.vlgmr.msra.gmra.mrb[16].mxu0 %vm795_vm4, %v1786_v24  ;;  %v2642_v24 = vld [vmem:[%s3897_s14 + $0xb8] sm:$0xff] }
 0xf75   : > { %2895 = vmatprep.mubr.msk.f32.mxu0 %vm3242_vm0, %v3241_v7 }
0x1043   : > { %v1781_v25 = vpop.f32.mrb[14].mxu0 }
0x1044   : > { %v2887_v26 = vpop.f32.mrb[15].mxu0  ;;  %2910 = vmatmul.mubr.msk.f32.vlgmr.msra.gmra.mrb[10].mxu1 %vm795_vm4, %v1781_v25  ;;  %v3056_v25 = vpack.c.bf16 %v2642_v24, %v2641_v23 }
0x1045   : > { %2955 = vmatprep.mubr.msk.f32.mxu1 %vm3242_vm0, %v3241_v7  ;;  %3048 = vmatpush3.bf16.msra.mxu1 %v3047_v14  ;;  %v2643_v26 = vld [vmem:[%s3897_s14 + $0xc0] sm:$0xff] }
0x1046   : > { %3049 = vmatprep.subr.bf16.mxu1 %v3240_v4 }
0x1047   : > { %v1859_v27 = vpop.f32.mrb[16].mxu0 }
0x1048   : > { %v1863_v28 = vmul.f32 0.25, %v1859_v27  ;;  %v2892_v29 = vpop.f32.mrb[17].mxu0  ;;  %v2644_v27 = vld [vmem:[%s3897_s14 + $0xc8] sm:$0xff] }
0x1049   : > { %3051 = vmatpush3.bf16.msra.mxu1 %v3050_v18  ;;  %v2645_v29 = vld [vmem:[%s3897_s14 + $0xd0] sm:$0xff] }
0x104a   : > { %v1864_v30 = vadd.f32 %v1863_v28, %v3497_v54  ;;  %3052 = vmatprep.subr.bf16.mxu1 %v3240_v4  ;;  %v3059_v28 = vpack.c.bf16 %v2644_v27, %v2643_v26 }
0x104c   : > { %v1865_v31 = vsel %vm872_vm6, %v1864_v30, -inf }
0x104d   : > { %1866 = vmax.xlane.f32.xlu0 %v1865_v31  ;;  %3054 = vmatpush3.bf16.msra.mxu1 %v3053_v21 }
0x104e   : > { %3055 = vmatprep.subr.bf16.mxu1 %v3240_v4 }
0x1051   : > { %3057 = vmatpush3.bf16.msra.mxu1 %v3056_v25 }
0x1052   : > { %3058 = vmatprep.subr.bf16.mxu1 %v3240_v4 }
0x1055   : > { %3060 = vmatpush3.bf16.msra.mxu1 %v3059_v28 }
0x1056   : > { %3061 = vmatprep.subr.bf16.mxu1 %v3240_v4 }
0x1063   : > { %1876 = vrot.lane.b32.xlu0 %v1611_v63, %s3932_s3  ;;  %v2630_v63 = vld [vmem:[%s3895_s12 + $0x38] sm:$0xff]  ;;  %s572_s3 = scalar_lea.vmem [#allocation4], %s571_s27 }
0x1064   : > { %v3044_v0 = vpack.c.bf16 %v2630_v63, %v2629_v62  ;;  %v2426_v62 = vld [vmem:[%s3901_s18 + $0x8] sm:$0xff]  ;;  %v2427_v63 = vld [vmem:[%s3901_s18 + $0x10] sm:$0xff]  ;;  %s2517_s1 = sshll.u32 %s572_s3, 4  ;;  %s3843_s1 = int_to_ptr.vmem [resolvable:$true] %s2517_s1 }
0x1065   : > { %s3172_s28 = scalar_lea.vmem %s3843_s1, 16  ;;  %p3179_p5 = scmp.lt.s32.totalorder %s3843_s1, %s3177_s26 }
0x1066   : > { %p3173_p2 = scmp.ne.s32.totalorder %s3843_s1, %s3172_s28  ;;  %p3180_p6 = scmp.lt.s32.totalorder %s3178_s30, %s3172_s28 }
0x1068   : > { %p3174_p3 = pnand %p3173_p2, %p3390_p10  ;;  %p3181_p7 = por %p3180_p6, %p3179_p5 }
0x106a   : > { %p3175_p4 = pneg %p3174_p3 }
0x106c   : > { %p3182_p8 = pnand %p3181_p7, %p3175_p4 }
0x10da   : > { %v1867_v32 = vpop.xlane.xlu0 %1866 }
0x10db   : > { %v1868_v33 = vsub.f32 %v1864_v30, %v1867_v32  ;;  %v2646_v30 = vld [vmem:[%s3897_s14 + $0xd8] sm:$0xff]  ;;  %v2647_v32 = vld [vmem:[%s3897_s14 + $0xe0] sm:$0xff] }
0x10dc   : > { %v3062_v31 = vpack.c.bf16 %v2646_v30, %v2645_v29 }
0x10dd   : > { %v1869_v34 = vmul.f32 1.442695, %v1868_v33  ;;  %v2648_v33 = vld [vmem:[%s3897_s14 + $0xe8] sm:$0xff] }
0x10de   : > { %v1877_v35 = vpop.permute.xlu0 %1876  ;;  %3063 = vmatpush3.bf16.msra.mxu1 %v3062_v31 }
0x10df   : > { %3148 = vpow2.f32 %v1869_v34  ;;  %2894 = vmatpush3.msra.mxu0 %v1877_v35  ;;  %3064 = vmatprep.subr.bf16.mxu1 %v3240_v4  ;;  %v3065_v34 = vpack.c.bf16 %v2648_v33, %v2647_v32  ;;  %v2649_v35 = vld [vmem:[%s3897_s14 + $0xf0] sm:$0xff] }
0x10e0   : > { %3034 = vmatprep.subr.bf16.mxu0 %v3240_v4 }
0x10e2   : > { %3066 = vmatpush3.bf16.msra.mxu1 %v3065_v34 }
0x10e3   : > { %3067 = vmatprep.subr.bf16.mxu1 %v3240_v4 }
0x10e9   : > { %v3149_v36 = vpop.eup %3148 }
0x10ea   : > { %v1871_v37 = vsel %vm872_vm6, %v3149_v36, 0.0 }
0x10eb   : > { %1872 = vadd.xlane.f32.xlu1 %v1871_v37 }
0x1117   : > { %v2094_v38 = vpop.f32.mrb[10].mxu1 }
0x1118   : > { %v2911_v41 = vpop.f32.mrb[11].mxu1 }
0x1178   : > { %v1873_v54 = vpop.xlane.xlu1 %1872 }
0x1179   : > { %3150 = vrcp.f32 %v1873_v54 }
0x1183   : > { %v3151_v44 = vpop.eup %3150 }
0x1184   : > { %v1875_v46 = vmul.f32 %v3151_v44, %v3149_v36  ;;  %v2650_v36 = vld [vmem:[%s3897_s14 + $0xf8] sm:$0xff] }
0x1185   : > { %v3068_v37 = vpack.c.bf16 %v2650_v36, %v2649_v35 }
0x1186   : > { %2896 = vmatmul.mubr.msk.f32.vlgmr.msra.gmra.mrb[18].mxu0 %vm872_vm6, %v1875_v46 }
0x1187   : > { %3036 = vmatpush3.bf16.msra.mxu0 %v3035_v45  ;;  %2902 = vmatprep.mubr.msk.f32.mxu0 %vm3242_vm0, %v3241_v7 }
0x1188   : > { %3040 = vmatprep.subr.bf16.mxu0 %v3240_v4  ;;  %3069 = vmatpush3.bf16.msra.mxu1 %v3068_v37 }
0x1259   : > { %v1948_v22 = vpop.f32.mrb[18].mxu0 }
0x125a   : > { %v2897_v39 = vpop.f32.mrb[19].mxu0  ;;  %2903 = vmatmul.mubr.msk.f32.vlgmr.msra.gmra.mrb[20].mxu0 %vm795_vm4, %v1948_v22 }
0x125b   : > { %2920 = vmatprep.mubr.msk.f32.mxu0 %vm3242_vm0, %v3241_v7 }
0x132d   : > { %v2021_v47 = vpop.f32.mrb[20].mxu0 }
0x132e   : > { %v2095_v48 = vadd.f32 %v2094_v38, %v2021_v47  ;;  %v2904_v49 = vpop.f32.mrb[21].mxu0  ;;  %v2632_v38 = vld [vmem:[%s3929_s0 + $0x1] ss:$0 sm:$0xff]  ;;  %v2330_v47 = vstv %s2329_s25 }
0x132f   : > { %vm2331_vm7 = vcmp.eq.s32.totalorder %v3440_v17, %v2330_v47 }
0x1330   : > { %v2098_v51 = vadd.f32 %v2095_v48, %v3633_v40  ;;  %v2628_v40 = vld [vmem:[%s3895_s12 + $0x28] sm:$0xff]  ;;  %v2652_v48 = vld [vmem:[%s3898_s15 + $0x1] ss:$0 sm:$0xff] }
0x1331   : > { %v3041_v61 = vpack.c.bf16 %v2628_v40, %v2627_v60 }
0x1332   : > { %v3718_v52 = vadd.f32 %v2622_v50, %v2098_v51 }
0x1333   : > { %3042 = vmatpush3.bf16.msra.mxu0 %v3041_v61  ;;  %v2425_v61 = vld [vmem:[%s3901_s18] sm:$0xff] }
0x1334   : > { %v2112_v53 = vsel %vm675_vm3, %v3718_v52, 0.0  ;;  %3043 = vmatprep.subr.bf16.mxu0 %v3240_v4 }
0x1335   : > { %2113 = vadd.xlane.f32.xlu1 %v2112_v53 }
0x1337   : > { %3045 = vmatpush3.bf16.msra.mxu0 %v3044_v0  ;;  %v2428_v0 = vld [vmem:[%s3901_s18 + $0x18] sm:$0xff] }
0x1338   : > { %2958 = vmatprep.subr.mxu0 %v3241_v7 }
0x13c2   : > { %v2114_v55 = vpop.xlane.xlu1 %2113 }
0x13c3   : > { %v2115_v56 = vmul.f32 0.03125, %v2114_v55  ;;  %v2653_v55 = vsel %vm2331_vm7, 1.0, %v3241_v7 }
0x13c5   : > { %v2116_v57 = vsub.f32 %v3718_v52, %v2115_v56 }
0x13c7   : > { %v2117_v58 = vmul.f32 %v2116_v57, %v2116_v57 }
0x13c9   : > { %v2118_v59 = vsel %vm675_vm3, %v2117_v58, 0.0 }
0x13ca   : > { %2119 = vadd.xlane.f32.xlu1 %v2118_v59 }
0x1457   : > { %v2120_v1 = vpop.xlane.xlu1 %2119 }
0x1458   : > { %v2121_v2 = vmul.f32 0.03125, %v2120_v1  ;;  %v3074_v1 = vpack.c.bf16 %v2428_v0, %v2427_v63 }
0x145a   : > { %v2122_v3 = vadd.f32 1e-05, %v2121_v2 }
0x145c   : > { %3152 = vrsqrt.f32 %v2122_v3 }
0x1466   : > { %v3153_v5 = vpop.eup %3152 }
0x1467   : > { %v2124_v8 = vmul.f32 %v3153_v5, %v2116_v57 }
0x1469   : > { %v2131_v10 = vmul.f32 %v2625_v6, %v2124_v8 }
0x146b   : > { %v2138_v11 = vadd.f32 %v2626_v9, %v2131_v10  ;;  %v2408_v9 = vld [vmem:[%s3900_s17] sm:$0x1] }
0x146d   : > { %2921 = vmatmul.mubr.msk.f32.vlgmr.msra.gmra.mrb[22].mxu0 %vm675_vm3, %v2138_v11 }
0x146e   : > { %2960 = vmatprep.mubr.msk.f32.mxu0 %vm3242_vm0, %v3241_v7 }
0x1540   : > { %v2221_v41 = vpop.f32.mrb[22].mxu0 }
0x1541   : > { %v2222_v54 = vadd.f32 %v2632_v38, %v2221_v41  ;;  %v2922_v42 = vpop.f32.mrb[23].mxu0 }
0x1543   : > { %v2634_v43 = vmul.f32 -1.702, %v2222_v54 }
0x1545   : > { %v2227_v44 = vmul.f32 1.442695, %v2634_v43 }
0x1547   : > { %3154 = vpow2.f32 %v2227_v44 }
0x1551   : > { %v3155_v45 = vpop.eup %3154 }
0x1552   : > { %v2229_v46 = vadd.f32 1.0, %v3155_v45 }
0x1554   : > { %3156 = vrcp.f32 %v2229_v46 }
0x155e   : > { %v3157_v22 = vpop.eup %3156 }
0x155f   : > { %v2232_v39 = vmul.f32 %v3157_v22, %v2222_v54 }
0x1561   : > { %2956 = vmatmul.mubr.f32.vlgmr.msra.gmra.mrb[12].mxu1 %v2232_v39 }
0x1634   : > { %v2324_v49 = vpop.f32.mrb[12].mxu1 }
0x1635   : > { %v2325_v50 = vadd.f32 %v2652_v48, %v2324_v49  ;;  %v2957_v51 = vpop.f32.mrb[13].mxu1 }
0x1637   : > { %v2328_v53 = vadd.f32 %v2325_v50, %v3718_v52 }
0x1639   : > { %2959 = vmatpush3.msra.mxu0 %v2328_v53 }
0x163a   : > { %2961 = vmatmul.mubr.msk.f32.vlgmr.msra.gmra.mrb[24].mxu0 %vm872_vm6, %v2653_v55  ;;  %3070 = vmatprep.subr.bf16.mxu0 %v3240_v4 }
0x163b   : > { %2971 = vmatprep.mubr.msk.f32.mxu0 %vm3242_vm0, %v3241_v7  ;;  %v3071_v7 = vpack.c.bf16 %v2426_v62, %v2425_v61 }
0x163d   : > { %3072 = vmatpush3.bf16.msra.mxu0 %v3071_v7 }
0x163e   : > { %3073 = vmatprep.subr.bf16.mxu0 %v3240_v4  ;;  %v2407_v4 = vld [vmem:[%s3899_s16] sm:$0x1] }
0x1641   : > { %3075 = vmatpush3.bf16.msra.mxu0 %v3074_v1 }
0x170d   : > { %v2403_v56 = vpop.f32.mrb[24].mxu0 }
0x170e   : > { %v2410_v57 = vsel %vm2409_vm8, %v2403_v56, 0.0  ;;  %v2962_v58 = vpop.f32.mrb[25].mxu0 }
0x170f   : > { %2411 = vadd.xlane.f32.xlu1 %v2410_v57 }
0x179c   : > { %v2412_v17 = vpop.xlane.xlu1 %2411 }
0x179d   : > { %v2413_v59 = vmul.f32 0.03125, %v2412_v17 }
0x179f   : > { %v2414_v60 = vsub.f32 %v2403_v56, %v2413_v59 }
0x17a1   : > { %v2415_v40 = vmul.f32 %v2414_v60, %v2414_v60 }
0x17a3   : > { %v2416_v52 = vsel %vm2409_vm8, %v2415_v40, 0.0 }
0x17a4   : > { %2417 = vadd.xlane.f32.xlu0 %v2416_v52 }
0x1831   : > { %v2418_v2 = vpop.xlane.xlu0 %2417 }
0x1832   : > { %v2419_v3 = vmul.f32 0.03125, %v2418_v2 }
0x1834   : > { %v2420_v5 = vadd.f32 1e-05, %v2419_v3 }
0x1836   : > { %3158 = vrsqrt.f32 %v2420_v5 }
0x1840   : > { %v3159_v6 = vpop.eup %3158 }
0x1841   : > { %v2422_v8 = vmul.f32 %v3159_v6, %v2414_v60 }
0x1843   : > { %v2423_v10 = vmul.f32 %v2422_v8, %v2407_v4 }
0x1845   : > { %v2424_v11 = vadd.f32 %v2423_v10, %v2408_v9 }
0x1847   : > { %2972 = vmatmul.mubr.msk.f32.vlgmr.msra.gmra.mrb[26].mxu0 %vm675_vm3, %v2424_v11 }
0x191a   : > { %v2498_v12 = vpop.f32.mrb[26].mxu0 }
0x191b   : > { %2503 = vst.msk [vmem:[%s572_s3] sm:$0x1] %vm2502_vm9, %v2498_v12  ;;  %v2973_v13 = vpop.f32.mrb[27].mxu0 }
0x191c   : > { %3185 = shalt.err (!%p3182_p8)
}
0x191d   : > { %s3186_s27 = scalar_lea.hbm %s3841_s20, 16  ;;  %s3190_s25 = scalar_lea.hbm %s3902_s19, 32 }
0x191e   : > { %p3187_p9 = scmp.ne.s32.totalorder %s3841_s20, %s3186_s27  ;;  %p3191_p0 = scmp.lt.u32.totalorder %s3841_s20, %s3902_s19 }
0x191f   : > { %p3192_p1 = scmp.lt.u32.totalorder %s3190_s25, %s3186_s27  ;;  %p3194_p3 = scmp.lt.u32.totalorder %s3186_s27, %s3841_s20 }
0x1920   : > { %p3188_p12 = pnand %p3187_p9, %p3390_p10 }
0x1921   : > { %p3193_p2 = por %p3192_p1, %p3191_p0 }
0x1922   : > { %p3189_p13 = pneg %p3188_p12 }
0x1923   : > { %p3195_p4 = por %p3194_p3, %p3193_p2 }
0x1925   : > { %p3196_p5 = pnand %p3195_p4, %p3189_p13 }
0x1927   : > { %3199 = shalt.err (!%p3196_p5)
}
0x1928   : > { %3076 = dma.vmem_to_hbm [thread:$0]  (%p3390_p10), %s3843_s1, 16, %s3841_s20, %s2505_s23  }
0x1929 PF: > { %s3933_s28 = sld [smem:[#allocation8_spill]]  ;;  %p3082_p6 = scmp.ge.s32.totalorder %s3236_s24, 2 }
0x192b   : > { %p3079_p7 = pnand %p3082_p6, %p3394_p11 }
0x192f   : > { %s2529_s22 = sand.u32 1, %s3933_s28  }
0x1930   : > { %s2530_s3 = scalar_lea.sflag [#allocation5], %s2529_s22 }
0x1931   : > { %3219 = dma.done.wait (!%p3079_p7), %s2530_s3, 16  }
0x1932   : > { %3221 = vsyncadd (!%p3079_p7), %s2530_s3, 4294967280  ;;  %s3935_s24 = sld [smem:[#allocation10_spill]]  ;;  %s3936_s27 = sld [smem:[#allocation9_spill]] }
0x1933   : > { %s3937_s23 = sld [smem:[#allocation11_spill]]  ;;  %s3938_s22 = smov %s3228_s2 }
0x1938   : > { %p35_p8 = scmp.ge.s32.totalorder %s3935_s24, 4   ;;  %s3939_s2 = smov %s3936_s27 }
0x193a   :  { %37 = sbr.rel (!%p35_p8) target bundleno = 25 (0x19), region = 139 }
0x1941   :  { %2534 = vsyncpa [#allocation5], 1 }
0x1942   :  { %2536 = vsyncpa [#allocation5 + $0x1], 1 }

</bundles_post_ra>
